<compile_context>
chip_gen: v6e
topology: v6e:2x2x1
jax: 0.10.0
libtpu: 0.0.40
codegen_flags: <defaults>
</compile_context>

<pallas_src>
import jax
import jax.numpy as jnp
from jax.experimental import pallas as pl
from jax.experimental.pallas import tpu as pltpu


def _mlp_head_kernel_single(x_ref, w1_ref, b1_ref, w2_ref, b2_ref, o_ref):
    # One grid step: the whole hidden dim is resident.  bf16 x bf16 on the MXU
    # with f32 accumulation; bias/ReLU in f32 on the VPU; the second matmul keeps
    # h in f32 (mem-bound kernel => the slower f32 MXU path costs nothing).
    h = jnp.dot(x_ref[...], w1_ref[...], preferred_element_type=jnp.float32)
    h = jnp.maximum(h + b1_ref[...], 0.0)
    o_ref[...] = (jnp.dot(h, w2_ref[...].astype(jnp.float32),
                          preferred_element_type=jnp.float32) + b2_ref[...])


def _mlp_head_kernel_tiled(x_ref, w1_ref, b1_ref, w2_ref, b2_ref, o_ref):
    # Hidden dim tiled (reduction axis): accumulate the partial contraction
    # directly into the grid-invariant f32 output block (resident in VMEM).
    k = pl.program_id(0)
    h = jnp.dot(x_ref[...], w1_ref[...], preferred_element_type=jnp.float32)
    h = jnp.maximum(h + b1_ref[...], 0.0)
    partial = jnp.dot(h, w2_ref[...].astype(jnp.float32),
                      preferred_element_type=jnp.float32)

    @pl.when(k == 0)
    def _init():
        o_ref[...] = partial + b2_ref[...]

    @pl.when(k > 0)
    def _accum():
        o_ref[...] += partial


def _pick_hidden_tile(H, dim_in, dim_out, itemsize, budget_bytes=12 << 20):
    """Largest hidden chunk whose double-buffered streamed blocks fit the budget."""
    def chunk_bytes(t):
        # W1 chunk + W2 chunk (stream dtype) + b1 chunk (f32)
        return (dim_in * t + t * dim_out) * itemsize + t * 4

    if 2 * chunk_bytes(H) <= budget_bytes:
        return H                      # single step: no reduction grid needed
    best = None
    for t in range(128, H, 128):      # divisor of H, multiple of 128, fits budget
        if H % t == 0 and 2 * chunk_bytes(t) <= budget_bytes:
            best = t
    if best is None:
        # TODO(synk): hidden dims with no fitting 128-multiple divisor would need a
        # masked last tile; fall back to a single (VMEM-hungry) step for now.
        return H
    return best


def projection_head_forward(x, w1, b1, w2, b2, *, stream_dtype=jnp.bfloat16,
                            hidden_tile=None):
    """x: [B, dim_in]; w1: [dim_in, H]; b1: [1, H]; w2: [H, dim_out]; b2: [1, dim_out].

    Weights are expected to already be stored in `stream_dtype` (see
    make_projection_head_params) so the casts below are no-ops and the bf16
    byte reduction is not paid back as an extra HBM round trip per call.
    """
    B, dim_in = x.shape
    H = w1.shape[1]
    dim_out = w2.shape[1]

    xq = x.astype(stream_dtype)
    w1q = w1.astype(stream_dtype)
    w2q = w2.astype(stream_dtype)
    b1f = b1.astype(jnp.float32)
    b2f = b2.astype(jnp.float32)

    itemsize = jnp.dtype(stream_dtype).itemsize
    if hidden_tile is None:
        hidden_tile = _pick_hidden_tile(H, dim_in, dim_out, itemsize)
    assert H % hidden_tile == 0, "hidden dim must divide by hidden_tile"
    nk = H // hidden_tile

    kernel = _mlp_head_kernel_single if nk == 1 else _mlp_head_kernel_tiled

    cost = pl.CostEstimate(
        flops=2 * B * dim_in * H + 2 * B * H * dim_out,
        transcendentals=0,
        bytes_accessed=(B * dim_in * itemsize        # x
                        + dim_in * H * itemsize      # W1
                        + H * 4                      # b1 (f32)
                        + H * dim_out * itemsize     # W2
                        + dim_out * 4                # b2 (f32)
                        + B * dim_out * 4),          # out (f32)
    )

    # Explicit VMEM budget: double-buffered streamed blocks + resident x/b2/out
    # + f32 hidden activation, with headroom.  Clamped so it is valid on v5e
    # (16 MiB default scoped) and well under v7x's 64 MiB physical VMEM.
    step_in_bytes = (dim_in * hidden_tile + hidden_tile * dim_out) * itemsize \
        + hidden_tile * 4
    resident_bytes = (B * dim_in * itemsize + dim_out * 4 + B * dim_out * 4
                      + B * hidden_tile * 4)
    vmem_limit = int(min(max(2 * step_in_bytes + resident_bytes + (4 << 20),
                             16 << 20), 48 << 20))

    out = pl.pallas_call(
        kernel,
        out_shape=jax.ShapeDtypeStruct((B, dim_out), jnp.float32),
        grid_spec=pltpu.PrefetchScalarGridSpec(
            num_scalar_prefetch=0,
            grid=(nk,),
            in_specs=[
                pl.BlockSpec((B, dim_in), lambda k: (0, 0)),               # x (resident)
                pl.BlockSpec((dim_in, hidden_tile), lambda k: (0, k)),     # W1 chunk
                pl.BlockSpec((1, hidden_tile), lambda k: (0, k)),          # b1 chunk
                pl.BlockSpec((hidden_tile, dim_out), lambda k: (k, 0)),    # W2 chunk
                pl.BlockSpec((1, dim_out), lambda k: (0, 0)),              # b2 (constant)
            ],
            out_specs=pl.BlockSpec((B, dim_out), lambda k: (0, 0)),
        ),
        compiler_params=pltpu.CompilerParams(
            # Hidden axis is a reduction ("arbitrary").  On v7x this leaves one TC
            # idle, which is correct for a weight-streaming-bound kernel.
            dimension_semantics=("arbitrary",),
            vmem_limit_bytes=vmem_limit,
        ),
        cost_estimate=cost,
    )(xq, w1q, b1f, w2q, b2f)

    return out.astype(x.dtype)


def make_projection_head_params(key, dim_in, dim_out, hidden_dim=None,
                                stream_dtype=jnp.bfloat16):
    """Deterministic synthetic params matching ProjectionHead.__init__ shapes.

    Weights are returned already cast to `stream_dtype` (amortized, one-time
    cast) so the per-call forward streams half the HBM bytes with no extra
    convert round trip.  Biases stay f32 (tiny, added in the f32 epilogue).
    """
    if hidden_dim is None:
        hidden_dim = dim_in * 2
    hidden_dim = max(hidden_dim, 4096)   # same rule as the PyTorch module

    k1, k2, k3, k4 = jax.random.split(key, 4)
    # Kaiming-uniform-ish scaling like nn.Linear default init.
    lim1 = 1.0 / jnp.sqrt(dim_in)
    lim2 = 1.0 / jnp.sqrt(hidden_dim)
    w1 = jax.random.uniform(k1, (dim_in, hidden_dim), jnp.float32, -lim1, lim1)
    b1 = jax.random.uniform(k2, (1, hidden_dim), jnp.float32, -lim1, lim1)
    w2 = jax.random.uniform(k3, (hidden_dim, dim_out), jnp.float32, -lim2, lim2)
    b2 = jax.random.uniform(k4, (1, dim_out), jnp.float32, -lim2, lim2)
    return w1.astype(stream_dtype), b1, w2.astype(stream_dtype), b2


if __name__ == "__main__":
    # Small shapes consistent with the module (hidden is forced to >= 4096).
    B, dim_in, dim_out = 8, 256, 64

    key = jax.random.PRNGKey(0)
    kx, kp = jax.random.split(key)
    x = jax.random.normal(kx, (B, dim_in), jnp.float32)
    w1, b1, w2, b2 = make_projection_head_params(kp, dim_in, dim_out)

    # Default path: weights fit VMEM budget -> single grid step.
    out = projection_head_forward(x, w1, b1, w2, b2)
    out = jax.block_until_ready(out)
    assert out.shape == (B, dim_out)

    # Reference mirroring the kernel numerics: bf16 x / bf16 weights, f32 math.
    xf = x.astype(jnp.bfloat16).astype(jnp.float32)
    w1f = w1.astype(jnp.float32)
    w2f = w2.astype(jnp.float32)
    h_ref = jnp.maximum(xf @ w1f + b1, 0.0)
    ref = h_ref @ w2f + b2
    assert jnp.allclose(out, ref, atol=1e-2, rtol=1e-2), "mismatch vs bf16-weight ref"

    # Loose sanity check against full-f32 math (the fp32 PyTorch module).
    ref_f32 = jnp.maximum(x @ w1f + b1, 0.0) @ w2f + b2
    assert jnp.allclose(out, ref_f32, atol=5e-2, rtol=5e-2), "mismatch vs f32 reference"

    # Also exercise the tiled (multi-step reduction) path used for large dim_in.
    out_tiled = projection_head_forward(x, w1, b1, w2, b2, hidden_tile=1024)
    out_tiled = jax.block_until_ready(out_tiled)
    assert jnp.allclose(out_tiled, ref, atol=1e-2, rtol=1e-2), "tiled path mismatch"

    print("KERNEL_OK")
</pallas_src>

<mosaic_0001>
module attributes {stable_mosaic.version = 11 : i64} {
  func.func @_mlp_head_kernel_single(%arg0: i32, %arg1: memref<8x256xbf16, #tpu.memory_space<vmem>>, %arg2: memref<256x4096xbf16, #tpu.memory_space<vmem>>, %arg3: memref<1x4096xf32, #tpu.memory_space<vmem>>, %arg4: memref<4096x64xbf16, #tpu.memory_space<vmem>>, %arg5: memref<1x64xf32, #tpu.memory_space<vmem>>, %arg6: memref<8x64xf32, #tpu.memory_space<vmem>>) attributes {dimension_semantics = [#tpu.dimension_semantics<arbitrary>], iteration_bounds = array<i64: 1>, scalar_prefetch = 0 : i64, scratch_operands = 0 : i64, tpu.core_type = #tpu.core_type<tc>, window_params = [{pipeline_mode = #tpu.pipeline_mode<synchronous>, transform_indices = @transform_0, window_bounds = array<i64: 8, 256>}, {transform_indices = @transform_1, window_bounds = array<i64: 256, 4096>}, {transform_indices = @transform_2, window_bounds = array<i64: 1, 4096>}, {transform_indices = @transform_3, window_bounds = array<i64: 4096, 64>}, {pipeline_mode = #tpu.pipeline_mode<synchronous>, transform_indices = @transform_4, window_bounds = array<i64: 1, 64>}, {pipeline_mode = #tpu.pipeline_mode<synchronous>, transform_indices = @transform_5, window_bounds = array<i64: 8, 64>}]} {
    %c0 = arith.constant 0 : index
    %c0_0 = arith.constant 0 : index
    %0 = vector.load %arg1[%c0, %c0_0] : memref<8x256xbf16, #tpu.memory_space<vmem>>, vector<8x256xbf16>
    %c0_1 = arith.constant 0 : index
    %c0_2 = arith.constant 0 : index
    %1 = vector.load %arg2[%c0_1, %c0_2] : memref<256x4096xbf16, #tpu.memory_space<vmem>>, vector<256x4096xbf16>
    %cst = arith.constant dense<0.000000e+00> : vector<8x4096xf32>
    %2 = tpu.matmul %0, %1, %cst {dimension_numbers = #tpu.dot_dimension_numbers<[1], [0], [0], [1], [0, 0, 1, 1], [], []>} : vector<8x256xbf16>, vector<256x4096xbf16>, vector<8x4096xf32> -> vector<8x4096xf32>
    %c0_3 = arith.constant 0 : index
    %c0_4 = arith.constant 0 : index
    %3 = vector.load %arg3[%c0_3, %c0_4] : memref<1x4096xf32, #tpu.memory_space<vmem>>, vector<1x4096xf32>
    %4 = vector.broadcast %3 : vector<1x4096xf32> to vector<8x4096xf32>
    %5 = arith.addf %2, %4 : vector<8x4096xf32>
    %cst_5 = arith.constant 0.000000e+00 : f32
    %6 = vector.broadcast %cst_5 : f32 to vector<8x4096xf32>
    %7 = arith.maximumf %5, %6 : vector<8x4096xf32>
    %c0_6 = arith.constant 0 : index
    %c0_7 = arith.constant 0 : index
    %8 = vector.load %arg4[%c0_6, %c0_7] : memref<4096x64xbf16, #tpu.memory_space<vmem>>, vector<4096x64xbf16>
    %9 = arith.extf %8 : vector<4096x64xbf16> to vector<4096x64xf32>
    %cst_8 = arith.constant dense<0.000000e+00> : vector<8x64xf32>
    %10 = tpu.matmul %7, %9, %cst_8 {dimension_numbers = #tpu.dot_dimension_numbers<[1], [0], [0], [1], [0, 0, 1, 1], [], []>} : vector<8x4096xf32>, vector<4096x64xf32>, vector<8x64xf32> -> vector<8x64xf32>
    %c0_9 = arith.constant 0 : index
    %c0_10 = arith.constant 0 : index
    %11 = vector.load %arg5[%c0_9, %c0_10] : memref<1x64xf32, #tpu.memory_space<vmem>>, vector<1x64xf32>
    %12 = vector.broadcast %11 : vector<1x64xf32> to vector<8x64xf32>
    %13 = arith.addf %10, %12 : vector<8x64xf32>
    %c0_11 = arith.constant 0 : index
    %c0_12 = arith.constant 0 : index
    %14 = vector.load %arg6[%c0_11, %c0_12] : memref<8x64xf32, #tpu.memory_space<vmem>>, vector<8x64xf32>
    tpu.vector_store %arg6[%c0_11, %c0_12], %13 {strides = array<i32>} : memref<8x64xf32, #tpu.memory_space<vmem>>, vector<8x64xf32>,
    return
  }
  func.func @transform_0(%arg0: i32) -> (i32, i32) {
    %c0_i32 = arith.constant 0 : i32
    %c0_i32_0 = arith.constant 0 : i32
    %c0_i32_1 = arith.constant 0 : i32
    return %c0_i32, %c0_i32_0 : i32, i32
  }
  func.func @transform_1(%arg0: i32) -> (i32, i32) {
    %c0_i32 = arith.constant 0 : i32
    %c0_i32_0 = arith.constant 0 : i32
    return %c0_i32, %arg0 : i32, i32
  }
  func.func @transform_2(%arg0: i32) -> (i32, i32) {
    %c0_i32 = arith.constant 0 : i32
    %c0_i32_0 = arith.constant 0 : i32
    return %c0_i32, %arg0 : i32, i32
  }
  func.func @transform_3(%arg0: i32) -> (i32, i32) {
    %c0_i32 = arith.constant 0 : i32
    %c0_i32_0 = arith.constant 0 : i32
    return %arg0, %c0_i32 : i32, i32
  }
  func.func @transform_4(%arg0: i32) -> (i32, i32) {
    %c0_i32 = arith.constant 0 : i32
    %c0_i32_0 = arith.constant 0 : i32
    %c0_i32_1 = arith.constant 0 : i32
    return %c0_i32, %c0_i32_0 : i32, i32
  }
  func.func @transform_5(%arg0: i32) -> (i32, i32) {
    %c0_i32 = arith.constant 0 : i32
    %c0_i32_0 = arith.constant 0 : i32
    %c0_i32_1 = arith.constant 0 : i32
    return %c0_i32, %c0_i32_0 : i32, i32
  }
}

</mosaic_0001>

<bundles_post_ra>
// kernel: tpu_custom_call.1
= control target key start
LH: loop header
LB: loop body
LE: loop exit
PB: predicated region body
PF: predicated region fallthrough
CT: control target
= control target key end

     0   :  { %10 = vsyncpa [#allocation3], 0  ;;  %s9703_s0 = inlined_call_operand.hbm [shape: bf16[8,256], index: 0, kind: input, shape index: {}]   ;;  %s9704_s1 = inlined_call_operand.hbm [shape: bf16[256,4096], index: 1, kind: input, shape index: {}]   ;;  %s9705_s2 = inlined_call_operand.hbm [shape: f32[1,4096], index: 2, kind: input, shape index: {}]   ;;  %s9706_s3 = inlined_call_operand.vmem [shape: bf16[4096,64], index: 3, kind: input, shape index: {}]   ;;  %s9707_s4 = inlined_call_operand.hbm [shape: f32[1,64], index: 4, kind: input, shape index: {}]   ;;  %s9708_s5 = inlined_call_operand.hbm [shape: f32[8,64], index: 5, kind: output, shape index: {}]  }
   0x1   :  { %11 = vsyncpa [#allocation6], 0 }
   0x2   :  { %12 = vsyncpa [#allocation9], 0 }
   0x3   :  { %13 = vsyncpa [#allocation4], 0  ;;  %s8647_s18 = smov [#allocation5]  }
   0x4   :  { %s29_s19 = sshll.u32 %s8647_s18, 4  ;;  %s30_s19 = int_to_ptr.vmem [resolvable:$true] %s29_s19 }
   0x5   :  { %s8547_s20 = scalar_lea.vmem %s30_s19, 65536  ;;  %p8552_p1 = scmp.lt.s32.totalorder %s30_s19, %s30_s19 }
   0x6   :  { %p8548_p0 = scmp.ne.s32.totalorder %s30_s19, %s8547_s20  ;;  %p8553_p2 = scmp.lt.s32.totalorder %s8547_s20, %s8547_s20 }
   0x8   :  { %p8554_p3 = por %p8553_p2, %p8552_p1 }
   0xa   :  { %p8555_p4 = pnand %p8554_p3, %p8548_p0 }
   0xc   :  { %8558 = shalt.err (!%p8555_p4)
}
   0xd   :  { %s8648_s21 = smov 2048   ;;  %s8649_s22 = smov 128  }
   0xe   :  { %35 = dma.hbm_to_vmem [thread:$0]  %s9704_s1, 65536, %s30_s19, [#allocation6], %s8648_s21, %s8648_s21, %s8649_s22  }
   0xf   :  { %s8650_s25 = smov [#allocation2]   ;;  %s8651_s27 = smov [#allocation7]  }
  0x10   :  { %s20_s26 = sshll.u32 %s8650_s25, 4  ;;  %s42_s28 = sshll.u32 %s8651_s27, 4  ;;  %s21_s26 = int_to_ptr.vmem [resolvable:$true] %s20_s26  ;;  %s43_s28 = int_to_ptr.vmem [resolvable:$true] %s42_s28 }
  0x11   :  { %s8567_s29 = scalar_lea.vmem %s21_s26, 128  ;;  %p8572_p6 = scmp.lt.s32.totalorder %s21_s26, %s21_s26 }
  0x12   :  { %p8568_p5 = scmp.ne.s32.totalorder %s21_s26, %s8567_s29  ;;  %p8573_p7 = scmp.lt.s32.totalorder %s8567_s29, %s8567_s29 }
  0x14   :  { %p8574_p8 = por %p8573_p7, %p8572_p6 }
  0x16   :  { %p8575_p9 = pnand %p8574_p8, %p8568_p5 }
  0x18   :  { %8578 = shalt.err (!%p8575_p9)
}
  0x19   :  { %23 = dma.hbm_to_vmem [thread:$0]  %s9703_s0, 128, %s21_s26, [#allocation3]  }
  0x1a   :  { %s8587_s7 = scalar_lea.vmem %s43_s28, 512  ;;  %p8592_p11 = scmp.lt.s32.totalorder %s43_s28, %s43_s28 }
  0x1b   :  { %p8588_p10 = scmp.ne.s32.totalorder %s43_s28, %s8587_s7  ;;  %p8593_p12 = scmp.lt.s32.totalorder %s8587_s7, %s8587_s7 }
  0x1d   :  { %p8594_p13 = por %p8593_p12, %p8592_p11 }
  0x1f   :  { %p8595_p0 = pnand %p8594_p13, %p8588_p10 }
  0x21   :  { %8598 = shalt.err (!%p8595_p0)
}
  0x22   :  { %45 = dma.hbm_to_vmem [thread:$0]  %s9705_s2, 512, %s43_s28, [#allocation6]  }
  0x23   :  { %s8652_s9 = smov [#allocation8]  }
  0x24   :  { %s54_s10 = sshll.u32 %s8652_s9, 4  ;;  %s55_s10 = int_to_ptr.vmem [resolvable:$true] %s54_s10 }
  0x25   :  { %s8607_s11 = scalar_lea.vmem %s55_s10, 16  ;;  %s8611_s12 = scalar_lea.vmem %s55_s10, 32 }
  0x26   :  { %p8608_p1 = scmp.ne.s32.totalorder %s55_s10, %s8607_s11  ;;  %p8612_p2 = scmp.lt.s32.totalorder %s55_s10, %s55_s10 }
  0x27   :  { %p8613_p3 = scmp.lt.s32.totalorder %s8611_s12, %s8607_s11 }
  0x29   :  { %p8614_p4 = por %p8613_p3, %p8612_p2 }
  0x2b   :  { %p8615_p5 = pnand %p8614_p4, %p8608_p1 }
  0x2d   :  { %8618 = shalt.err (!%p8615_p5)
}
  0x2e   :  { %57 = dma.hbm_to_vmem [thread:$0]  %s9707_s4, 16, %s55_s10, [#allocation9]  }
  0x2f   :  { %8639 = dma.done.wait [#allocation3], 128  }
  0x30   :  { %8640 = vsyncadd [#allocation3], 4294967168 }
  0x31   :  { %8641 = dma.done.wait [#allocation6], 66048  }
  0x32   :  { %8642 = vsyncadd [#allocation6], 4294901248 }
  0x33   :  { %8643 = dma.done.wait [#allocation9], 16  }
  0x34   :  { %8644 = vsyncadd [#allocation9], 4294967280  ;;  %v295_v0 = vld [vmem:[#allocation5 + $0x700] sm:$0xff]  ;;  %v296_v2 = vld [vmem:[#allocation5 + $0x708] sm:$0xff]  ;;  %vm6157_vm0 = vcmask 523264  }
  0x35   :  { %v311_v1 = vld [vmem:[#allocation5 + $0x780] sm:$0xff]  ;;  %v312_v4 = vld [vmem:[#allocation5 + $0x788] sm:$0xff]  ;;  %v8696_v53 = vld [vmem:[#allocation2] sm:$0xff] }
  0x36   :  { %v6403_v3 = vcombine.high %v295_v0, %v311_v1  ;;  %v6402_v5 = vcombine.low %v295_v0, %v311_v1  ;;  %v263_v6 = vld [vmem:[#allocation5 + $0x600] sm:$0xff]  ;;  %v6405_v8 = vcombine.high %v296_v2, %v312_v4  ;;  %v6404_v9 = vcombine.low %v296_v2, %v312_v4  ;;  %v264_v11 = vld [vmem:[#allocation5 + $0x608] sm:$0xff] }
  0x37   :  { %v279_v7 = vld [vmem:[#allocation5 + $0x680] sm:$0xff]  ;;  %v280_v12 = vld [vmem:[#allocation5 + $0x688] sm:$0xff]  ;;  %v8700_v57 = vcombine.high %v8696_v53, %v8696_v53 }
  0x38   :  { %v6371_v10 = vcombine.high %v263_v6, %v279_v7  ;;  %v231_v13 = vld [vmem:[#allocation5 + $0x500] sm:$0xff]  ;;  %3318 = vmatprep.subr.bf16.mxu0 %v6403_v3  ;;  %v6373_v14 = vcombine.high %v264_v11, %v280_v12  ;;  %v232_v16 = vld [vmem:[#allocation5 + $0x508] sm:$0xff]  ;;  %3359 = vmatprep.subr.bf16.mxu1 %v6405_v8  ;;  %v6370_v18 = vcombine.low %v263_v6, %v279_v7 }
  0x39   :  { %v247_v15 = vld [vmem:[#allocation5 + $0x580] sm:$0xff]  ;;  %v248_v17 = vld [vmem:[#allocation5 + $0x588] sm:$0xff]  ;;  %3319 = vmatpush1.bf16.msra.mxu0 %v6402_v5  ;;  %3360 = vmatpush1.bf16.msra.mxu1 %v6404_v9  ;;  %v6372_v19 = vcombine.low %v264_v11, %v280_v12 }
  0x3a   :  { %3320 = vmatprep.subr.bf16.mxu0 %v6371_v10  ;;  %v6339_v20 = vcombine.high %v231_v13, %v247_v15  ;;  %3361 = vmatprep.subr.bf16.mxu1 %v6373_v14  ;;  %v6341_v21 = vcombine.high %v232_v16, %v248_v17  ;;  %v199_v22 = vld [vmem:[#allocation5 + $0x400] sm:$0xff]  ;;  %v200_v24 = vld [vmem:[#allocation5 + $0x408] sm:$0xff]  ;;  %v6338_v26 = vcombine.low %v231_v13, %v247_v15 }
  0x3b   :  { %v215_v23 = vld [vmem:[#allocation5 + $0x480] sm:$0xff]  ;;  %v216_v25 = vld [vmem:[#allocation5 + $0x488] sm:$0xff]  ;;  %v6340_v27 = vcombine.low %v232_v16, %v248_v17  ;;  %3350 = vmatprep.mubr.bf16.mxu0 %v8700_v57  ;;  %3391 = vmatprep.mubr.bf16.mxu1 %v8700_v57 }
  0x3c   :  { %v6307_v28 = vcombine.high %v199_v22, %v215_v23  ;;  %v6309_v29 = vcombine.high %v200_v24, %v216_v25  ;;  %v167_v30 = vld [vmem:[#allocation5 + $0x300] sm:$0xff]  ;;  %v168_v32 = vld [vmem:[#allocation5 + $0x308] sm:$0xff]  ;;  %v6306_v34 = vcombine.low %v199_v22, %v215_v23  ;;  %v6308_v35 = vcombine.low %v200_v24, %v216_v25 }
  0x3d   :  { %3321 = vmatpush1.bf16.msra.mxu0 %v6370_v18  ;;  %3362 = vmatpush1.bf16.msra.mxu1 %v6372_v19  ;;  %v183_v31 = vld [vmem:[#allocation5 + $0x380] sm:$0xff]  ;;  %v184_v33 = vld [vmem:[#allocation5 + $0x388] sm:$0xff] }
  0x3e   :  { %3322 = vmatprep.subr.bf16.mxu0 %v6339_v20  ;;  %3363 = vmatprep.subr.bf16.mxu1 %v6341_v21  ;;  %v6275_v36 = vcombine.high %v167_v30, %v183_v31  ;;  %v6277_v37 = vcombine.high %v168_v32, %v184_v33  ;;  %v135_v38 = vld [vmem:[#allocation5 + $0x200] sm:$0xff]  ;;  %v136_v40 = vld [vmem:[#allocation5 + $0x208] sm:$0xff]  ;;  %v6274_v42 = vcombine.low %v167_v30, %v183_v31 }
  0x3f   :  { %v151_v39 = vld [vmem:[#allocation5 + $0x280] sm:$0xff]  ;;  %v152_v41 = vld [vmem:[#allocation5 + $0x288] sm:$0xff]  ;;  %v6276_v43 = vcombine.low %v168_v32, %v184_v33 }
  0x40   :  { %v6243_v44 = vcombine.high %v135_v38, %v151_v39  ;;  %v6245_v45 = vcombine.high %v136_v40, %v152_v41  ;;  %v103_v46 = vld [vmem:[#allocation5 + $0x100] sm:$0xff]  ;;  %v104_v48 = vld [vmem:[#allocation5 + $0x108] sm:$0xff]  ;;  %v6242_v50 = vcombine.low %v135_v38, %v151_v39  ;;  %v6244_v51 = vcombine.low %v136_v40, %v152_v41 }
  0x41   :  { %3323 = vmatpush1.bf16.msra.mxu0 %v6338_v26  ;;  %3364 = vmatpush1.bf16.msra.mxu1 %v6340_v27  ;;  %v119_v47 = vld [vmem:[#allocation5 + $0x180] sm:$0xff]  ;;  %v120_v49 = vld [vmem:[#allocation5 + $0x188] sm:$0xff] }
  0x42   :  { %3324 = vmatprep.subr.bf16.mxu0 %v6307_v28  ;;  %3365 = vmatprep.subr.bf16.mxu1 %v6309_v29  ;;  %v6211_v52 = vcombine.high %v103_v46, %v119_v47  ;;  %v6213_v54 = vcombine.high %v104_v48, %v120_v49  ;;  %v71_v55 = vld [vmem:[#allocation5] sm:$0xff]  ;;  %v72_v58 = vld [vmem:[#allocation5 + $0x8] sm:$0xff]  ;;  %v6210_v60 = vcombine.low %v103_v46, %v119_v47 }
  0x43   :  { %v87_v56 = vld [vmem:[#allocation5 + $0x80] sm:$0xff]  ;;  %v88_v59 = vld [vmem:[#allocation5 + $0x88] sm:$0xff]  ;;  %v6212_v61 = vcombine.low %v104_v48, %v120_v49 }
  0x44   :  { %v6179_v62 = vcombine.high %v71_v55, %v87_v56  ;;  %v6181_v63 = vcombine.high %v72_v58, %v88_v59  ;;  %v551_v0 = vld [vmem:[#allocation5 + $0xf00] sm:$0xff]  ;;  %v552_v2 = vld [vmem:[#allocation5 + $0xf08] sm:$0xff]  ;;  %v6178_v4 = vcombine.low %v71_v55, %v87_v56  ;;  %v6180_v5 = vcombine.low %v72_v58, %v88_v59 }
  0x45   :  { %3325 = vmatpush1.bf16.msra.mxu0 %v6306_v34  ;;  %3366 = vmatpush1.bf16.msra.mxu1 %v6308_v35  ;;  %v567_v1 = vld [vmem:[#allocation5 + $0xf80] sm:$0xff]  ;;  %v568_v3 = vld [vmem:[#allocation5 + $0xf88] sm:$0xff] }
  0x46   :  { %3326 = vmatprep.subr.bf16.mxu0 %v6275_v36  ;;  %3367 = vmatprep.subr.bf16.mxu1 %v6277_v37  ;;  %v6659_v6 = vcombine.high %v551_v0, %v567_v1  ;;  %v6661_v7 = vcombine.high %v552_v2, %v568_v3  ;;  %v519_v8 = vld [vmem:[#allocation5 + $0xe00] sm:$0xff]  ;;  %v520_v10 = vld [vmem:[#allocation5 + $0xe08] sm:$0xff]  ;;  %v6658_v12 = vcombine.low %v551_v0, %v567_v1 }
  0x47   :  { %v535_v9 = vld [vmem:[#allocation5 + $0xe80] sm:$0xff]  ;;  %v536_v11 = vld [vmem:[#allocation5 + $0xe88] sm:$0xff]  ;;  %v6660_v13 = vcombine.low %v552_v2, %v568_v3  ;;  %v297_v2 = vld [vmem:[#allocation5 + $0x710] sm:$0xff] }
  0x48   :  { %v6627_v14 = vcombine.high %v519_v8, %v535_v9  ;;  %v6629_v15 = vcombine.high %v520_v10, %v536_v11  ;;  %v487_v16 = vld [vmem:[#allocation5 + $0xd00] sm:$0xff]  ;;  %v488_v18 = vld [vmem:[#allocation5 + $0xd08] sm:$0xff]  ;;  %v6626_v20 = vcombine.low %v519_v8, %v535_v9  ;;  %v6628_v21 = vcombine.low %v520_v10, %v536_v11  ;;  %v313_v3 = vld [vmem:[#allocation5 + $0x790] sm:$0xff] }
  0x49   :  { %3327 = vmatpush1.bf16.msra.mxu0 %v6274_v42  ;;  %3368 = vmatpush1.bf16.msra.mxu1 %v6276_v43  ;;  %v503_v17 = vld [vmem:[#allocation5 + $0xd80] sm:$0xff]  ;;  %v504_v19 = vld [vmem:[#allocation5 + $0xd88] sm:$0xff]  ;;  %v6407_v8 = vcombine.high %v297_v2, %v313_v3  ;;  %v265_v10 = vld [vmem:[#allocation5 + $0x610] sm:$0xff] }
  0x4a   :  { %3328 = vmatprep.subr.bf16.mxu0 %v6243_v44  ;;  %3369 = vmatprep.subr.bf16.mxu1 %v6245_v45  ;;  %v6595_v22 = vcombine.high %v487_v16, %v503_v17  ;;  %v6597_v23 = vcombine.high %v488_v18, %v504_v19  ;;  %v455_v24 = vld [vmem:[#allocation5 + $0xc00] sm:$0xff]  ;;  %v456_v26 = vld [vmem:[#allocation5 + $0xc08] sm:$0xff]  ;;  %v6594_v28 = vcombine.low %v487_v16, %v503_v17  ;;  %v281_v11 = vld [vmem:[#allocation5 + $0x690] sm:$0xff] }
  0x4b   :  { %v471_v25 = vld [vmem:[#allocation5 + $0xc80] sm:$0xff]  ;;  %v472_v27 = vld [vmem:[#allocation5 + $0xc88] sm:$0xff]  ;;  %v6596_v29 = vcombine.low %v488_v18, %v504_v19  ;;  %v6375_v17 = vcombine.high %v265_v10, %v281_v11  ;;  %v233_v19 = vld [vmem:[#allocation5 + $0x510] sm:$0xff] }
  0x4c   :  { %v6563_v30 = vcombine.high %v455_v24, %v471_v25  ;;  %v6565_v31 = vcombine.high %v456_v26, %v472_v27  ;;  %v423_v32 = vld [vmem:[#allocation5 + $0xb00] sm:$0xff]  ;;  %v424_v34 = vld [vmem:[#allocation5 + $0xb08] sm:$0xff]  ;;  %v6562_v36 = vcombine.low %v455_v24, %v471_v25  ;;  %v6564_v37 = vcombine.low %v456_v26, %v472_v27  ;;  %v201_v26 = vld [vmem:[#allocation5 + $0x410] sm:$0xff] }
  0x4d   :  { %3329 = vmatpush1.bf16.msra.mxu0 %v6242_v50  ;;  %3370 = vmatpush1.bf16.msra.mxu1 %v6244_v51  ;;  %v439_v33 = vld [vmem:[#allocation5 + $0xb80] sm:$0xff]  ;;  %v440_v35 = vld [vmem:[#allocation5 + $0xb88] sm:$0xff]  ;;  %v217_v27 = vld [vmem:[#allocation5 + $0x490] sm:$0xff] }
  0x4e   :  { %3330 = vmatprep.subr.bf16.mxu0 %v6211_v52  ;;  %3371 = vmatprep.subr.bf16.mxu1 %v6213_v54  ;;  %v6531_v38 = vcombine.high %v423_v32, %v439_v33  ;;  %v6533_v39 = vcombine.high %v424_v34, %v440_v35  ;;  %v391_v40 = vld [vmem:[#allocation5 + $0xa00] sm:$0xff]  ;;  %v392_v42 = vld [vmem:[#allocation5 + $0xa08] sm:$0xff]  ;;  %v6530_v44 = vcombine.low %v423_v32, %v439_v33 }
  0x4f   :  { %v407_v41 = vld [vmem:[#allocation5 + $0xa80] sm:$0xff]  ;;  %v408_v43 = vld [vmem:[#allocation5 + $0xa88] sm:$0xff]  ;;  %v6532_v45 = vcombine.low %v424_v34, %v440_v35  ;;  %v6311_v32 = vcombine.high %v201_v26, %v217_v27  ;;  %v169_v34 = vld [vmem:[#allocation5 + $0x310] sm:$0xff] }
  0x50   :  { %v6499_v46 = vcombine.high %v391_v40, %v407_v41  ;;  %v6501_v47 = vcombine.high %v392_v42, %v408_v43  ;;  %v359_v48 = vld [vmem:[#allocation5 + $0x900] sm:$0xff]  ;;  %v360_v50 = vld [vmem:[#allocation5 + $0x908] sm:$0xff]  ;;  %v6498_v52 = vcombine.low %v391_v40, %v407_v41  ;;  %v6500_v54 = vcombine.low %v392_v42, %v408_v43  ;;  %v185_v35 = vld [vmem:[#allocation5 + $0x390] sm:$0xff] }
  0x51   :  { %3331 = vmatpush1.bf16.msra.mxu0 %v6210_v60  ;;  %3372 = vmatpush1.bf16.msra.mxu1 %v6212_v61  ;;  %v375_v49 = vld [vmem:[#allocation5 + $0x980] sm:$0xff]  ;;  %v376_v51 = vld [vmem:[#allocation5 + $0x988] sm:$0xff]  ;;  %v6279_v40 = vcombine.high %v169_v34, %v185_v35  ;;  %v137_v42 = vld [vmem:[#allocation5 + $0x210] sm:$0xff] }
  0x52   :  { %3332 = vmatprep.subr.bf16.mxu0 %v6179_v62  ;;  %3373 = vmatprep.subr.bf16.mxu1 %v6181_v63  ;;  %v6467_v55 = vcombine.high %v359_v48, %v375_v49  ;;  %v6469_v56 = vcombine.high %v360_v50, %v376_v51  ;;  %v327_v58 = vld [vmem:[#allocation5 + $0x800] sm:$0xff]  ;;  %v328_v60 = vld [vmem:[#allocation5 + $0x808] sm:$0xff]  ;;  %v6466_v62 = vcombine.low %v359_v48, %v375_v49  ;;  %v153_v43 = vld [vmem:[#allocation5 + $0x290] sm:$0xff] }
  0x53   :  { %v343_v59 = vld [vmem:[#allocation5 + $0x880] sm:$0xff]  ;;  %v344_v61 = vld [vmem:[#allocation5 + $0x888] sm:$0xff]  ;;  %v6468_v63 = vcombine.low %v360_v50, %v376_v51  ;;  %v6247_v48 = vcombine.high %v137_v42, %v153_v43  ;;  %v105_v50 = vld [vmem:[#allocation5 + $0x110] sm:$0xff] }
  0x54   :  { %v6435_v0 = vcombine.high %v327_v58, %v343_v59  ;;  %v6437_v1 = vcombine.high %v328_v60, %v344_v61  ;;  %v121_v51 = vld [vmem:[#allocation5 + $0x190] sm:$0xff] }
  0x55   :  { %3333 = vmatpush1.bf16.msra.mxu0 %v6178_v4  ;;  %3374 = vmatpush1.bf16.msra.mxu1 %v6180_v5  ;;  %v298_v4 = vld [vmem:[#allocation5 + $0x718] sm:$0xff] }
  0x56   :  { %3334 = vmatprep.subr.bf16.mxu0 %v6659_v6  ;;  %3375 = vmatprep.subr.bf16.mxu1 %v6661_v7  ;;  %v314_v5 = vld [vmem:[#allocation5 + $0x798] sm:$0xff]  ;;  %v6434_v6 = vcombine.low %v327_v58, %v343_v59  ;;  %v6436_v7 = vcombine.low %v328_v60, %v344_v61  ;;  %v6215_v58 = vcombine.high %v105_v50, %v121_v51  ;;  %v73_v60 = vld [vmem:[#allocation5 + $0x10] sm:$0xff] }
  0x57   :  { %v6409_v9 = vcombine.high %v298_v4, %v314_v5  ;;  %v6408_v16 = vcombine.low %v298_v4, %v314_v5  ;;  %v89_v61 = vld [vmem:[#allocation5 + $0x90] sm:$0xff] }
  0x58   :  { %v553_v4 = vld [vmem:[#allocation5 + $0xf10] sm:$0xff] }
  0x59   :  { %3335 = vmatpush2.bf16.msra.mxu0 %v6658_v12  ;;  %3376 = vmatpush2.bf16.msra.mxu1 %v6660_v13  ;;  %v8706_v12 = vcombine.low %v8696_v53, %v8696_v53  ;;  %v266_v13 = vld [vmem:[#allocation5 + $0x618] sm:$0xff]  ;;  %v6374_v53 = vcombine.low %v265_v10, %v281_v11  ;;  %v569_v5 = vld [vmem:[#allocation5 + $0xf90] sm:$0xff] }
  0x5a   :  { %3336 = vmatprep.subr.bf16.mxu0 %v6627_v14  ;;  %3377 = vmatprep.subr.bf16.mxu1 %v6629_v15  ;;  %v282_v14 = vld [vmem:[#allocation5 + $0x698] sm:$0xff]  ;;  %v6406_v15 = vcombine.low %v297_v2, %v313_v3  ;;  %v6183_v2 = vcombine.high %v73_v60, %v89_v61  ;;  %v6663_v10 = vcombine.high %v553_v4, %v569_v5 }
  0x5b   :  { %v6377_v18 = vcombine.high %v266_v13, %v282_v14 }
  0x5d   :  { %3337 = vmatpush2.bf16.msra.mxu0 %v6626_v20  ;;  %3378 = vmatpush2.bf16.msra.mxu1 %v6628_v21  ;;  %v249_v20 = vld [vmem:[#allocation5 + $0x590] sm:$0xff]  ;;  %v234_v21 = vld [vmem:[#allocation5 + $0x518] sm:$0xff] }
  0x5e   :  { %3338 = vmatprep.subr.bf16.mxu0 %v6595_v22  ;;  %3379 = vmatprep.subr.bf16.mxu1 %v6597_v23  ;;  %v250_v22 = vld [vmem:[#allocation5 + $0x598] sm:$0xff]  ;;  %v6376_v23 = vcombine.low %v266_v13, %v282_v14  ;;  %v6343_v24 = vcombine.high %v233_v19, %v249_v20  ;;  %v521_v13 = vld [vmem:[#allocation5 + $0xe10] sm:$0xff] }
  0x5f   :  { %v6345_v25 = vcombine.high %v234_v21, %v250_v22  ;;  %v537_v14 = vld [vmem:[#allocation5 + $0xe90] sm:$0xff] }
  0x61   :  { %3339 = vmatpush2.bf16.msra.mxu0 %v6594_v28  ;;  %3380 = vmatpush2.bf16.msra.mxu1 %v6596_v29  ;;  %v202_v28 = vld [vmem:[#allocation5 + $0x418] sm:$0xff] }
  0x62   :  { %3340 = vmatprep.subr.bf16.mxu0 %v6563_v30  ;;  %3381 = vmatprep.subr.bf16.mxu1 %v6565_v31  ;;  %v218_v29 = vld [vmem:[#allocation5 + $0x498] sm:$0xff]  ;;  %v6342_v30 = vcombine.low %v233_v19, %v249_v20  ;;  %v6344_v31 = vcombine.low %v234_v21, %v250_v22  ;;  %v6631_v19 = vcombine.high %v521_v13, %v537_v14  ;;  %v489_v21 = vld [vmem:[#allocation5 + $0xd10] sm:$0xff] }
  0x63   :  { %v6313_v33 = vcombine.high %v202_v28, %v218_v29  ;;  %v505_v22 = vld [vmem:[#allocation5 + $0xd90] sm:$0xff] }
  0x65   :  { %3341 = vmatpush2.bf16.msra.mxu0 %v6562_v36  ;;  %3382 = vmatpush2.bf16.msra.mxu1 %v6564_v37  ;;  %v170_v36 = vld [vmem:[#allocation5 + $0x318] sm:$0xff] }
  0x66   :  { %3342 = vmatprep.subr.bf16.mxu0 %v6531_v38  ;;  %3383 = vmatprep.subr.bf16.mxu1 %v6533_v39  ;;  %v186_v37 = vld [vmem:[#allocation5 + $0x398] sm:$0xff]  ;;  %v6310_v38 = vcombine.low %v201_v26, %v217_v27  ;;  %v6312_v39 = vcombine.low %v202_v28, %v218_v29  ;;  %v6599_v26 = vcombine.high %v489_v21, %v505_v22  ;;  %v457_v28 = vld [vmem:[#allocation5 + $0xc10] sm:$0xff] }
  0x67   :  { %v6281_v41 = vcombine.high %v170_v36, %v186_v37  ;;  %v473_v29 = vld [vmem:[#allocation5 + $0xc90] sm:$0xff] }
  0x69   :  { %3343 = vmatpush2.bf16.msra.mxu0 %v6530_v44  ;;  %3384 = vmatpush2.bf16.msra.mxu1 %v6532_v45  ;;  %v138_v44 = vld [vmem:[#allocation5 + $0x218] sm:$0xff] }
  0x6a   :  { %3344 = vmatprep.subr.bf16.mxu0 %v6499_v46  ;;  %3385 = vmatprep.subr.bf16.mxu1 %v6501_v47  ;;  %v154_v45 = vld [vmem:[#allocation5 + $0x298] sm:$0xff]  ;;  %v6278_v46 = vcombine.low %v169_v34, %v185_v35  ;;  %v6280_v47 = vcombine.low %v170_v36, %v186_v37  ;;  %v6567_v34 = vcombine.high %v457_v28, %v473_v29  ;;  %v425_v36 = vld [vmem:[#allocation5 + $0xb10] sm:$0xff] }
  0x6b   :  { %v6249_v49 = vcombine.high %v138_v44, %v154_v45  ;;  %v441_v37 = vld [vmem:[#allocation5 + $0xb90] sm:$0xff] }
  0x6d   :  { %3345 = vmatpush2.bf16.msra.mxu0 %v6498_v52  ;;  %3386 = vmatpush2.bf16.msra.mxu1 %v6500_v54  ;;  %v106_v52 = vld [vmem:[#allocation5 + $0x118] sm:$0xff] }
  0x6e   :  { %3346 = vmatprep.subr.bf16.mxu0 %v6467_v55  ;;  %3387 = vmatprep.subr.bf16.mxu1 %v6469_v56  ;;  %v122_v54 = vld [vmem:[#allocation5 + $0x198] sm:$0xff]  ;;  %v6246_v55 = vcombine.low %v137_v42, %v153_v43  ;;  %v6248_v56 = vcombine.low %v138_v44, %v154_v45  ;;  %v6535_v42 = vcombine.high %v425_v36, %v441_v37  ;;  %v393_v44 = vld [vmem:[#allocation5 + $0xa10] sm:$0xff] }
  0x6f   :  { %v6217_v59 = vcombine.high %v106_v52, %v122_v54  ;;  %v409_v45 = vld [vmem:[#allocation5 + $0xa90] sm:$0xff] }
  0x71   :  { %3347 = vmatpush2.bf16.msra.mxu0 %v6466_v62  ;;  %3388 = vmatpush2.bf16.msra.mxu1 %v6468_v63  ;;  %v74_v62 = vld [vmem:[#allocation5 + $0x18] sm:$0xff] }
  0x72   :  { %3348 = vmatprep.subr.bf16.mxu0 %v6435_v0  ;;  %3389 = vmatprep.subr.bf16.mxu1 %v6437_v1  ;;  %v90_v63 = vld [vmem:[#allocation5 + $0x98] sm:$0xff]  ;;  %v6214_v0 = vcombine.low %v105_v50, %v121_v51  ;;  %v6216_v1 = vcombine.low %v106_v52, %v122_v54  ;;  %v6503_v50 = vcombine.high %v393_v44, %v409_v45  ;;  %v361_v52 = vld [vmem:[#allocation5 + $0x910] sm:$0xff] }
  0x73   :  { %v6185_v3 = vcombine.high %v74_v62, %v90_v63  ;;  %v377_v54 = vld [vmem:[#allocation5 + $0x990] sm:$0xff] }
  0x75   :  { %3349 = vmatpush2.bf16.msra.mxu0 %v6434_v6  ;;  %3390 = vmatpush2.bf16.msra.mxu1 %v6436_v7  ;;  %v554_v6 = vld [vmem:[#allocation5 + $0xf18] sm:$0xff] }
  0x76   :  { %3400 = vmatprep.subr.bf16.mxu0 %v6407_v8  ;;  %3441 = vmatprep.subr.bf16.mxu1 %v6409_v9  ;;  %v570_v7 = vld [vmem:[#allocation5 + $0xf98] sm:$0xff]  ;;  %v6182_v8 = vcombine.low %v73_v60, %v89_v61  ;;  %v6184_v9 = vcombine.low %v74_v62, %v90_v63  ;;  %v6471_v60 = vcombine.high %v361_v52, %v377_v54  ;;  %v329_v62 = vld [vmem:[#allocation5 + $0x810] sm:$0xff] }
  0x77   :  { %v6665_v11 = vcombine.high %v554_v6, %v570_v7  ;;  %v345_v63 = vld [vmem:[#allocation5 + $0x890] sm:$0xff] }
  0x78   :  { %3351 = vmatmul.mubr.bf16.vlgmr.msra.gmra.mxu0 %v8706_v12  ;;  %3392 = vmatmul.mubr.bf16.vlgmr.msra.gmra.mxu1 %v8706_v12 }
  0x79   :  { %3401 = vmatpush1.bf16.msra.mxu0 %v6406_v15  ;;  %3442 = vmatpush1.bf16.msra.mxu1 %v6408_v16  ;;  %v522_v15 = vld [vmem:[#allocation5 + $0xe18] sm:$0xff] }
  0x7a   :  { %3402 = vmatprep.subr.bf16.mxu0 %v6375_v17  ;;  %3443 = vmatprep.subr.bf16.mxu1 %v6377_v18  ;;  %v538_v16 = vld [vmem:[#allocation5 + $0xe98] sm:$0xff]  ;;  %v6662_v17 = vcombine.low %v553_v4, %v569_v5  ;;  %v6664_v18 = vcombine.low %v554_v6, %v570_v7  ;;  %v6439_v4 = vcombine.high %v329_v62, %v345_v63  ;;  %v299_v6 = vld [vmem:[#allocation5 + $0x720] sm:$0xff] }
  0x7b   :  { %3432 = vmatprep.mubr.bf16.mxu0 %v8700_v57  ;;  %3473 = vmatprep.mubr.bf16.mxu1 %v8700_v57  ;;  %v6633_v20 = vcombine.high %v522_v15, %v538_v16  ;;  %v315_v7 = vld [vmem:[#allocation5 + $0x7a0] sm:$0xff] }
  0x7d   :  { %3403 = vmatpush1.bf16.msra.mxu0 %v6374_v53  ;;  %3444 = vmatpush1.bf16.msra.mxu1 %v6376_v23  ;;  %v490_v53 = vld [vmem:[#allocation5 + $0xd18] sm:$0xff] }
  0x7e   :  { %3404 = vmatprep.subr.bf16.mxu0 %v6343_v24  ;;  %3445 = vmatprep.subr.bf16.mxu1 %v6345_v25  ;;  %v506_v23 = vld [vmem:[#allocation5 + $0xd98] sm:$0xff]  ;;  %v6630_v24 = vcombine.low %v521_v13, %v537_v14  ;;  %v6632_v25 = vcombine.low %v522_v15, %v538_v16  ;;  %v6411_v13 = vcombine.high %v299_v6, %v315_v7  ;;  %v267_v15 = vld [vmem:[#allocation5 + $0x620] sm:$0xff] }
  0x7f   :  { %v6601_v27 = vcombine.high %v490_v53, %v506_v23  ;;  %v283_v16 = vld [vmem:[#allocation5 + $0x6a0] sm:$0xff] }
  0x81   :  { %3405 = vmatpush1.bf16.msra.mxu0 %v6342_v30  ;;  %3446 = vmatpush1.bf16.msra.mxu1 %v6344_v31  ;;  %v458_v30 = vld [vmem:[#allocation5 + $0xc18] sm:$0xff] }
  0x82   :  { %3406 = vmatprep.subr.bf16.mxu0 %v6311_v32  ;;  %3447 = vmatprep.subr.bf16.mxu1 %v6313_v33  ;;  %v474_v31 = vld [vmem:[#allocation5 + $0xc98] sm:$0xff]  ;;  %v6598_v32 = vcombine.low %v489_v21, %v505_v22  ;;  %v6600_v33 = vcombine.low %v490_v53, %v506_v23  ;;  %v6379_v21 = vcombine.high %v267_v15, %v283_v16  ;;  %v235_v53 = vld [vmem:[#allocation5 + $0x520] sm:$0xff] }
  0x83   :  { %v6569_v35 = vcombine.high %v458_v30, %v474_v31  ;;  %v251_v23 = vld [vmem:[#allocation5 + $0x5a0] sm:$0xff] }
  0x85   :  { %3407 = vmatpush1.bf16.msra.mxu0 %v6310_v38  ;;  %3448 = vmatpush1.bf16.msra.mxu1 %v6312_v39  ;;  %v426_v38 = vld [vmem:[#allocation5 + $0xb18] sm:$0xff] }
  0x86   :  { %3408 = vmatprep.subr.bf16.mxu0 %v6279_v40  ;;  %3449 = vmatprep.subr.bf16.mxu1 %v6281_v41  ;;  %v442_v39 = vld [vmem:[#allocation5 + $0xb98] sm:$0xff]  ;;  %v6566_v40 = vcombine.low %v457_v28, %v473_v29  ;;  %v6568_v41 = vcombine.low %v458_v30, %v474_v31  ;;  %v6347_v28 = vcombine.high %v235_v53, %v251_v23  ;;  %v203_v30 = vld [vmem:[#allocation5 + $0x420] sm:$0xff] }
  0x87   :  { %v6537_v43 = vcombine.high %v426_v38, %v442_v39  ;;  %v219_v31 = vld [vmem:[#allocation5 + $0x4a0] sm:$0xff] }
  0x89   :  { %3409 = vmatpush1.bf16.msra.mxu0 %v6278_v46  ;;  %3450 = vmatpush1.bf16.msra.mxu1 %v6280_v47  ;;  %v394_v46 = vld [vmem:[#allocation5 + $0xa18] sm:$0xff] }
  0x8a   :  { %3410 = vmatprep.subr.bf16.mxu0 %v6247_v48  ;;  %3451 = vmatprep.subr.bf16.mxu1 %v6249_v49  ;;  %v410_v47 = vld [vmem:[#allocation5 + $0xa98] sm:$0xff]  ;;  %v6534_v48 = vcombine.low %v425_v36, %v441_v37  ;;  %v6536_v49 = vcombine.low %v426_v38, %v442_v39  ;;  %v6315_v36 = vcombine.high %v203_v30, %v219_v31  ;;  %v171_v38 = vld [vmem:[#allocation5 + $0x320] sm:$0xff] }
  0x8b   :  { %v6505_v51 = vcombine.high %v394_v46, %v410_v47  ;;  %v187_v39 = vld [vmem:[#allocation5 + $0x3a0] sm:$0xff] }
  0x8d   :  { %3411 = vmatpush1.bf16.msra.mxu0 %v6246_v55  ;;  %3452 = vmatpush1.bf16.msra.mxu1 %v6248_v56  ;;  %v362_v55 = vld [vmem:[#allocation5 + $0x918] sm:$0xff] }
  0x8e   :  { %3412 = vmatprep.subr.bf16.mxu0 %v6215_v58  ;;  %3453 = vmatprep.subr.bf16.mxu1 %v6217_v59  ;;  %v378_v56 = vld [vmem:[#allocation5 + $0x998] sm:$0xff]  ;;  %v6502_v58 = vcombine.low %v393_v44, %v409_v45  ;;  %v6504_v59 = vcombine.low %v394_v46, %v410_v47  ;;  %v6283_v44 = vcombine.high %v171_v38, %v187_v39  ;;  %v139_v46 = vld [vmem:[#allocation5 + $0x220] sm:$0xff] }
  0x8f   :  { %v6473_v61 = vcombine.high %v362_v55, %v378_v56  ;;  %v155_v47 = vld [vmem:[#allocation5 + $0x2a0] sm:$0xff] }
  0x91   :  { %3413 = vmatpush1.bf16.msra.mxu0 %v6214_v0  ;;  %3454 = vmatpush1.bf16.msra.mxu1 %v6216_v1  ;;  %v330_v0 = vld [vmem:[#allocation5 + $0x818] sm:$0xff] }
  0x92   :  { %3414 = vmatprep.subr.bf16.mxu0 %v6183_v2  ;;  %3455 = vmatprep.subr.bf16.mxu1 %v6185_v3  ;;  %v346_v1 = vld [vmem:[#allocation5 + $0x898] sm:$0xff]  ;;  %v6470_v2 = vcombine.low %v361_v52, %v377_v54  ;;  %v6472_v3 = vcombine.low %v362_v55, %v378_v56  ;;  %v6251_v52 = vcombine.high %v139_v46, %v155_v47  ;;  %v107_v55 = vld [vmem:[#allocation5 + $0x120] sm:$0xff] }
  0x93   :  { %v6441_v5 = vcombine.high %v330_v0, %v346_v1  ;;  %v123_v56 = vld [vmem:[#allocation5 + $0x1a0] sm:$0xff] }
  0x95   :  { %3415 = vmatpush1.bf16.msra.mxu0 %v6182_v8  ;;  %3456 = vmatpush1.bf16.msra.mxu1 %v6184_v9  ;;  %v300_v8 = vld [vmem:[#allocation5 + $0x728] sm:$0xff] }
  0x96   :  { %3416 = vmatprep.subr.bf16.mxu0 %v6663_v10  ;;  %3457 = vmatprep.subr.bf16.mxu1 %v6665_v11  ;;  %v316_v9 = vld [vmem:[#allocation5 + $0x7a8] sm:$0xff]  ;;  %v6438_v10 = vcombine.low %v329_v62, %v345_v63  ;;  %v6440_v11 = vcombine.low %v330_v0, %v346_v1  ;;  %v6219_v62 = vcombine.high %v107_v55, %v123_v56  ;;  %v75_v0 = vld [vmem:[#allocation5 + $0x20] sm:$0xff] }
  0x97   :  { %v6413_v14 = vcombine.high %v300_v8, %v316_v9  ;;  %v91_v1 = vld [vmem:[#allocation5 + $0xa0] sm:$0xff] }
  0x99   :  { %3417 = vmatpush2.bf16.msra.mxu0 %v6662_v17  ;;  %3458 = vmatpush2.bf16.msra.mxu1 %v6664_v18  ;;  %v268_v17 = vld [vmem:[#allocation5 + $0x628] sm:$0xff] }
  0x9a   :  { %3418 = vmatprep.subr.bf16.mxu0 %v6631_v19  ;;  %3459 = vmatprep.subr.bf16.mxu1 %v6633_v20  ;;  %v284_v18 = vld [vmem:[#allocation5 + $0x6a8] sm:$0xff]  ;;  %v6410_v19 = vcombine.low %v299_v6, %v315_v7  ;;  %v6412_v20 = vcombine.low %v300_v8, %v316_v9  ;;  %v6187_v6 = vcombine.high %v75_v0, %v91_v1  ;;  %v555_v8 = vld [vmem:[#allocation5 + $0xf20] sm:$0xff] }
  0x9b   :  { %v6381_v22 = vcombine.high %v268_v17, %v284_v18  ;;  %v571_v9 = vld [vmem:[#allocation5 + $0xfa0] sm:$0xff] }
  0x9d   :  { %3419 = vmatpush2.bf16.msra.mxu0 %v6630_v24  ;;  %3460 = vmatpush2.bf16.msra.mxu1 %v6632_v25  ;;  %v236_v24 = vld [vmem:[#allocation5 + $0x528] sm:$0xff] }
  0x9e   :  { %3420 = vmatprep.subr.bf16.mxu0 %v6599_v26  ;;  %3461 = vmatprep.subr.bf16.mxu1 %v6601_v27  ;;  %v252_v25 = vld [vmem:[#allocation5 + $0x5a8] sm:$0xff]  ;;  %v6378_v26 = vcombine.low %v267_v15, %v283_v16  ;;  %v6380_v27 = vcombine.low %v268_v17, %v284_v18  ;;  %v6667_v15 = vcombine.high %v555_v8, %v571_v9  ;;  %v523_v17 = vld [vmem:[#allocation5 + $0xe20] sm:$0xff] }
  0x9f   :  { %v6349_v29 = vcombine.high %v236_v24, %v252_v25  ;;  %v539_v18 = vld [vmem:[#allocation5 + $0xea0] sm:$0xff] }
  0xa1   :  { %3421 = vmatpush2.bf16.msra.mxu0 %v6598_v32  ;;  %3462 = vmatpush2.bf16.msra.mxu1 %v6600_v33  ;;  %v204_v32 = vld [vmem:[#allocation5 + $0x428] sm:$0xff] }
  0xa2   :  { %3422 = vmatprep.subr.bf16.mxu0 %v6567_v34  ;;  %3463 = vmatprep.subr.bf16.mxu1 %v6569_v35  ;;  %v220_v33 = vld [vmem:[#allocation5 + $0x4a8] sm:$0xff]  ;;  %v6346_v34 = vcombine.low %v235_v53, %v251_v23  ;;  %v6348_v35 = vcombine.low %v236_v24, %v252_v25  ;;  %v6635_v53 = vcombine.high %v523_v17, %v539_v18  ;;  %v491_v24 = vld [vmem:[#allocation5 + $0xd20] sm:$0xff] }
  0xa3   :  { %v6317_v37 = vcombine.high %v204_v32, %v220_v33  ;;  %v507_v25 = vld [vmem:[#allocation5 + $0xda0] sm:$0xff] }
  0xa5   :  { %3423 = vmatpush2.bf16.msra.mxu0 %v6566_v40  ;;  %3464 = vmatpush2.bf16.msra.mxu1 %v6568_v41  ;;  %v172_v40 = vld [vmem:[#allocation5 + $0x328] sm:$0xff] }
  0xa6   :  { %3424 = vmatprep.subr.bf16.mxu0 %v6535_v42  ;;  %3465 = vmatprep.subr.bf16.mxu1 %v6537_v43  ;;  %v188_v41 = vld [vmem:[#allocation5 + $0x3a8] sm:$0xff]  ;;  %v6314_v42 = vcombine.low %v203_v30, %v219_v31  ;;  %v6316_v43 = vcombine.low %v204_v32, %v220_v33  ;;  %v6603_v30 = vcombine.high %v491_v24, %v507_v25  ;;  %v459_v32 = vld [vmem:[#allocation5 + $0xc20] sm:$0xff] }
  0xa7   :  { %v6285_v45 = vcombine.high %v172_v40, %v188_v41  ;;  %v475_v33 = vld [vmem:[#allocation5 + $0xca0] sm:$0xff] }
  0xa9   :  { %3425 = vmatpush2.bf16.msra.mxu0 %v6534_v48  ;;  %3466 = vmatpush2.bf16.msra.mxu1 %v6536_v49  ;;  %v140_v48 = vld [vmem:[#allocation5 + $0x228] sm:$0xff] }
  0xaa   :  { %3426 = vmatprep.subr.bf16.mxu0 %v6503_v50  ;;  %3467 = vmatprep.subr.bf16.mxu1 %v6505_v51  ;;  %v156_v49 = vld [vmem:[#allocation5 + $0x2a8] sm:$0xff]  ;;  %v6282_v50 = vcombine.low %v171_v38, %v187_v39  ;;  %v6284_v51 = vcombine.low %v172_v40, %v188_v41  ;;  %v6571_v38 = vcombine.high %v459_v32, %v475_v33  ;;  %v427_v40 = vld [vmem:[#allocation5 + $0xb20] sm:$0xff] }
  0xab   :  { %v6253_v54 = vcombine.high %v140_v48, %v156_v49  ;;  %v443_v41 = vld [vmem:[#allocation5 + $0xba0] sm:$0xff] }
  0xad   :  { %3427 = vmatpush2.bf16.msra.mxu0 %v6502_v58  ;;  %3468 = vmatpush2.bf16.msra.mxu1 %v6504_v59  ;;  %v108_v58 = vld [vmem:[#allocation5 + $0x128] sm:$0xff] }
  0xae   :  { %3428 = vmatprep.subr.bf16.mxu0 %v6471_v60  ;;  %3469 = vmatprep.subr.bf16.mxu1 %v6473_v61  ;;  %v124_v59 = vld [vmem:[#allocation5 + $0x1a8] sm:$0xff]  ;;  %v6250_v60 = vcombine.low %v139_v46, %v155_v47  ;;  %v6252_v61 = vcombine.low %v140_v48, %v156_v49  ;;  %v6539_v46 = vcombine.high %v427_v40, %v443_v41  ;;  %v395_v48 = vld [vmem:[#allocation5 + $0xa20] sm:$0xff] }
  0xaf   :  { %v6221_v63 = vcombine.high %v108_v58, %v124_v59  ;;  %v411_v49 = vld [vmem:[#allocation5 + $0xaa0] sm:$0xff] }
  0xb1   :  { %3429 = vmatpush2.bf16.msra.mxu0 %v6470_v2  ;;  %3470 = vmatpush2.bf16.msra.mxu1 %v6472_v3  ;;  %v76_v2 = vld [vmem:[#allocation5 + $0x28] sm:$0xff] }
  0xb2   :  { %3430 = vmatprep.subr.bf16.mxu0 %v6439_v4  ;;  %3471 = vmatprep.subr.bf16.mxu1 %v6441_v5  ;;  %v92_v3 = vld [vmem:[#allocation5 + $0xa8] sm:$0xff]  ;;  %v6218_v4 = vcombine.low %v107_v55, %v123_v56  ;;  %v6220_v5 = vcombine.low %v108_v58, %v124_v59  ;;  %v6507_v55 = vcombine.high %v395_v48, %v411_v49  ;;  %v363_v58 = vld [vmem:[#allocation5 + $0x920] sm:$0xff] }
  0xb3   :  { %v6189_v7 = vcombine.high %v76_v2, %v92_v3  ;;  %v379_v59 = vld [vmem:[#allocation5 + $0x9a0] sm:$0xff] }
  0xb5   :  { %3431 = vmatpush2.bf16.msra.mxu0 %v6438_v10  ;;  %3472 = vmatpush2.bf16.msra.mxu1 %v6440_v11  ;;  %v556_v10 = vld [vmem:[#allocation5 + $0xf28] sm:$0xff] }
  0xb6   :  { %3482 = vmatprep.subr.bf16.mxu0 %v6411_v13  ;;  %3523 = vmatprep.subr.bf16.mxu1 %v6413_v14  ;;  %v572_v11 = vld [vmem:[#allocation5 + $0xfa8] sm:$0xff]  ;;  %v6186_v13 = vcombine.low %v75_v0, %v91_v1  ;;  %v6188_v14 = vcombine.low %v76_v2, %v92_v3  ;;  %v6475_v0 = vcombine.high %v363_v58, %v379_v59  ;;  %v331_v2 = vld [vmem:[#allocation5 + $0x820] sm:$0xff] }
  0xb7   :  { %v6669_v16 = vcombine.high %v556_v10, %v572_v11  ;;  %v347_v3 = vld [vmem:[#allocation5 + $0x8a0] sm:$0xff] }
  0xb8   :  { %3433 = vmatmul.mubr.bf16.vlgmr.msra.gmra.mxu0 %v8706_v12  ;;  %3474 = vmatmul.mubr.bf16.vlgmr.msra.gmra.mxu1 %v8706_v12 }
  0xb9   :  { %3483 = vmatpush1.bf16.msra.mxu0 %v6410_v19  ;;  %3524 = vmatpush1.bf16.msra.mxu1 %v6412_v20  ;;  %v524_v19 = vld [vmem:[#allocation5 + $0xe28] sm:$0xff] }
  0xba   :  { %3484 = vmatprep.subr.bf16.mxu0 %v6379_v21  ;;  %3525 = vmatprep.subr.bf16.mxu1 %v6381_v22  ;;  %v540_v20 = vld [vmem:[#allocation5 + $0xea8] sm:$0xff]  ;;  %v6666_v21 = vcombine.low %v555_v8, %v571_v9  ;;  %v6668_v22 = vcombine.low %v556_v10, %v572_v11  ;;  %v6443_v8 = vcombine.high %v331_v2, %v347_v3  ;;  %v301_v10 = vld [vmem:[#allocation5 + $0x730] sm:$0xff] }
  0xbb   :  { %3514 = vmatprep.mubr.bf16.mxu0 %v8700_v57  ;;  %3555 = vmatprep.mubr.bf16.mxu1 %v8700_v57  ;;  %v6637_v23 = vcombine.high %v524_v19, %v540_v20  ;;  %v317_v11 = vld [vmem:[#allocation5 + $0x7b0] sm:$0xff] }
  0xbd   :  { %3485 = vmatpush1.bf16.msra.mxu0 %v6378_v26  ;;  %3526 = vmatpush1.bf16.msra.mxu1 %v6380_v27  ;;  %v492_v26 = vld [vmem:[#allocation5 + $0xd28] sm:$0xff] }
  0xbe   :  { %3486 = vmatprep.subr.bf16.mxu0 %v6347_v28  ;;  %3527 = vmatprep.subr.bf16.mxu1 %v6349_v29  ;;  %v508_v27 = vld [vmem:[#allocation5 + $0xda8] sm:$0xff]  ;;  %v6634_v28 = vcombine.low %v523_v17, %v539_v18  ;;  %v6636_v29 = vcombine.low %v524_v19, %v540_v20  ;;  %v6415_v17 = vcombine.high %v301_v10, %v317_v11  ;;  %v269_v19 = vld [vmem:[#allocation5 + $0x630] sm:$0xff] }
  0xbf   :  { %v6605_v31 = vcombine.high %v492_v26, %v508_v27  ;;  %v285_v20 = vld [vmem:[#allocation5 + $0x6b0] sm:$0xff] }
  0xc1   :  { %3487 = vmatpush1.bf16.msra.mxu0 %v6346_v34  ;;  %3528 = vmatpush1.bf16.msra.mxu1 %v6348_v35  ;;  %v460_v34 = vld [vmem:[#allocation5 + $0xc28] sm:$0xff] }
  0xc2   :  { %3488 = vmatprep.subr.bf16.mxu0 %v6315_v36  ;;  %3529 = vmatprep.subr.bf16.mxu1 %v6317_v37  ;;  %v476_v35 = vld [vmem:[#allocation5 + $0xca8] sm:$0xff]  ;;  %v6602_v36 = vcombine.low %v491_v24, %v507_v25  ;;  %v6604_v37 = vcombine.low %v492_v26, %v508_v27  ;;  %v6383_v24 = vcombine.high %v269_v19, %v285_v20  ;;  %v237_v26 = vld [vmem:[#allocation5 + $0x530] sm:$0xff] }
  0xc3   :  { %v6573_v39 = vcombine.high %v460_v34, %v476_v35  ;;  %v253_v27 = vld [vmem:[#allocation5 + $0x5b0] sm:$0xff] }
  0xc5   :  { %3489 = vmatpush1.bf16.msra.mxu0 %v6314_v42  ;;  %3530 = vmatpush1.bf16.msra.mxu1 %v6316_v43  ;;  %v428_v42 = vld [vmem:[#allocation5 + $0xb28] sm:$0xff] }
  0xc6   :  { %3490 = vmatprep.subr.bf16.mxu0 %v6283_v44  ;;  %3531 = vmatprep.subr.bf16.mxu1 %v6285_v45  ;;  %v444_v43 = vld [vmem:[#allocation5 + $0xba8] sm:$0xff]  ;;  %v6570_v44 = vcombine.low %v459_v32, %v475_v33  ;;  %v6572_v45 = vcombine.low %v460_v34, %v476_v35  ;;  %v6351_v32 = vcombine.high %v237_v26, %v253_v27  ;;  %v205_v34 = vld [vmem:[#allocation5 + $0x430] sm:$0xff] }
  0xc7   :  { %v6541_v47 = vcombine.high %v428_v42, %v444_v43  ;;  %v221_v35 = vld [vmem:[#allocation5 + $0x4b0] sm:$0xff] }
  0xc9   :  { %3491 = vmatpush1.bf16.msra.mxu0 %v6282_v50  ;;  %3532 = vmatpush1.bf16.msra.mxu1 %v6284_v51  ;;  %v396_v50 = vld [vmem:[#allocation5 + $0xa28] sm:$0xff] }
  0xca   :  { %3492 = vmatprep.subr.bf16.mxu0 %v6251_v52  ;;  %3533 = vmatprep.subr.bf16.mxu1 %v6253_v54  ;;  %v412_v51 = vld [vmem:[#allocation5 + $0xaa8] sm:$0xff]  ;;  %v6538_v52 = vcombine.low %v427_v40, %v443_v41  ;;  %v6540_v54 = vcombine.low %v428_v42, %v444_v43  ;;  %v6319_v40 = vcombine.high %v205_v34, %v221_v35  ;;  %v173_v42 = vld [vmem:[#allocation5 + $0x330] sm:$0xff] }
  0xcb   :  { %v6509_v56 = vcombine.high %v396_v50, %v412_v51  ;;  %v189_v43 = vld [vmem:[#allocation5 + $0x3b0] sm:$0xff] }
  0xcd   :  { %3493 = vmatpush1.bf16.msra.mxu0 %v6250_v60  ;;  %3534 = vmatpush1.bf16.msra.mxu1 %v6252_v61  ;;  %v364_v60 = vld [vmem:[#allocation5 + $0x928] sm:$0xff] }
  0xce   :  { %3494 = vmatprep.subr.bf16.mxu0 %v6219_v62  ;;  %3535 = vmatprep.subr.bf16.mxu1 %v6221_v63  ;;  %v380_v61 = vld [vmem:[#allocation5 + $0x9a8] sm:$0xff]  ;;  %v6506_v62 = vcombine.low %v395_v48, %v411_v49  ;;  %v6508_v63 = vcombine.low %v396_v50, %v412_v51  ;;  %v6287_v48 = vcombine.high %v173_v42, %v189_v43  ;;  %v141_v50 = vld [vmem:[#allocation5 + $0x230] sm:$0xff] }
  0xcf   :  { %v6477_v1 = vcombine.high %v364_v60, %v380_v61  ;;  %v157_v51 = vld [vmem:[#allocation5 + $0x2b0] sm:$0xff] }
  0xd1   :  { %3495 = vmatpush1.bf16.msra.mxu0 %v6218_v4  ;;  %3536 = vmatpush1.bf16.msra.mxu1 %v6220_v5  ;;  %v332_v4 = vld [vmem:[#allocation5 + $0x828] sm:$0xff] }
  0xd2   :  { %3496 = vmatprep.subr.bf16.mxu0 %v6187_v6  ;;  %3537 = vmatprep.subr.bf16.mxu1 %v6189_v7  ;;  %v348_v5 = vld [vmem:[#allocation5 + $0x8a8] sm:$0xff]  ;;  %v6474_v6 = vcombine.low %v363_v58, %v379_v59  ;;  %v6476_v7 = vcombine.low %v364_v60, %v380_v61  ;;  %v6255_v58 = vcombine.high %v141_v50, %v157_v51  ;;  %v109_v60 = vld [vmem:[#allocation5 + $0x130] sm:$0xff] }
  0xd3   :  { %v6445_v9 = vcombine.high %v332_v4, %v348_v5  ;;  %v125_v61 = vld [vmem:[#allocation5 + $0x1b0] sm:$0xff] }
  0xd5   :  { %3497 = vmatpush1.bf16.msra.mxu0 %v6186_v13  ;;  %3538 = vmatpush1.bf16.msra.mxu1 %v6188_v14  ;;  %v302_v13 = vld [vmem:[#allocation5 + $0x738] sm:$0xff] }
  0xd6   :  { %3498 = vmatprep.subr.bf16.mxu0 %v6667_v15  ;;  %3539 = vmatprep.subr.bf16.mxu1 %v6669_v16  ;;  %v318_v14 = vld [vmem:[#allocation5 + $0x7b8] sm:$0xff]  ;;  %v6442_v15 = vcombine.low %v331_v2, %v347_v3  ;;  %v6444_v16 = vcombine.low %v332_v4, %v348_v5  ;;  %v6223_v2 = vcombine.high %v109_v60, %v125_v61  ;;  %v77_v4 = vld [vmem:[#allocation5 + $0x30] sm:$0xff] }
  0xd7   :  { %v6417_v18 = vcombine.high %v302_v13, %v318_v14  ;;  %v93_v5 = vld [vmem:[#allocation5 + $0xb0] sm:$0xff] }
  0xd9   :  { %3499 = vmatpush2.bf16.msra.mxu0 %v6666_v21  ;;  %3540 = vmatpush2.bf16.msra.mxu1 %v6668_v22  ;;  %v270_v21 = vld [vmem:[#allocation5 + $0x638] sm:$0xff] }
  0xda   :  { %3500 = vmatprep.subr.bf16.mxu0 %v6635_v53  ;;  %3541 = vmatprep.subr.bf16.mxu1 %v6637_v23  ;;  %v286_v22 = vld [vmem:[#allocation5 + $0x6b8] sm:$0xff]  ;;  %v6414_v53 = vcombine.low %v301_v10, %v317_v11  ;;  %v6416_v23 = vcombine.low %v302_v13, %v318_v14  ;;  %v6191_v10 = vcombine.high %v77_v4, %v93_v5  ;;  %v557_v13 = vld [vmem:[#allocation5 + $0xf30] sm:$0xff] }
  0xdb   :  { %v6385_v25 = vcombine.high %v270_v21, %v286_v22  ;;  %v573_v14 = vld [vmem:[#allocation5 + $0xfb0] sm:$0xff] }
  0xdd   :  { %3501 = vmatpush2.bf16.msra.mxu0 %v6634_v28  ;;  %3542 = vmatpush2.bf16.msra.mxu1 %v6636_v29  ;;  %v238_v28 = vld [vmem:[#allocation5 + $0x538] sm:$0xff] }
  0xde   :  { %3502 = vmatprep.subr.bf16.mxu0 %v6603_v30  ;;  %3543 = vmatprep.subr.bf16.mxu1 %v6605_v31  ;;  %v254_v29 = vld [vmem:[#allocation5 + $0x5b8] sm:$0xff]  ;;  %v6382_v30 = vcombine.low %v269_v19, %v285_v20  ;;  %v6384_v31 = vcombine.low %v270_v21, %v286_v22  ;;  %v6671_v19 = vcombine.high %v557_v13, %v573_v14  ;;  %v525_v21 = vld [vmem:[#allocation5 + $0xe30] sm:$0xff] }
  0xdf   :  { %v6353_v33 = vcombine.high %v238_v28, %v254_v29  ;;  %v541_v22 = vld [vmem:[#allocation5 + $0xeb0] sm:$0xff] }
  0xe1   :  { %3503 = vmatpush2.bf16.msra.mxu0 %v6602_v36  ;;  %3544 = vmatpush2.bf16.msra.mxu1 %v6604_v37  ;;  %v206_v36 = vld [vmem:[#allocation5 + $0x438] sm:$0xff] }
  0xe2   :  { %3504 = vmatprep.subr.bf16.mxu0 %v6571_v38  ;;  %3545 = vmatprep.subr.bf16.mxu1 %v6573_v39  ;;  %v222_v37 = vld [vmem:[#allocation5 + $0x4b8] sm:$0xff]  ;;  %v6350_v38 = vcombine.low %v237_v26, %v253_v27  ;;  %v6352_v39 = vcombine.low %v238_v28, %v254_v29  ;;  %v6639_v26 = vcombine.high %v525_v21, %v541_v22  ;;  %v493_v28 = vld [vmem:[#allocation5 + $0xd30] sm:$0xff] }
  0xe3   :  { %v6321_v41 = vcombine.high %v206_v36, %v222_v37  ;;  %v509_v29 = vld [vmem:[#allocation5 + $0xdb0] sm:$0xff] }
  0xe5   :  { %3505 = vmatpush2.bf16.msra.mxu0 %v6570_v44  ;;  %3546 = vmatpush2.bf16.msra.mxu1 %v6572_v45  ;;  %v174_v44 = vld [vmem:[#allocation5 + $0x338] sm:$0xff] }
  0xe6   :  { %3506 = vmatprep.subr.bf16.mxu0 %v6539_v46  ;;  %3547 = vmatprep.subr.bf16.mxu1 %v6541_v47  ;;  %v190_v45 = vld [vmem:[#allocation5 + $0x3b8] sm:$0xff]  ;;  %v6318_v46 = vcombine.low %v205_v34, %v221_v35  ;;  %v6320_v47 = vcombine.low %v206_v36, %v222_v37  ;;  %v6607_v34 = vcombine.high %v493_v28, %v509_v29  ;;  %v461_v36 = vld [vmem:[#allocation5 + $0xc30] sm:$0xff] }
  0xe7   :  { %v6289_v49 = vcombine.high %v174_v44, %v190_v45  ;;  %v477_v37 = vld [vmem:[#allocation5 + $0xcb0] sm:$0xff] }
  0xe9   :  { %3507 = vmatpush2.bf16.msra.mxu0 %v6538_v52  ;;  %3548 = vmatpush2.bf16.msra.mxu1 %v6540_v54  ;;  %v142_v52 = vld [vmem:[#allocation5 + $0x238] sm:$0xff] }
  0xea   :  { %3508 = vmatprep.subr.bf16.mxu0 %v6507_v55  ;;  %3549 = vmatprep.subr.bf16.mxu1 %v6509_v56  ;;  %v158_v54 = vld [vmem:[#allocation5 + $0x2b8] sm:$0xff]  ;;  %v6286_v55 = vcombine.low %v173_v42, %v189_v43  ;;  %v6288_v56 = vcombine.low %v174_v44, %v190_v45  ;;  %v6575_v42 = vcombine.high %v461_v36, %v477_v37  ;;  %v429_v44 = vld [vmem:[#allocation5 + $0xb30] sm:$0xff] }
  0xeb   :  { %v6257_v59 = vcombine.high %v142_v52, %v158_v54  ;;  %v445_v45 = vld [vmem:[#allocation5 + $0xbb0] sm:$0xff] }
  0xed   :  { %3509 = vmatpush2.bf16.msra.mxu0 %v6506_v62  ;;  %3550 = vmatpush2.bf16.msra.mxu1 %v6508_v63  ;;  %v110_v62 = vld [vmem:[#allocation5 + $0x138] sm:$0xff] }
  0xee   :  { %3510 = vmatprep.subr.bf16.mxu0 %v6475_v0  ;;  %3551 = vmatprep.subr.bf16.mxu1 %v6477_v1  ;;  %v126_v63 = vld [vmem:[#allocation5 + $0x1b8] sm:$0xff]  ;;  %v6254_v0 = vcombine.low %v141_v50, %v157_v51  ;;  %v6256_v1 = vcombine.low %v142_v52, %v158_v54  ;;  %v6543_v50 = vcombine.high %v429_v44, %v445_v45  ;;  %v397_v52 = vld [vmem:[#allocation5 + $0xa30] sm:$0xff] }
  0xef   :  { %v6225_v3 = vcombine.high %v110_v62, %v126_v63  ;;  %v413_v54 = vld [vmem:[#allocation5 + $0xab0] sm:$0xff] }
  0xf1   :  { %3511 = vmatpush2.bf16.msra.mxu0 %v6474_v6  ;;  %3552 = vmatpush2.bf16.msra.mxu1 %v6476_v7  ;;  %v78_v6 = vld [vmem:[#allocation5 + $0x38] sm:$0xff] }
  0xf2   :  { %3512 = vmatprep.subr.bf16.mxu0 %v6443_v8  ;;  %3553 = vmatprep.subr.bf16.mxu1 %v6445_v9  ;;  %v94_v7 = vld [vmem:[#allocation5 + $0xb8] sm:$0xff]  ;;  %v6222_v8 = vcombine.low %v109_v60, %v125_v61  ;;  %v6224_v9 = vcombine.low %v110_v62, %v126_v63  ;;  %v6511_v60 = vcombine.high %v397_v52, %v413_v54  ;;  %v365_v62 = vld [vmem:[#allocation5 + $0x930] sm:$0xff] }
  0xf3   :  { %v6193_v11 = vcombine.high %v78_v6, %v94_v7  ;;  %v381_v63 = vld [vmem:[#allocation5 + $0x9b0] sm:$0xff] }
  0xf5   :  { %3513 = vmatpush2.bf16.msra.mxu0 %v6442_v15  ;;  %3554 = vmatpush2.bf16.msra.mxu1 %v6444_v16  ;;  %v558_v15 = vld [vmem:[#allocation5 + $0xf38] sm:$0xff] }
  0xf6   :  { %3564 = vmatprep.subr.bf16.mxu0 %v6415_v17  ;;  %3605 = vmatprep.subr.bf16.mxu1 %v6417_v18  ;;  %v574_v16 = vld [vmem:[#allocation5 + $0xfb8] sm:$0xff]  ;;  %v6190_v17 = vcombine.low %v77_v4, %v93_v5  ;;  %v6192_v18 = vcombine.low %v78_v6, %v94_v7  ;;  %v6479_v4 = vcombine.high %v365_v62, %v381_v63  ;;  %v333_v6 = vld [vmem:[#allocation5 + $0x830] sm:$0xff] }
  0xf7   :  { %v6673_v20 = vcombine.high %v558_v15, %v574_v16  ;;  %v349_v7 = vld [vmem:[#allocation5 + $0x8b0] sm:$0xff] }
  0xf8   :  { %3515 = vmatmul.mubr.bf16.vlgmr.msra.gmra.mxu0 %v8706_v12  ;;  %3556 = vmatmul.mubr.bf16.vlgmr.msra.gmra.mxu1 %v8706_v12 }
  0xf9   :  { %3565 = vmatpush1.bf16.msra.mxu0 %v6414_v53  ;;  %3606 = vmatpush1.bf16.msra.mxu1 %v6416_v23  ;;  %v526_v53 = vld [vmem:[#allocation5 + $0xe38] sm:$0xff] }
  0xfa   :  { %3566 = vmatprep.subr.bf16.mxu0 %v6383_v24  ;;  %3607 = vmatprep.subr.bf16.mxu1 %v6385_v25  ;;  %v542_v23 = vld [vmem:[#allocation5 + $0xeb8] sm:$0xff]  ;;  %v6670_v24 = vcombine.low %v557_v13, %v573_v14  ;;  %v6672_v25 = vcombine.low %v558_v15, %v574_v16  ;;  %v6447_v13 = vcombine.high %v333_v6, %v349_v7  ;;  %v303_v15 = vld [vmem:[#allocation5 + $0x740] sm:$0xff] }
  0xfb   :  { %3596 = vmatprep.mubr.bf16.mxu0 %v8700_v57  ;;  %3637 = vmatprep.mubr.bf16.mxu1 %v8700_v57  ;;  %v6641_v27 = vcombine.high %v526_v53, %v542_v23  ;;  %v319_v16 = vld [vmem:[#allocation5 + $0x7c0] sm:$0xff] }
  0xfd   :  { %3567 = vmatpush1.bf16.msra.mxu0 %v6382_v30  ;;  %3608 = vmatpush1.bf16.msra.mxu1 %v6384_v31  ;;  %v494_v30 = vld [vmem:[#allocation5 + $0xd38] sm:$0xff] }
  0xfe   :  { %3568 = vmatprep.subr.bf16.mxu0 %v6351_v32  ;;  %3609 = vmatprep.subr.bf16.mxu1 %v6353_v33  ;;  %v510_v31 = vld [vmem:[#allocation5 + $0xdb8] sm:$0xff]  ;;  %v6638_v32 = vcombine.low %v525_v21, %v541_v22  ;;  %v6640_v33 = vcombine.low %v526_v53, %v542_v23  ;;  %v6419_v21 = vcombine.high %v303_v15, %v319_v16  ;;  %v271_v53 = vld [vmem:[#allocation5 + $0x640] sm:$0xff] }
  0xff   :  { %v6609_v35 = vcombine.high %v494_v30, %v510_v31  ;;  %v287_v23 = vld [vmem:[#allocation5 + $0x6c0] sm:$0xff] }
 0x101   :  { %3569 = vmatpush1.bf16.msra.mxu0 %v6350_v38  ;;  %3610 = vmatpush1.bf16.msra.mxu1 %v6352_v39  ;;  %v462_v38 = vld [vmem:[#allocation5 + $0xc38] sm:$0xff] }
 0x102   :  { %3570 = vmatprep.subr.bf16.mxu0 %v6319_v40  ;;  %3611 = vmatprep.subr.bf16.mxu1 %v6321_v41  ;;  %v478_v39 = vld [vmem:[#allocation5 + $0xcb8] sm:$0xff]  ;;  %v6606_v40 = vcombine.low %v493_v28, %v509_v29  ;;  %v6608_v41 = vcombine.low %v494_v30, %v510_v31  ;;  %v6387_v28 = vcombine.high %v271_v53, %v287_v23  ;;  %v239_v30 = vld [vmem:[#allocation5 + $0x540] sm:$0xff] }
 0x103   :  { %v6577_v43 = vcombine.high %v462_v38, %v478_v39  ;;  %v255_v31 = vld [vmem:[#allocation5 + $0x5c0] sm:$0xff] }
 0x105   :  { %3571 = vmatpush1.bf16.msra.mxu0 %v6318_v46  ;;  %3612 = vmatpush1.bf16.msra.mxu1 %v6320_v47  ;;  %v430_v46 = vld [vmem:[#allocation5 + $0xb38] sm:$0xff] }
 0x106   :  { %3572 = vmatprep.subr.bf16.mxu0 %v6287_v48  ;;  %3613 = vmatprep.subr.bf16.mxu1 %v6289_v49  ;;  %v446_v47 = vld [vmem:[#allocation5 + $0xbb8] sm:$0xff]  ;;  %v6574_v48 = vcombine.low %v461_v36, %v477_v37  ;;  %v6576_v49 = vcombine.low %v462_v38, %v478_v39  ;;  %v6386_v36 = vcombine.low %v271_v53, %v287_v23 }
 0x107   :  { %v6545_v51 = vcombine.high %v430_v46, %v446_v47  ;;  %v6355_v39 = vcombine.high %v239_v30, %v255_v31 }
 0x109   :  { %3573 = vmatpush1.bf16.msra.mxu0 %v6286_v55  ;;  %3614 = vmatpush1.bf16.msra.mxu1 %v6288_v56  ;;  %v398_v55 = vld [vmem:[#allocation5 + $0xa38] sm:$0xff] }
 0x10a   :  { %3574 = vmatprep.subr.bf16.mxu0 %v6255_v58  ;;  %3615 = vmatprep.subr.bf16.mxu1 %v6257_v59  ;;  %v414_v56 = vld [vmem:[#allocation5 + $0xab8] sm:$0xff]  ;;  %v6542_v58 = vcombine.low %v429_v44, %v445_v45  ;;  %v6544_v59 = vcombine.low %v430_v46, %v446_v47  ;;  %v208_v45 = vld [vmem:[#allocation5 + $0x448] sm:$0xff] }
 0x10b   :  { %v6513_v61 = vcombine.high %v398_v55, %v414_v56  ;;  %v224_v46 = vld [vmem:[#allocation5 + $0x4c8] sm:$0xff] }
 0x10d   :  { %3575 = vmatpush1.bf16.msra.mxu0 %v6254_v0  ;;  %3616 = vmatpush1.bf16.msra.mxu1 %v6256_v1  ;;  %v366_v0 = vld [vmem:[#allocation5 + $0x938] sm:$0xff] }
 0x10e   :  { %3576 = vmatprep.subr.bf16.mxu0 %v6223_v2  ;;  %3617 = vmatprep.subr.bf16.mxu1 %v6225_v3  ;;  %v382_v1 = vld [vmem:[#allocation5 + $0x9b8] sm:$0xff]  ;;  %v6510_v2 = vcombine.low %v397_v52, %v413_v54  ;;  %v6512_v3 = vcombine.low %v398_v55, %v414_v56  ;;  %v6325_v54 = vcombine.high %v208_v45, %v224_v46  ;;  %v175_v55 = vld [vmem:[#allocation5 + $0x340] sm:$0xff] }
 0x10f   :  { %v6481_v5 = vcombine.high %v366_v0, %v382_v1  ;;  %v191_v56 = vld [vmem:[#allocation5 + $0x3c0] sm:$0xff] }
 0x111   :  { %3577 = vmatpush1.bf16.msra.mxu0 %v6222_v8  ;;  %3618 = vmatpush1.bf16.msra.mxu1 %v6224_v9  ;;  %v334_v8 = vld [vmem:[#allocation5 + $0x838] sm:$0xff] }
 0x112   :  { %3578 = vmatprep.subr.bf16.mxu0 %v6191_v10  ;;  %3619 = vmatprep.subr.bf16.mxu1 %v6193_v11  ;;  %v350_v9 = vld [vmem:[#allocation5 + $0x8b8] sm:$0xff]  ;;  %v6478_v10 = vcombine.low %v365_v62, %v381_v63  ;;  %v6480_v11 = vcombine.low %v366_v0, %v382_v1  ;;  %v6291_v62 = vcombine.high %v175_v55, %v191_v56  ;;  %v143_v0 = vld [vmem:[#allocation5 + $0x240] sm:$0xff] }
 0x113   :  { %v6449_v14 = vcombine.high %v334_v8, %v350_v9  ;;  %v159_v1 = vld [vmem:[#allocation5 + $0x2c0] sm:$0xff] }
 0x115   :  { %3579 = vmatpush1.bf16.msra.mxu0 %v6190_v17  ;;  %3620 = vmatpush1.bf16.msra.mxu1 %v6192_v18  ;;  %v304_v17 = vld [vmem:[#allocation5 + $0x748] sm:$0xff] }
 0x116   :  { %3580 = vmatprep.subr.bf16.mxu0 %v6671_v19  ;;  %3621 = vmatprep.subr.bf16.mxu1 %v6673_v20  ;;  %v320_v18 = vld [vmem:[#allocation5 + $0x7c8] sm:$0xff]  ;;  %v6446_v19 = vcombine.low %v333_v6, %v349_v7  ;;  %v6448_v20 = vcombine.low %v334_v8, %v350_v9  ;;  %v6259_v6 = vcombine.high %v143_v0, %v159_v1  ;;  %v111_v8 = vld [vmem:[#allocation5 + $0x140] sm:$0xff] }
 0x117   :  { %v6421_v22 = vcombine.high %v304_v17, %v320_v18  ;;  %v127_v9 = vld [vmem:[#allocation5 + $0x1c0] sm:$0xff] }
 0x119   :  { %3581 = vmatpush2.bf16.msra.mxu0 %v6670_v24  ;;  %3622 = vmatpush2.bf16.msra.mxu1 %v6672_v25  ;;  %v272_v24 = vld [vmem:[#allocation5 + $0x648] sm:$0xff] }
 0x11a   :  { %3582 = vmatprep.subr.bf16.mxu0 %v6639_v26  ;;  %3623 = vmatprep.subr.bf16.mxu1 %v6641_v27  ;;  %v288_v25 = vld [vmem:[#allocation5 + $0x6c8] sm:$0xff]  ;;  %v6418_v26 = vcombine.low %v303_v15, %v319_v16  ;;  %v6420_v27 = vcombine.low %v304_v17, %v320_v18  ;;  %v6227_v15 = vcombine.high %v111_v8, %v127_v9  ;;  %v79_v17 = vld [vmem:[#allocation5 + $0x40] sm:$0xff] }
 0x11b   :  { %v6389_v29 = vcombine.high %v272_v24, %v288_v25  ;;  %v6388_v38 = vcombine.low %v272_v24, %v288_v25  ;;  %v95_v18 = vld [vmem:[#allocation5 + $0xc0] sm:$0xff] }
 0x11c   :  { %v6195_v53 = vcombine.high %v79_v17, %v95_v18  ;;  %v559_v24 = vld [vmem:[#allocation5 + $0xf40] sm:$0xff] }
 0x11d   :  { %3583 = vmatpush2.bf16.msra.mxu0 %v6638_v32  ;;  %3624 = vmatpush2.bf16.msra.mxu1 %v6640_v33  ;;  %v240_v33 = vld [vmem:[#allocation5 + $0x548] sm:$0xff]  ;;  %v575_v25 = vld [vmem:[#allocation5 + $0xfc0] sm:$0xff] }
 0x11e   :  { %3584 = vmatprep.subr.bf16.mxu0 %v6607_v34  ;;  %3625 = vmatprep.subr.bf16.mxu1 %v6609_v35  ;;  %v256_v34 = vld [vmem:[#allocation5 + $0x5c8] sm:$0xff] }
 0x121   :  { %3585 = vmatpush2.bf16.msra.mxu0 %v6606_v40  ;;  %3626 = vmatpush2.bf16.msra.mxu1 %v6608_v41  ;;  %v6357_v41 = vcombine.high %v240_v33, %v256_v34 }
 0x122   :  { %3586 = vmatprep.subr.bf16.mxu0 %v6575_v42  ;;  %3627 = vmatprep.subr.bf16.mxu1 %v6577_v43  ;;  %v207_v42 = vld [vmem:[#allocation5 + $0x440] sm:$0xff] }
 0x123   :  { %v223_v43 = vld [vmem:[#allocation5 + $0x4c0] sm:$0xff] }
 0x125   :  { %3587 = vmatpush2.bf16.msra.mxu0 %v6574_v48  ;;  %3628 = vmatpush2.bf16.msra.mxu1 %v6576_v49  ;;  %v6354_v48 = vcombine.low %v239_v30, %v255_v31  ;;  %v6675_v30 = vcombine.high %v559_v24, %v575_v25 }
 0x126   :  { %3588 = vmatprep.subr.bf16.mxu0 %v6543_v50  ;;  %3629 = vmatprep.subr.bf16.mxu1 %v6545_v51  ;;  %v6356_v50 = vcombine.low %v240_v33, %v256_v34  ;;  %v6323_v51 = vcombine.high %v207_v42, %v223_v43  ;;  %v527_v33 = vld [vmem:[#allocation5 + $0xe40] sm:$0xff] }
 0x127   :  { %v543_v34 = vld [vmem:[#allocation5 + $0xec0] sm:$0xff] }
 0x129   :  { %3589 = vmatpush2.bf16.msra.mxu0 %v6542_v58  ;;  %3630 = vmatpush2.bf16.msra.mxu1 %v6544_v59  ;;  %v176_v58 = vld [vmem:[#allocation5 + $0x348] sm:$0xff] }
 0x12a   :  { %3590 = vmatprep.subr.bf16.mxu0 %v6511_v60  ;;  %3631 = vmatprep.subr.bf16.mxu1 %v6513_v61  ;;  %v192_v59 = vld [vmem:[#allocation5 + $0x3c8] sm:$0xff]  ;;  %v6322_v60 = vcombine.low %v207_v42, %v223_v43  ;;  %v6324_v61 = vcombine.low %v208_v45, %v224_v46  ;;  %v6643_v42 = vcombine.high %v527_v33, %v543_v34  ;;  %v511_v45 = vld [vmem:[#allocation5 + $0xdc0] sm:$0xff] }
 0x12b   :  { %v6293_v63 = vcombine.high %v176_v58, %v192_v59  ;;  %v496_v46 = vld [vmem:[#allocation5 + $0xd48] sm:$0xff] }
 0x12d   :  { %3591 = vmatpush2.bf16.msra.mxu0 %v6510_v2  ;;  %3632 = vmatpush2.bf16.msra.mxu1 %v6512_v3  ;;  %v144_v2 = vld [vmem:[#allocation5 + $0x248] sm:$0xff] }
 0x12e   :  { %3592 = vmatprep.subr.bf16.mxu0 %v6479_v4  ;;  %3633 = vmatprep.subr.bf16.mxu1 %v6481_v5  ;;  %v160_v3 = vld [vmem:[#allocation5 + $0x2c8] sm:$0xff]  ;;  %v6290_v4 = vcombine.low %v175_v55, %v191_v56  ;;  %v6292_v5 = vcombine.low %v176_v58, %v192_v59 }
 0x12f   :  { %v6261_v7 = vcombine.high %v144_v2, %v160_v3  ;;  %v464_v55 = vld [vmem:[#allocation5 + $0xc48] sm:$0xff] }
 0x130   :  { %v480_v56 = vld [vmem:[#allocation5 + $0xcc8] sm:$0xff] }
 0x131   :  { %3593 = vmatpush2.bf16.msra.mxu0 %v6478_v10  ;;  %3634 = vmatpush2.bf16.msra.mxu1 %v6480_v11  ;;  %v112_v10 = vld [vmem:[#allocation5 + $0x148] sm:$0xff] }
 0x132   :  { %3594 = vmatprep.subr.bf16.mxu0 %v6447_v13  ;;  %3635 = vmatprep.subr.bf16.mxu1 %v6449_v14  ;;  %v128_v11 = vld [vmem:[#allocation5 + $0x1c8] sm:$0xff]  ;;  %v6258_v13 = vcombine.low %v143_v0, %v159_v1  ;;  %v6260_v14 = vcombine.low %v144_v2, %v160_v3  ;;  %v6580_v3 = vcombine.low %v464_v55, %v480_v56 }
 0x133   :  { %v6229_v16 = vcombine.high %v112_v10, %v128_v11  ;;  %v432_v0 = vld [vmem:[#allocation5 + $0xb48] sm:$0xff] }
 0x134   :  { %v448_v1 = vld [vmem:[#allocation5 + $0xbc8] sm:$0xff] }
 0x135   :  { %3595 = vmatpush2.bf16.msra.mxu0 %v6446_v19  ;;  %3636 = vmatpush2.bf16.msra.mxu1 %v6448_v20  ;;  %v80_v19 = vld [vmem:[#allocation5 + $0x48] sm:$0xff] }
 0x136   :  { %3646 = vmatprep.subr.bf16.mxu0 %v6419_v21  ;;  %3687 = vmatprep.subr.bf16.mxu1 %v6421_v22  ;;  %v96_v20 = vld [vmem:[#allocation5 + $0xc8] sm:$0xff]  ;;  %v6226_v21 = vcombine.low %v111_v8, %v127_v9  ;;  %v6228_v22 = vcombine.low %v112_v10, %v128_v11  ;;  %v6548_v11 = vcombine.low %v432_v0, %v448_v1 }
 0x137   :  { %v6197_v23 = vcombine.high %v80_v19, %v96_v20  ;;  %v400_v8 = vld [vmem:[#allocation5 + $0xa48] sm:$0xff] }
 0x138   :  { %v8720_v32 = vpop.f32.mrf.mxu0  ;;  %3597 = vmatmul.mubr.bf16.vlgmr.msra.gmra.mxu0 %v8706_v12  ;;  %v8723_v35 = vpop.f32.mrf.mxu1  ;;  %3638 = vmatmul.mubr.bf16.vlgmr.msra.gmra.mxu1 %v8706_v12  ;;  %v416_v9 = vld [vmem:[#allocation5 + $0xac8] sm:$0xff] }
 0x139   :  { %3647 = vmatpush1.bf16.msra.mxu0 %v6418_v26  ;;  %3688 = vmatpush1.bf16.msra.mxu1 %v6420_v27  ;;  %v560_v26 = vld [vmem:[#allocation5 + $0xf48] sm:$0xff] }
 0x13a   :  { %v8726_v37 = vpop.f32.mrf.mxu0  ;;  %3648 = vmatprep.subr.bf16.mxu0 %v6387_v28  ;;  %v8728_v40 = vpop.f32.mrf.mxu1  ;;  %3689 = vmatprep.subr.bf16.mxu1 %v6389_v29  ;;  %v576_v27 = vld [vmem:[#allocation5 + $0xfc8] sm:$0xff]  ;;  %v6194_v28 = vcombine.low %v79_v17, %v95_v18  ;;  %v6196_v29 = vcombine.low %v80_v19, %v96_v20  ;;  %v6516_v20 = vcombine.low %v400_v8, %v416_v9 }
 0x13b   :  { %3678 = vmatprep.mubr.bf16.mxu0 %v8700_v57  ;;  %3719 = vmatprep.mubr.bf16.mxu1 %v8700_v57  ;;  %v6677_v31 = vcombine.high %v560_v26, %v576_v27  ;;  %v368_v17 = vld [vmem:[#allocation5 + $0x948] sm:$0xff] }
 0x13c   :  { %v3356_v44 = vpop.f32.mrf.mxu0  ;;  %v3397_v47 = vpop.f32.mrf.mxu1  ;;  %v384_v18 = vld [vmem:[#allocation5 + $0x9c8] sm:$0xff] }
 0x13d   :  { %3649 = vmatpush1.bf16.msra.mxu0 %v6386_v36  ;;  %3690 = vmatpush1.bf16.msra.mxu1 %v6388_v38  ;;  %v528_v36 = vld [vmem:[#allocation5 + $0xe48] sm:$0xff]  ;;  %v495_v44 = vld [vmem:[#allocation5 + $0xd40] sm:$0xff] }
 0x13e   :  { %v3357_v49 = vpop.f32.mrf.mxu0  ;;  %3650 = vmatprep.subr.bf16.mxu0 %v6355_v39  ;;  %v3398_v52 = vpop.f32.mrf.mxu1  ;;  %3691 = vmatprep.subr.bf16.mxu1 %v6357_v41  ;;  %v544_v38 = vld [vmem:[#allocation5 + $0xec8] sm:$0xff]  ;;  %v6674_v39 = vcombine.low %v559_v24, %v575_v25  ;;  %v6676_v41 = vcombine.low %v560_v26, %v576_v27  ;;  %v6610_v58 = vcombine.low %v495_v44, %v511_v45 }
 0x13f   :  { %v6645_v43 = vcombine.high %v528_v36, %v544_v38  ;;  %v512_v47 = vld [vmem:[#allocation5 + $0xdc8] sm:$0xff]  ;;  %v6644_v49 = vcombine.low %v528_v36, %v544_v38  ;;  %v463_v52 = vld [vmem:[#allocation5 + $0xc40] sm:$0xff]  ;;  %v6484_v27 = vcombine.low %v368_v17, %v384_v18 }
 0x140   :  { %v6612_v59 = vcombine.low %v496_v46, %v512_v47  ;;  %v336_v24 = vld [vmem:[#allocation5 + $0x848] sm:$0xff] }
 0x141   :  { %3651 = vmatpush1.bf16.msra.mxu0 %v6354_v48  ;;  %3692 = vmatpush1.bf16.msra.mxu1 %v6356_v50  ;;  %v6642_v48 = vcombine.low %v527_v33, %v543_v34  ;;  %v6611_v50 = vcombine.high %v495_v44, %v511_v45  ;;  %v352_v25 = vld [vmem:[#allocation5 + $0x8c8] sm:$0xff]  ;;  %v306_v33 = vld [vmem:[#allocation5 + $0x758] sm:$0xff] }
 0x142   :  { %3652 = vmatprep.subr.bf16.mxu0 %v6323_v51  ;;  %3693 = vmatprep.subr.bf16.mxu1 %v6325_v54  ;;  %v6613_v51 = vcombine.high %v496_v46, %v512_v47  ;;  %v479_v54 = vld [vmem:[#allocation5 + $0xcc0] sm:$0xff]  ;;  %v322_v34 = vld [vmem:[#allocation5 + $0x7d8] sm:$0xff]  ;;  %v6452_v38 = vcombine.low %v336_v24, %v352_v25 }
 0x143   :  { %v6578_v2 = vcombine.low %v463_v52, %v479_v54  ;;  %v274_v44 = vld [vmem:[#allocation5 + $0x658] sm:$0xff]  ;;  %v6424_v47 = vcombine.low %v306_v33, %v322_v34 }
 0x144   :  { %v290_v45 = vld [vmem:[#allocation5 + $0x6d8] sm:$0xff] }
 0x145   :  { %3653 = vmatpush1.bf16.msra.mxu0 %v6322_v60  ;;  %3694 = vmatpush1.bf16.msra.mxu1 %v6324_v61  ;;  %v6579_v60 = vcombine.high %v463_v52, %v479_v54  ;;  %v6581_v61 = vcombine.high %v464_v55, %v480_v56  ;;  %v242_v54 = vld [vmem:[#allocation5 + $0x558] sm:$0xff] }
 0x146   :  { %3654 = vmatprep.subr.bf16.mxu0 %v6291_v62  ;;  %3695 = vmatprep.subr.bf16.mxu1 %v6293_v63  ;;  %v431_v62 = vld [vmem:[#allocation5 + $0xb40] sm:$0xff]  ;;  %v258_v55 = vld [vmem:[#allocation5 + $0x5d8] sm:$0xff] }
 0x147   :  { %v447_v63 = vld [vmem:[#allocation5 + $0xbc0] sm:$0xff] }
 0x148   :  { %v6546_v10 = vcombine.low %v431_v62, %v447_v63 }
 0x149   :  { %3655 = vmatpush1.bf16.msra.mxu0 %v6290_v4  ;;  %3696 = vmatpush1.bf16.msra.mxu1 %v6292_v5  ;;  %v6547_v4 = vcombine.high %v431_v62, %v447_v63  ;;  %v6549_v5 = vcombine.high %v432_v0, %v448_v1  ;;  %v6361_v63 = vcombine.high %v242_v54, %v258_v55  ;;  %v209_v0 = vld [vmem:[#allocation5 + $0x450] sm:$0xff] }
 0x14a   :  { %3656 = vmatprep.subr.bf16.mxu0 %v6259_v6  ;;  %3697 = vmatprep.subr.bf16.mxu1 %v6261_v7  ;;  %v399_v6 = vld [vmem:[#allocation5 + $0xa40] sm:$0xff]  ;;  %v225_v1 = vld [vmem:[#allocation5 + $0x4d0] sm:$0xff] }
 0x14b   :  { %v415_v7 = vld [vmem:[#allocation5 + $0xac0] sm:$0xff] }
 0x14c   :  { %v6514_v19 = vcombine.low %v399_v6, %v415_v7 }
 0x14d   :  { %3657 = vmatpush1.bf16.msra.mxu0 %v6258_v13  ;;  %3698 = vmatpush1.bf16.msra.mxu1 %v6260_v14  ;;  %v6515_v13 = vcombine.high %v399_v6, %v415_v7  ;;  %v6517_v14 = vcombine.high %v400_v8, %v416_v9  ;;  %v6360_v8 = vcombine.low %v242_v54, %v258_v55 }
 0x14e   :  { %3658 = vmatprep.subr.bf16.mxu0 %v6227_v15  ;;  %3699 = vmatprep.subr.bf16.mxu1 %v6229_v16  ;;  %v367_v15 = vld [vmem:[#allocation5 + $0x940] sm:$0xff]  ;;  %v6327_v9 = vcombine.high %v209_v0, %v225_v1 }
 0x14f   :  { %v383_v16 = vld [vmem:[#allocation5 + $0x9c0] sm:$0xff] }
 0x150   :  { %v6482_v26 = vcombine.low %v367_v15, %v383_v16 }
 0x151   :  { %3659 = vmatpush1.bf16.msra.mxu0 %v6226_v21  ;;  %3700 = vmatpush1.bf16.msra.mxu1 %v6228_v22  ;;  %v6483_v21 = vcombine.high %v367_v15, %v383_v16  ;;  %v6485_v22 = vcombine.high %v368_v17, %v384_v18  ;;  %v178_v15 = vld [vmem:[#allocation5 + $0x358] sm:$0xff]  ;;  %v6326_v17 = vcombine.low %v209_v0, %v225_v1 }
 0x152   :  { %3660 = vmatprep.subr.bf16.mxu0 %v6195_v53  ;;  %3701 = vmatprep.subr.bf16.mxu1 %v6197_v23  ;;  %v335_v53 = vld [vmem:[#allocation5 + $0x840] sm:$0xff]  ;;  %v194_v16 = vld [vmem:[#allocation5 + $0x3d8] sm:$0xff] }
 0x153   :  { %v351_v23 = vld [vmem:[#allocation5 + $0x8c0] sm:$0xff]  ;;  %v530_v0 = vld [vmem:[#allocation5 + $0xe58] sm:$0xff] }
 0x154   :  { %v6450_v36 = vcombine.low %v335_v53, %v351_v23  ;;  %v546_v1 = vld [vmem:[#allocation5 + $0xed8] sm:$0xff] }
 0x155   :  { %3661 = vmatpush1.bf16.msra.mxu0 %v6194_v28  ;;  %3702 = vmatpush1.bf16.msra.mxu1 %v6196_v29  ;;  %v6451_v28 = vcombine.high %v335_v53, %v351_v23  ;;  %v6453_v29 = vcombine.high %v336_v24, %v352_v25  ;;  %v146_v53 = vld [vmem:[#allocation5 + $0x258] sm:$0xff]  ;;  %v6296_v25 = vcombine.low %v178_v15, %v194_v16 }
 0x156   :  { %3662 = vmatprep.subr.bf16.mxu0 %v6675_v30  ;;  %3703 = vmatprep.subr.bf16.mxu1 %v6677_v31  ;;  %v305_v30 = vld [vmem:[#allocation5 + $0x750] sm:$0xff]  ;;  %v162_v23 = vld [vmem:[#allocation5 + $0x2d8] sm:$0xff] }
 0x157   :  { %v321_v31 = vld [vmem:[#allocation5 + $0x7d0] sm:$0xff] }
 0x158   :  { %v6422_v46 = vcombine.low %v305_v30, %v321_v31 }
 0x159   :  { %3663 = vmatpush2.bf16.msra.mxu0 %v6674_v39  ;;  %3704 = vmatpush2.bf16.msra.mxu1 %v6676_v41  ;;  %v6423_v39 = vcombine.high %v305_v30, %v321_v31  ;;  %v6425_v41 = vcombine.high %v306_v33, %v322_v34  ;;  %v114_v30 = vld [vmem:[#allocation5 + $0x158] sm:$0xff]  ;;  %v6264_v34 = vcombine.low %v146_v53, %v162_v23 }
 0x15a   :  { %3664 = vmatprep.subr.bf16.mxu0 %v6643_v42  ;;  %3705 = vmatprep.subr.bf16.mxu1 %v6645_v43  ;;  %v273_v42 = vld [vmem:[#allocation5 + $0x650] sm:$0xff]  ;;  %v130_v31 = vld [vmem:[#allocation5 + $0x1d8] sm:$0xff] }
 0x15b   :  { %v289_v43 = vld [vmem:[#allocation5 + $0x6d0] sm:$0xff] }
 0x15d   :  { %3665 = vmatpush2.bf16.msra.mxu0 %v6642_v48  ;;  %3706 = vmatpush2.bf16.msra.mxu1 %v6644_v49  ;;  %v6391_v48 = vcombine.high %v273_v42, %v289_v43  ;;  %v6393_v49 = vcombine.high %v274_v44, %v290_v45 }
 0x15e   :  { %3666 = vmatprep.subr.bf16.mxu0 %v6611_v50  ;;  %3707 = vmatprep.subr.bf16.mxu1 %v6613_v51  ;;  %v241_v50 = vld [vmem:[#allocation5 + $0x550] sm:$0xff] }
 0x15f   :  { %v257_v51 = vld [vmem:[#allocation5 + $0x5d0] sm:$0xff] }
 0x160   :  { %v6358_v6 = vcombine.low %v241_v50, %v257_v51 }
 0x161   :  { %3667 = vmatpush2.bf16.msra.mxu0 %v6610_v58  ;;  %3708 = vmatpush2.bf16.msra.mxu1 %v6612_v59  ;;  %v6390_v58 = vcombine.low %v273_v42, %v289_v43  ;;  %v82_v42 = vld [vmem:[#allocation5 + $0x58] sm:$0xff] }
 0x162   :  { %3668 = vmatprep.subr.bf16.mxu0 %v6579_v60  ;;  %3709 = vmatprep.subr.bf16.mxu1 %v6581_v61  ;;  %v6392_v60 = vcombine.low %v274_v44, %v290_v45  ;;  %v6359_v61 = vcombine.high %v241_v50, %v257_v51  ;;  %v98_v43 = vld [vmem:[#allocation5 + $0xd8] sm:$0xff]  ;;  %v6232_v45 = vcombine.low %v114_v30, %v130_v31 }
 0x163   :  { %v562_v50 = vld [vmem:[#allocation5 + $0xf58] sm:$0xff]  ;;  %v6200_v55 = vcombine.low %v82_v42, %v98_v43 }
 0x164   :  { %v578_v51 = vld [vmem:[#allocation5 + $0xfd8] sm:$0xff] }
 0x165   :  { %3669 = vmatpush2.bf16.msra.mxu0 %v6578_v2  ;;  %3710 = vmatpush2.bf16.msra.mxu1 %v6580_v3  ;;  %v210_v3 = vld [vmem:[#allocation5 + $0x458] sm:$0xff] }
 0x166   :  { %3670 = vmatprep.subr.bf16.mxu0 %v6547_v4  ;;  %3711 = vmatprep.subr.bf16.mxu1 %v6549_v5  ;;  %v226_v4 = vld [vmem:[#allocation5 + $0x4d8] sm:$0xff] }
 0x167   :  { %v6328_v18 = vcombine.low %v210_v3, %v226_v4 }
 0x169   :  { %3671 = vmatpush2.bf16.msra.mxu0 %v6546_v10  ;;  %3712 = vmatpush2.bf16.msra.mxu1 %v6548_v11  ;;  %v6329_v11 = vcombine.high %v210_v3, %v226_v4  ;;  %v6680_v3 = vcombine.low %v562_v50, %v578_v51 }
 0x16a   :  { %3672 = vmatprep.subr.bf16.mxu0 %v6515_v13  ;;  %3713 = vmatprep.subr.bf16.mxu1 %v6517_v14  ;;  %v177_v13 = vld [vmem:[#allocation5 + $0x350] sm:$0xff] }
 0x16b   :  { %v193_v14 = vld [vmem:[#allocation5 + $0x3d0] sm:$0xff] }
 0x16c   :  { %v6294_v24 = vcombine.low %v177_v13, %v193_v14 }
 0x16d   :  { %3673 = vmatpush2.bf16.msra.mxu0 %v6514_v19  ;;  %3714 = vmatpush2.bf16.msra.mxu1 %v6516_v20  ;;  %v6295_v19 = vcombine.high %v177_v13, %v193_v14  ;;  %v6297_v20 = vcombine.high %v178_v15, %v194_v16  ;;  %v465_v15 = vld [vmem:[#allocation5 + $0xc50] sm:$0xff] }
 0x16e   :  { %3674 = vmatprep.subr.bf16.mxu0 %v6483_v21  ;;  %3715 = vmatprep.subr.bf16.mxu1 %v6485_v22  ;;  %v145_v21 = vld [vmem:[#allocation5 + $0x250] sm:$0xff] }
 0x16f   :  { %v161_v22 = vld [vmem:[#allocation5 + $0x2d0] sm:$0xff] }
 0x170   :  { %v6262_v33 = vcombine.low %v145_v21, %v161_v22  ;;  %v481_v16 = vld [vmem:[#allocation5 + $0xcd0] sm:$0xff] }
 0x171   :  { %3675 = vmatpush2.bf16.msra.mxu0 %v6482_v26  ;;  %3716 = vmatpush2.bf16.msra.mxu1 %v6484_v27  ;;  %v6263_v26 = vcombine.high %v145_v21, %v161_v22  ;;  %v6265_v27 = vcombine.high %v146_v53, %v162_v23  ;;  %v6583_v21 = vcombine.high %v465_v15, %v481_v16  ;;  %v433_v53 = vld [vmem:[#allocation5 + $0xb50] sm:$0xff] }
 0x172   :  { %3676 = vmatprep.subr.bf16.mxu0 %v6451_v28  ;;  %3717 = vmatprep.subr.bf16.mxu1 %v6453_v29  ;;  %v113_v28 = vld [vmem:[#allocation5 + $0x150] sm:$0xff] }
 0x173   :  { %v129_v29 = vld [vmem:[#allocation5 + $0x1d0] sm:$0xff] }
 0x174   :  { %v6230_v44 = vcombine.low %v113_v28, %v129_v29  ;;  %v449_v23 = vld [vmem:[#allocation5 + $0xbd0] sm:$0xff] }
 0x175   :  { %3677 = vmatpush2.bf16.msra.mxu0 %v6450_v36  ;;  %3718 = vmatpush2.bf16.msra.mxu1 %v6452_v38  ;;  %v6231_v36 = vcombine.high %v113_v28, %v129_v29  ;;  %v6233_v38 = vcombine.high %v114_v30, %v130_v31  ;;  %v6551_v28 = vcombine.high %v433_v53, %v449_v23  ;;  %v401_v30 = vld [vmem:[#allocation5 + $0xa50] sm:$0xff] }
 0x176   :  { %3728 = vmatprep.subr.bf16.mxu0 %v6423_v39  ;;  %3769 = vmatprep.subr.bf16.mxu1 %v6425_v41  ;;  %v81_v39 = vld [vmem:[#allocation5 + $0x50] sm:$0xff] }
 0x177   :  { %v97_v41 = vld [vmem:[#allocation5 + $0xd0] sm:$0xff] }
 0x178   :  { %v8732_v52 = vpop.f32.mrf.mxu0  ;;  %3679 = vmatmul.mubr.bf16.vlgmr.msra.gmra.mxu0 %v8706_v12  ;;  %v8735_v56 = vpop.f32.mrf.mxu1  ;;  %3720 = vmatmul.mubr.bf16.vlgmr.msra.gmra.mxu1 %v8706_v12  ;;  %v6198_v54 = vcombine.low %v81_v39, %v97_v41  ;;  %v417_v31 = vld [vmem:[#allocation5 + $0xad0] sm:$0xff] }
 0x179   :  { %3729 = vmatpush1.bf16.msra.mxu0 %v6422_v46  ;;  %3770 = vmatpush1.bf16.msra.mxu1 %v6424_v47  ;;  %v6199_v46 = vcombine.high %v81_v39, %v97_v41  ;;  %v6201_v47 = vcombine.high %v82_v42, %v98_v43  ;;  %v6519_v39 = vcombine.high %v401_v30, %v417_v31  ;;  %v369_v42 = vld [vmem:[#allocation5 + $0x950] sm:$0xff] }
 0x17a   :  { %v8738_v59 = vpop.f32.mrf.mxu0  ;;  %3730 = vmatprep.subr.bf16.mxu0 %v6391_v48  ;;  %v8740_v62 = vpop.f32.mrf.mxu1  ;;  %3771 = vmatprep.subr.bf16.mxu1 %v6393_v49  ;;  %v561_v48 = vld [vmem:[#allocation5 + $0xf50] sm:$0xff] }
 0x17b   :  { %3760 = vmatprep.mubr.bf16.mxu0 %v8700_v57  ;;  %3801 = vmatprep.mubr.bf16.mxu1 %v8700_v57  ;;  %v577_v49 = vld [vmem:[#allocation5 + $0xfd0] sm:$0xff] }
 0x17c   :  { %v3438_v2 = vpop.f32.mrf.mxu0  ;;  %v3479_v5 = vpop.f32.mrf.mxu1  ;;  %v385_v43 = vld [vmem:[#allocation5 + $0x9d0] sm:$0xff] }
 0x17d   :  { %3731 = vmatpush1.bf16.msra.mxu0 %v6390_v58  ;;  %3772 = vmatpush1.bf16.msra.mxu1 %v6392_v60  ;;  %v6679_v58 = vcombine.high %v561_v48, %v577_v49  ;;  %v6681_v60 = vcombine.high %v562_v50, %v578_v51  ;;  %v6678_v2 = vcombine.low %v561_v48, %v577_v49  ;;  %v337_v50 = vld [vmem:[#allocation5 + $0x850] sm:$0xff] }
 0x17e   :  { %v3439_v7 = vpop.f32.mrf.mxu0  ;;  %3732 = vmatprep.subr.bf16.mxu0 %v6359_v61  ;;  %v3480_v10 = vpop.f32.mrf.mxu1  ;;  %3773 = vmatprep.subr.bf16.mxu1 %v6361_v63  ;;  %v529_v61 = vld [vmem:[#allocation5 + $0xe50] sm:$0xff]  ;;  %v6649_v5 = vcombine.high %v530_v0, %v546_v1  ;;  %v6487_v48 = vcombine.high %v369_v42, %v385_v43 }
 0x17f   :  { %v545_v63 = vld [vmem:[#allocation5 + $0xed0] sm:$0xff] }
 0x180   :  { %v6647_v4 = vcombine.high %v529_v61, %v545_v63  ;;  %v513_v7 = vld [vmem:[#allocation5 + $0xdd0] sm:$0xff]  ;;  %v6646_v10 = vcombine.low %v529_v61, %v545_v63 }
 0x181   :  { %3733 = vmatpush1.bf16.msra.mxu0 %v6358_v6  ;;  %3774 = vmatpush1.bf16.msra.mxu1 %v6360_v8  ;;  %v497_v6 = vld [vmem:[#allocation5 + $0xd50] sm:$0xff]  ;;  %v498_v8 = vld [vmem:[#allocation5 + $0xd58] sm:$0xff] }
 0x182   :  { %3734 = vmatprep.subr.bf16.mxu0 %v6327_v9  ;;  %3775 = vmatprep.subr.bf16.mxu1 %v6329_v11  ;;  %v514_v9 = vld [vmem:[#allocation5 + $0xdd8] sm:$0xff]  ;;  %v6648_v11 = vcombine.low %v530_v0, %v546_v1  ;;  %v6615_v13 = vcombine.high %v497_v6, %v513_v7  ;;  %v353_v51 = vld [vmem:[#allocation5 + $0x8d0] sm:$0xff]  ;;  %v307_v0 = vld [vmem:[#allocation5 + $0x760] sm:$0xff] }
 0x183   :  { %v6617_v14 = vcombine.high %v498_v8, %v514_v9  ;;  %v6455_v61 = vcombine.high %v337_v50, %v353_v51  ;;  %v323_v1 = vld [vmem:[#allocation5 + $0x7e0] sm:$0xff] }
 0x185   :  { %3735 = vmatpush1.bf16.msra.mxu0 %v6326_v17  ;;  %3776 = vmatpush1.bf16.msra.mxu1 %v6328_v18  ;;  %v466_v17 = vld [vmem:[#allocation5 + $0xc58] sm:$0xff] }
 0x186   :  { %3736 = vmatprep.subr.bf16.mxu0 %v6295_v19  ;;  %3777 = vmatprep.subr.bf16.mxu1 %v6297_v20  ;;  %v482_v18 = vld [vmem:[#allocation5 + $0xcd8] sm:$0xff]  ;;  %v6614_v19 = vcombine.low %v497_v6, %v513_v7  ;;  %v6616_v20 = vcombine.low %v498_v8, %v514_v9  ;;  %v6427_v6 = vcombine.high %v307_v0, %v323_v1  ;;  %v275_v8 = vld [vmem:[#allocation5 + $0x660] sm:$0xff] }
 0x187   :  { %v6585_v22 = vcombine.high %v466_v17, %v482_v18  ;;  %v291_v9 = vld [vmem:[#allocation5 + $0x6e0] sm:$0xff] }
 0x189   :  { %3737 = vmatpush1.bf16.msra.mxu0 %v6294_v24  ;;  %3778 = vmatpush1.bf16.msra.mxu1 %v6296_v25  ;;  %v434_v24 = vld [vmem:[#allocation5 + $0xb58] sm:$0xff] }
 0x18a   :  { %3738 = vmatprep.subr.bf16.mxu0 %v6263_v26  ;;  %3779 = vmatprep.subr.bf16.mxu1 %v6265_v27  ;;  %v450_v25 = vld [vmem:[#allocation5 + $0xbd8] sm:$0xff]  ;;  %v6582_v26 = vcombine.low %v465_v15, %v481_v16  ;;  %v6584_v27 = vcombine.low %v466_v17, %v482_v18  ;;  %v6395_v15 = vcombine.high %v275_v8, %v291_v9  ;;  %v243_v17 = vld [vmem:[#allocation5 + $0x560] sm:$0xff] }
 0x18b   :  { %v6553_v29 = vcombine.high %v434_v24, %v450_v25  ;;  %v259_v18 = vld [vmem:[#allocation5 + $0x5e0] sm:$0xff] }
 0x18d   :  { %3739 = vmatpush1.bf16.msra.mxu0 %v6262_v33  ;;  %3780 = vmatpush1.bf16.msra.mxu1 %v6264_v34  ;;  %v402_v33 = vld [vmem:[#allocation5 + $0xa58] sm:$0xff] }
 0x18e   :  { %3740 = vmatprep.subr.bf16.mxu0 %v6231_v36  ;;  %3781 = vmatprep.subr.bf16.mxu1 %v6233_v38  ;;  %v418_v34 = vld [vmem:[#allocation5 + $0xad8] sm:$0xff]  ;;  %v6550_v36 = vcombine.low %v433_v53, %v449_v23  ;;  %v6552_v38 = vcombine.low %v434_v24, %v450_v25  ;;  %v6394_v53 = vcombine.low %v275_v8, %v291_v9 }
 0x18f   :  { %v6521_v41 = vcombine.high %v402_v33, %v418_v34  ;;  %v6363_v25 = vcombine.high %v243_v17, %v259_v18 }
 0x191   :  { %3741 = vmatpush1.bf16.msra.mxu0 %v6230_v44  ;;  %3782 = vmatpush1.bf16.msra.mxu1 %v6232_v45  ;;  %v370_v44 = vld [vmem:[#allocation5 + $0x958] sm:$0xff] }
 0x192   :  { %3742 = vmatprep.subr.bf16.mxu0 %v6199_v46  ;;  %3783 = vmatprep.subr.bf16.mxu1 %v6201_v47  ;;  %v386_v45 = vld [vmem:[#allocation5 + $0x9d8] sm:$0xff]  ;;  %v6518_v46 = vcombine.low %v401_v30, %v417_v31  ;;  %v6520_v47 = vcombine.low %v402_v33, %v418_v34  ;;  %v212_v31 = vld [vmem:[#allocation5 + $0x468] sm:$0xff] }
 0x193   :  { %v6489_v49 = vcombine.high %v370_v44, %v386_v45  ;;  %v228_v33 = vld [vmem:[#allocation5 + $0x4e8] sm:$0xff] }
 0x195   :  { %3743 = vmatpush1.bf16.msra.mxu0 %v6198_v54  ;;  %3784 = vmatpush1.bf16.msra.mxu1 %v6200_v55  ;;  %v338_v54 = vld [vmem:[#allocation5 + $0x858] sm:$0xff] }
 0x196   :  { %3744 = vmatprep.subr.bf16.mxu0 %v6679_v58  ;;  %3785 = vmatprep.subr.bf16.mxu1 %v6681_v60  ;;  %v354_v55 = vld [vmem:[#allocation5 + $0x8d8] sm:$0xff]  ;;  %v6486_v58 = vcombine.low %v369_v42, %v385_v43  ;;  %v6488_v60 = vcombine.low %v370_v44, %v386_v45  ;;  %v6333_v43 = vcombine.high %v212_v31, %v228_v33  ;;  %v179_v44 = vld [vmem:[#allocation5 + $0x360] sm:$0xff] }
 0x197   :  { %v6457_v63 = vcombine.high %v338_v54, %v354_v55  ;;  %v195_v45 = vld [vmem:[#allocation5 + $0x3e0] sm:$0xff] }
 0x199   :  { %3745 = vmatpush2.bf16.msra.mxu0 %v6678_v2  ;;  %3786 = vmatpush2.bf16.msra.mxu1 %v6680_v3  ;;  %v308_v2 = vld [vmem:[#allocation5 + $0x768] sm:$0xff] }
 0x19a   :  { %3746 = vmatprep.subr.bf16.mxu0 %v6647_v4  ;;  %3787 = vmatprep.subr.bf16.mxu1 %v6649_v5  ;;  %v324_v3 = vld [vmem:[#allocation5 + $0x7e8] sm:$0xff]  ;;  %v6454_v4 = vcombine.low %v337_v50, %v353_v51  ;;  %v6456_v5 = vcombine.low %v338_v54, %v354_v55  ;;  %v6299_v50 = vcombine.high %v179_v44, %v195_v45  ;;  %v147_v54 = vld [vmem:[#allocation5 + $0x260] sm:$0xff] }
 0x19b   :  { %v6429_v7 = vcombine.high %v308_v2, %v324_v3  ;;  %v163_v55 = vld [vmem:[#allocation5 + $0x2e0] sm:$0xff] }
 0x19d   :  { %3747 = vmatpush2.bf16.msra.mxu0 %v6646_v10  ;;  %3788 = vmatpush2.bf16.msra.mxu1 %v6648_v11  ;;  %v276_v10 = vld [vmem:[#allocation5 + $0x668] sm:$0xff] }
 0x19e   :  { %3748 = vmatprep.subr.bf16.mxu0 %v6615_v13  ;;  %3789 = vmatprep.subr.bf16.mxu1 %v6617_v14  ;;  %v292_v11 = vld [vmem:[#allocation5 + $0x6e8] sm:$0xff]  ;;  %v6426_v13 = vcombine.low %v307_v0, %v323_v1  ;;  %v6428_v14 = vcombine.low %v308_v2, %v324_v3  ;;  %v6267_v0 = vcombine.high %v147_v54, %v163_v55  ;;  %v115_v2 = vld [vmem:[#allocation5 + $0x160] sm:$0xff] }
 0x19f   :  { %v6397_v16 = vcombine.high %v276_v10, %v292_v11  ;;  %v6396_v24 = vcombine.low %v276_v10, %v292_v11  ;;  %v131_v3 = vld [vmem:[#allocation5 + $0x1e0] sm:$0xff] }
 0x1a0   :  { %v6235_v8 = vcombine.high %v115_v2, %v131_v3  ;;  %v83_v10 = vld [vmem:[#allocation5 + $0x60] sm:$0xff] }
 0x1a1   :  { %3749 = vmatpush2.bf16.msra.mxu0 %v6614_v19  ;;  %3790 = vmatpush2.bf16.msra.mxu1 %v6616_v20  ;;  %v244_v20 = vld [vmem:[#allocation5 + $0x568] sm:$0xff]  ;;  %v99_v11 = vld [vmem:[#allocation5 + $0xe0] sm:$0xff] }
 0x1a2   :  { %3750 = vmatprep.subr.bf16.mxu0 %v6583_v21  ;;  %3791 = vmatprep.subr.bf16.mxu1 %v6585_v22  ;;  %v260_v21 = vld [vmem:[#allocation5 + $0x5e8] sm:$0xff] }
 0x1a5   :  { %3751 = vmatpush2.bf16.msra.mxu0 %v6582_v26  ;;  %3792 = vmatpush2.bf16.msra.mxu1 %v6584_v27  ;;  %v6365_v27 = vcombine.high %v244_v20, %v260_v21 }
 0x1a6   :  { %3752 = vmatprep.subr.bf16.mxu0 %v6551_v28  ;;  %3793 = vmatprep.subr.bf16.mxu1 %v6553_v29  ;;  %v211_v28 = vld [vmem:[#allocation5 + $0x460] sm:$0xff] }
 0x1a7   :  { %v227_v29 = vld [vmem:[#allocation5 + $0x4e0] sm:$0xff] }
 0x1a9   :  { %3753 = vmatpush2.bf16.msra.mxu0 %v6550_v36  ;;  %3794 = vmatpush2.bf16.msra.mxu1 %v6552_v38  ;;  %v6362_v36 = vcombine.low %v243_v17, %v259_v18  ;;  %v6203_v17 = vcombine.high %v83_v10, %v99_v11 }
 0x1aa   :  { %3754 = vmatprep.subr.bf16.mxu0 %v6519_v39  ;;  %3795 = vmatprep.subr.bf16.mxu1 %v6521_v41  ;;  %v6364_v39 = vcombine.low %v244_v20, %v260_v21  ;;  %v6331_v41 = vcombine.high %v211_v28, %v227_v29  ;;  %v563_v20 = vld [vmem:[#allocation5 + $0xf60] sm:$0xff] }
 0x1ab   :  { %v579_v21 = vld [vmem:[#allocation5 + $0xfe0] sm:$0xff] }
 0x1ad   :  { %3755 = vmatpush2.bf16.msra.mxu0 %v6518_v46  ;;  %3796 = vmatpush2.bf16.msra.mxu1 %v6520_v47  ;;  %v180_v46 = vld [vmem:[#allocation5 + $0x368] sm:$0xff] }
 0x1ae   :  { %3756 = vmatprep.subr.bf16.mxu0 %v6487_v48  ;;  %3797 = vmatprep.subr.bf16.mxu1 %v6489_v49  ;;  %v196_v47 = vld [vmem:[#allocation5 + $0x3e8] sm:$0xff]  ;;  %v6330_v48 = vcombine.low %v211_v28, %v227_v29  ;;  %v6332_v49 = vcombine.low %v212_v31, %v228_v33  ;;  %v6683_v28 = vcombine.high %v563_v20, %v579_v21  ;;  %v547_v31 = vld [vmem:[#allocation5 + $0xee0] sm:$0xff] }
 0x1af   :  { %v6301_v51 = vcombine.high %v180_v46, %v196_v47  ;;  %v532_v33 = vld [vmem:[#allocation5 + $0xe68] sm:$0xff] }
 0x1b1   :  { %3757 = vmatpush2.bf16.msra.mxu0 %v6486_v58  ;;  %3798 = vmatpush2.bf16.msra.mxu1 %v6488_v60  ;;  %v148_v58 = vld [vmem:[#allocation5 + $0x268] sm:$0xff] }
 0x1b2   :  { %3758 = vmatprep.subr.bf16.mxu0 %v6455_v61  ;;  %3799 = vmatprep.subr.bf16.mxu1 %v6457_v63  ;;  %v164_v60 = vld [vmem:[#allocation5 + $0x2e8] sm:$0xff]  ;;  %v6298_v61 = vcombine.low %v179_v44, %v195_v45  ;;  %v6300_v63 = vcombine.low %v180_v46, %v196_v47 }
 0x1b3   :  { %v6269_v1 = vcombine.high %v148_v58, %v164_v60  ;;  %v500_v44 = vld [vmem:[#allocation5 + $0xd68] sm:$0xff] }
 0x1b4   :  { %v516_v45 = vld [vmem:[#allocation5 + $0xde8] sm:$0xff] }
 0x1b5   :  { %3759 = vmatpush2.bf16.msra.mxu0 %v6454_v4  ;;  %3800 = vmatpush2.bf16.msra.mxu1 %v6456_v5  ;;  %v116_v4 = vld [vmem:[#allocation5 + $0x168] sm:$0xff] }
 0x1b6   :  { %3810 = vmatprep.subr.bf16.mxu0 %v6427_v6  ;;  %3851 = vmatprep.subr.bf16.mxu1 %v6429_v7  ;;  %v132_v5 = vld [vmem:[#allocation5 + $0x1e8] sm:$0xff]  ;;  %v6266_v6 = vcombine.low %v147_v54, %v163_v55  ;;  %v6268_v7 = vcombine.low %v148_v58, %v164_v60  ;;  %v6620_v60 = vcombine.low %v500_v44, %v516_v45 }
 0x1b7   :  { %v6237_v9 = vcombine.high %v116_v4, %v132_v5  ;;  %v468_v54 = vld [vmem:[#allocation5 + $0xc68] sm:$0xff] }
 0x1b8   :  { %v8744_v19 = vpop.f32.mrf.mxu0  ;;  %3761 = vmatmul.mubr.bf16.vlgmr.msra.gmra.mxu0 %v8706_v12  ;;  %v8747_v22 = vpop.f32.mrf.mxu1  ;;  %3802 = vmatmul.mubr.bf16.vlgmr.msra.gmra.mxu1 %v8706_v12  ;;  %v484_v55 = vld [vmem:[#allocation5 + $0xce8] sm:$0xff] }
 0x1b9   :  { %3811 = vmatpush1.bf16.msra.mxu0 %v6426_v13  ;;  %3852 = vmatpush1.bf16.msra.mxu1 %v6428_v14  ;;  %v84_v13 = vld [vmem:[#allocation5 + $0x68] sm:$0xff] }
 0x1ba   :  { %v8750_v23 = vpop.f32.mrf.mxu0  ;;  %3812 = vmatprep.subr.bf16.mxu0 %v6395_v15  ;;  %v8752_v26 = vpop.f32.mrf.mxu1  ;;  %3853 = vmatprep.subr.bf16.mxu1 %v6397_v16  ;;  %v100_v14 = vld [vmem:[#allocation5 + $0xe8] sm:$0xff]  ;;  %v6234_v15 = vcombine.low %v115_v2, %v131_v3  ;;  %v6236_v16 = vcombine.low %v116_v4, %v132_v5  ;;  %v6588_v5 = vcombine.low %v468_v54, %v484_v55 }
 0x1bb   :  { %3842 = vmatprep.mubr.bf16.mxu0 %v8700_v57  ;;  %3883 = vmatprep.mubr.bf16.mxu1 %v8700_v57  ;;  %v6205_v18 = vcombine.high %v84_v13, %v100_v14  ;;  %v436_v2 = vld [vmem:[#allocation5 + $0xb68] sm:$0xff] }
 0x1bc   :  { %v3520_v30 = vpop.f32.mrf.mxu0  ;;  %v3561_v34 = vpop.f32.mrf.mxu1  ;;  %v452_v3 = vld [vmem:[#allocation5 + $0xbe8] sm:$0xff] }
 0x1bd   :  { %3813 = vmatpush1.bf16.msra.mxu0 %v6394_v53  ;;  %3854 = vmatpush1.bf16.msra.mxu1 %v6396_v24  ;;  %v564_v53 = vld [vmem:[#allocation5 + $0xf68] sm:$0xff]  ;;  %v531_v30 = vld [vmem:[#allocation5 + $0xe60] sm:$0xff] }
 0x1be   :  { %v3521_v38 = vpop.f32.mrf.mxu0  ;;  %3814 = vmatprep.subr.bf16.mxu0 %v6363_v25  ;;  %v3562_v42 = vpop.f32.mrf.mxu1  ;;  %3855 = vmatprep.subr.bf16.mxu1 %v6365_v27  ;;  %v580_v24 = vld [vmem:[#allocation5 + $0xfe8] sm:$0xff]  ;;  %v6202_v25 = vcombine.low %v83_v10, %v99_v11  ;;  %v6204_v27 = vcombine.low %v84_v13, %v100_v14  ;;  %v6650_v46 = vcombine.low %v531_v30, %v547_v31 }
 0x1bf   :  { %v6685_v29 = vcombine.high %v564_v53, %v580_v24  ;;  %v548_v34 = vld [vmem:[#allocation5 + $0xee8] sm:$0xff]  ;;  %v6684_v38 = vcombine.low %v564_v53, %v580_v24  ;;  %v499_v42 = vld [vmem:[#allocation5 + $0xd60] sm:$0xff]  ;;  %v6556_v14 = vcombine.low %v436_v2, %v452_v3 }
 0x1c0   :  { %v6652_v47 = vcombine.low %v532_v33, %v548_v34  ;;  %v404_v10 = vld [vmem:[#allocation5 + $0xa68] sm:$0xff] }
 0x1c1   :  { %3815 = vmatpush1.bf16.msra.mxu0 %v6362_v36  ;;  %3856 = vmatpush1.bf16.msra.mxu1 %v6364_v39  ;;  %v6682_v36 = vcombine.low %v563_v20, %v579_v21  ;;  %v6651_v39 = vcombine.high %v531_v30, %v547_v31  ;;  %v420_v11 = vld [vmem:[#allocation5 + $0xae8] sm:$0xff] }
 0x1c2   :  { %3816 = vmatprep.subr.bf16.mxu0 %v6331_v41  ;;  %3857 = vmatprep.subr.bf16.mxu1 %v6333_v43  ;;  %v6653_v41 = vcombine.high %v532_v33, %v548_v34  ;;  %v515_v43 = vld [vmem:[#allocation5 + $0xde0] sm:$0xff]  ;;  %v372_v20 = vld [vmem:[#allocation5 + $0x968] sm:$0xff]  ;;  %v6524_v24 = vcombine.low %v404_v10, %v420_v11 }
 0x1c3   :  { %v6618_v58 = vcombine.low %v499_v42, %v515_v43  ;;  %v388_v21 = vld [vmem:[#allocation5 + $0x9e8] sm:$0xff] }
 0x1c4   :  { %v340_v30 = vld [vmem:[#allocation5 + $0x868] sm:$0xff]  ;;  %v6492_v34 = vcombine.low %v372_v20, %v388_v21 }
 0x1c5   :  { %3817 = vmatpush1.bf16.msra.mxu0 %v6330_v48  ;;  %3858 = vmatpush1.bf16.msra.mxu1 %v6332_v49  ;;  %v6619_v48 = vcombine.high %v499_v42, %v515_v43  ;;  %v6621_v49 = vcombine.high %v500_v44, %v516_v45  ;;  %v356_v31 = vld [vmem:[#allocation5 + $0x8e8] sm:$0xff]  ;;  %v310_v42 = vld [vmem:[#allocation5 + $0x778] sm:$0xff] }
 0x1c6   :  { %3818 = vmatprep.subr.bf16.mxu0 %v6299_v50  ;;  %3859 = vmatprep.subr.bf16.mxu1 %v6301_v51  ;;  %v467_v50 = vld [vmem:[#allocation5 + $0xc60] sm:$0xff]  ;;  %v326_v43 = vld [vmem:[#allocation5 + $0x7f8] sm:$0xff]  ;;  %v6460_v45 = vcombine.low %v340_v30, %v356_v31 }
 0x1c7   :  { %v483_v51 = vld [vmem:[#allocation5 + $0xce0] sm:$0xff] }
 0x1c8   :  { %v6586_v4 = vcombine.low %v467_v50, %v483_v51 }
 0x1c9   :  { %3819 = vmatpush1.bf16.msra.mxu0 %v6298_v61  ;;  %3860 = vmatpush1.bf16.msra.mxu1 %v6300_v63  ;;  %v6587_v61 = vcombine.high %v467_v50, %v483_v51  ;;  %v6589_v63 = vcombine.high %v468_v54, %v484_v55  ;;  %v278_v50 = vld [vmem:[#allocation5 + $0x678] sm:$0xff]  ;;  %v6432_v55 = vcombine.low %v310_v42, %v326_v43 }
 0x1ca   :  { %3820 = vmatprep.subr.bf16.mxu0 %v6267_v0  ;;  %3861 = vmatprep.subr.bf16.mxu1 %v6269_v1  ;;  %v435_v0 = vld [vmem:[#allocation5 + $0xb60] sm:$0xff]  ;;  %v294_v51 = vld [vmem:[#allocation5 + $0x6f8] sm:$0xff] }
 0x1cb   :  { %v451_v1 = vld [vmem:[#allocation5 + $0xbe0] sm:$0xff] }
 0x1cc   :  { %v6554_v13 = vcombine.low %v435_v0, %v451_v1 }
 0x1cd   :  { %3821 = vmatpush1.bf16.msra.mxu0 %v6266_v6  ;;  %3862 = vmatpush1.bf16.msra.mxu1 %v6268_v7  ;;  %v6555_v6 = vcombine.high %v435_v0, %v451_v1  ;;  %v6557_v7 = vcombine.high %v436_v2, %v452_v3  ;;  %v246_v1 = vld [vmem:[#allocation5 + $0x578] sm:$0xff] }
 0x1ce   :  { %3822 = vmatprep.subr.bf16.mxu0 %v6235_v8  ;;  %3863 = vmatprep.subr.bf16.mxu1 %v6237_v9  ;;  %v403_v8 = vld [vmem:[#allocation5 + $0xa60] sm:$0xff]  ;;  %v262_v2 = vld [vmem:[#allocation5 + $0x5f8] sm:$0xff] }
 0x1cf   :  { %v419_v9 = vld [vmem:[#allocation5 + $0xae0] sm:$0xff] }
 0x1d0   :  { %v6522_v53 = vcombine.low %v403_v8, %v419_v9 }
 0x1d1   :  { %3823 = vmatpush1.bf16.msra.mxu0 %v6234_v15  ;;  %3864 = vmatpush1.bf16.msra.mxu1 %v6236_v16  ;;  %v6523_v15 = vcombine.high %v403_v8, %v419_v9  ;;  %v6525_v16 = vcombine.high %v404_v10, %v420_v11  ;;  %v6369_v9 = vcombine.high %v246_v1, %v262_v2  ;;  %v213_v10 = vld [vmem:[#allocation5 + $0x470] sm:$0xff] }
 0x1d2   :  { %3824 = vmatprep.subr.bf16.mxu0 %v6203_v17  ;;  %3865 = vmatprep.subr.bf16.mxu1 %v6205_v18  ;;  %v371_v17 = vld [vmem:[#allocation5 + $0x960] sm:$0xff]  ;;  %v229_v11 = vld [vmem:[#allocation5 + $0x4f0] sm:$0xff] }
 0x1d3   :  { %v387_v18 = vld [vmem:[#allocation5 + $0x9e0] sm:$0xff] }
 0x1d4   :  { %v6490_v33 = vcombine.low %v371_v17, %v387_v18 }
 0x1d5   :  { %3825 = vmatpush1.bf16.msra.mxu0 %v6202_v25  ;;  %3866 = vmatpush1.bf16.msra.mxu1 %v6204_v27  ;;  %v6491_v25 = vcombine.high %v371_v17, %v387_v18  ;;  %v6493_v27 = vcombine.high %v372_v20, %v388_v21  ;;  %v6368_v20 = vcombine.low %v246_v1, %v262_v2 }
 0x1d6   :  { %3826 = vmatprep.subr.bf16.mxu0 %v6683_v28  ;;  %3867 = vmatprep.subr.bf16.mxu1 %v6685_v29  ;;  %v339_v28 = vld [vmem:[#allocation5 + $0x860] sm:$0xff]  ;;  %v6335_v21 = vcombine.high %v213_v10, %v229_v11 }
 0x1d7   :  { %v355_v29 = vld [vmem:[#allocation5 + $0x8e0] sm:$0xff] }
 0x1d8   :  { %v6458_v44 = vcombine.low %v339_v28, %v355_v29 }
 0x1d9   :  { %3827 = vmatpush2.bf16.msra.mxu0 %v6682_v36  ;;  %3868 = vmatpush2.bf16.msra.mxu1 %v6684_v38  ;;  %v6459_v36 = vcombine.high %v339_v28, %v355_v29  ;;  %v6461_v38 = vcombine.high %v340_v30, %v356_v31  ;;  %v182_v28 = vld [vmem:[#allocation5 + $0x378] sm:$0xff]  ;;  %v6334_v30 = vcombine.low %v213_v10, %v229_v11 }
 0x1da   :  { %3828 = vmatprep.subr.bf16.mxu0 %v6651_v39  ;;  %3869 = vmatprep.subr.bf16.mxu1 %v6653_v41  ;;  %v309_v39 = vld [vmem:[#allocation5 + $0x770] sm:$0xff]  ;;  %v198_v29 = vld [vmem:[#allocation5 + $0x3f8] sm:$0xff] }
 0x1db   :  { %v325_v41 = vld [vmem:[#allocation5 + $0x7f0] sm:$0xff]  ;;  %v582_v10 = vld [vmem:[#allocation5 + $0xff8] sm:$0xff] }
 0x1dc   :  { %v6430_v54 = vcombine.low %v309_v39, %v325_v41 }
 0x1dd   :  { %3829 = vmatpush2.bf16.msra.mxu0 %v6650_v46  ;;  %3870 = vmatpush2.bf16.msra.mxu1 %v6652_v47  ;;  %v6431_v46 = vcombine.high %v309_v39, %v325_v41  ;;  %v6433_v47 = vcombine.high %v310_v42, %v326_v43  ;;  %v166_v39 = vld [vmem:[#allocation5 + $0x2f8] sm:$0xff]  ;;  %v6304_v42 = vcombine.low %v182_v28, %v198_v29 }
 0x1de   :  { %3830 = vmatprep.subr.bf16.mxu0 %v6619_v48  ;;  %3871 = vmatprep.subr.bf16.mxu1 %v6621_v49  ;;  %v277_v48 = vld [vmem:[#allocation5 + $0x670] sm:$0xff] }
 0x1df   :  { %v293_v49 = vld [vmem:[#allocation5 + $0x6f0] sm:$0xff] }
 0x1e1   :  { %3831 = vmatpush2.bf16.msra.mxu0 %v6618_v58  ;;  %3872 = vmatpush2.bf16.msra.mxu1 %v6620_v60  ;;  %v6399_v58 = vcombine.high %v277_v48, %v293_v49  ;;  %v6401_v60 = vcombine.high %v278_v50, %v294_v51 }
 0x1e2   :  { %3832 = vmatprep.subr.bf16.mxu0 %v6587_v61  ;;  %3873 = vmatprep.subr.bf16.mxu1 %v6589_v63  ;;  %v245_v61 = vld [vmem:[#allocation5 + $0x570] sm:$0xff] }
 0x1e3   :  { %v261_v63 = vld [vmem:[#allocation5 + $0x5f0] sm:$0xff] }
 0x1e4   :  { %v6366_v17 = vcombine.low %v245_v61, %v261_v63 }
 0x1e5   :  { %3833 = vmatpush2.bf16.msra.mxu0 %v6586_v4  ;;  %3874 = vmatpush2.bf16.msra.mxu1 %v6588_v5  ;;  %v6398_v4 = vcombine.low %v277_v48, %v293_v49  ;;  %v134_v48 = vld [vmem:[#allocation5 + $0x1f8] sm:$0xff] }
 0x1e6   :  { %3834 = vmatprep.subr.bf16.mxu0 %v6555_v6  ;;  %3875 = vmatprep.subr.bf16.mxu1 %v6557_v7  ;;  %v6400_v6 = vcombine.low %v278_v50, %v294_v51  ;;  %v6367_v7 = vcombine.high %v245_v61, %v261_v63  ;;  %v102_v61 = vld [vmem:[#allocation5 + $0xf8] sm:$0xff] }
 0x1e9   :  { %3835 = vmatpush2.bf16.msra.mxu0 %v6554_v13  ;;  %3876 = vmatpush2.bf16.msra.mxu1 %v6556_v14  ;;  %v214_v14 = vld [vmem:[#allocation5 + $0x478] sm:$0xff] }
 0x1ea   :  { %3836 = vmatprep.subr.bf16.mxu0 %v6523_v15  ;;  %3877 = vmatprep.subr.bf16.mxu1 %v6525_v16  ;;  %v230_v15 = vld [vmem:[#allocation5 + $0x4f8] sm:$0xff] }
 0x1ed   :  { %3837 = vmatpush2.bf16.msra.mxu0 %v6522_v53  ;;  %3878 = vmatpush2.bf16.msra.mxu1 %v6524_v24  ;;  %v6337_v24 = vcombine.high %v214_v14, %v230_v15 }
 0x1ee   :  { %3838 = vmatprep.subr.bf16.mxu0 %v6491_v25  ;;  %3879 = vmatprep.subr.bf16.mxu1 %v6493_v27  ;;  %v181_v25 = vld [vmem:[#allocation5 + $0x370] sm:$0xff] }
 0x1ef   :  { %v197_v27 = vld [vmem:[#allocation5 + $0x3f0] sm:$0xff] }
 0x1f0   :  { %v6303_v31 = vcombine.high %v181_v25, %v197_v27  ;;  %v6302_v41 = vcombine.low %v181_v25, %v197_v27  ;;  %v501_v27 = vld [vmem:[#allocation5 + $0xd70] sm:$0xff] }
 0x1f1   :  { %3839 = vmatpush2.bf16.msra.mxu0 %v6490_v33  ;;  %3880 = vmatpush2.bf16.msra.mxu1 %v6492_v34  ;;  %v6305_v33 = vcombine.high %v182_v28, %v198_v29  ;;  %v149_v34 = vld [vmem:[#allocation5 + $0x270] sm:$0xff]  ;;  %v502_v29 = vld [vmem:[#allocation5 + $0xd78] sm:$0xff] }
 0x1f2   :  { %3840 = vmatprep.subr.bf16.mxu0 %v6459_v36  ;;  %3881 = vmatprep.subr.bf16.mxu1 %v6461_v38  ;;  %v165_v36 = vld [vmem:[#allocation5 + $0x2f0] sm:$0xff]  ;;  %v150_v38 = vld [vmem:[#allocation5 + $0x278] sm:$0xff] }
 0x1f3   :  { %v6271_v43 = vcombine.high %v149_v34, %v165_v36  ;;  %v6270_v49 = vcombine.low %v149_v34, %v165_v36  ;;  %v6272_v50 = vcombine.low %v150_v38, %v166_v39  ;;  %v517_v28 = vld [vmem:[#allocation5 + $0xdf0] sm:$0xff] }
 0x1f4   :  { %v469_v36 = vld [vmem:[#allocation5 + $0xc70] sm:$0xff] }
 0x1f5   :  { %3841 = vmatpush2.bf16.msra.mxu0 %v6458_v44  ;;  %3882 = vmatpush2.bf16.msra.mxu1 %v6460_v45  ;;  %v6273_v44 = vcombine.high %v150_v38, %v166_v39  ;;  %v117_v45 = vld [vmem:[#allocation5 + $0x170] sm:$0xff]  ;;  %v470_v39 = vld [vmem:[#allocation5 + $0xc78] sm:$0xff] }
 0x1f6   :  { %3892 = vmatprep.subr.bf16.mxu0 %v6431_v46  ;;  %3933 = vmatprep.subr.bf16.mxu1 %v6433_v47  ;;  %v133_v46 = vld [vmem:[#allocation5 + $0x1f0] sm:$0xff]  ;;  %v118_v47 = vld [vmem:[#allocation5 + $0x178] sm:$0xff] }
 0x1f7   :  { %v6239_v51 = vcombine.high %v117_v45, %v133_v46  ;;  %v6238_v63 = vcombine.low %v117_v45, %v133_v46  ;;  %v6240_v1 = vcombine.low %v118_v47, %v134_v48  ;;  %v485_v38 = vld [vmem:[#allocation5 + $0xcf0] sm:$0xff] }
 0x1f8   :  { %v8756_v0 = vpop.f32.mrf.mxu0  ;;  %3843 = vmatmul.mubr.bf16.vlgmr.msra.gmra.mxu0 %v8706_v12  ;;  %v8759_v3 = vpop.f32.mrf.mxu1  ;;  %3884 = vmatmul.mubr.bf16.vlgmr.msra.gmra.mxu1 %v8706_v12  ;;  %v437_v46 = vld [vmem:[#allocation5 + $0xb70] sm:$0xff] }
 0x1f9   :  { %3893 = vmatpush1.bf16.msra.mxu0 %v6430_v54  ;;  %3934 = vmatpush1.bf16.msra.mxu1 %v6432_v55  ;;  %v6241_v54 = vcombine.high %v118_v47, %v134_v48  ;;  %v85_v55 = vld [vmem:[#allocation5 + $0x70] sm:$0xff]  ;;  %v438_v48 = vld [vmem:[#allocation5 + $0xb78] sm:$0xff] }
 0x1fa   :  { %v8762_v5 = vpop.f32.mrf.mxu0  ;;  %3894 = vmatprep.subr.bf16.mxu0 %v6399_v58  ;;  %v8764_v8 = vpop.f32.mrf.mxu1  ;;  %3935 = vmatprep.subr.bf16.mxu1 %v6401_v60  ;;  %v101_v58 = vld [vmem:[#allocation5 + $0xf0] sm:$0xff]  ;;  %v86_v60 = vld [vmem:[#allocation5 + $0x78] sm:$0xff] }
 0x1fb   :  { %3924 = vmatprep.mubr.bf16.mxu0 %v8700_v57  ;;  %3965 = vmatprep.mubr.bf16.mxu1 %v8700_v57  ;;  %v6336_v57 = vcombine.low %v214_v14, %v230_v15  ;;  %v6207_v2 = vcombine.high %v85_v55, %v101_v58  ;;  %v6206_v11 = vcombine.low %v85_v55, %v101_v58  ;;  %v453_v47 = vld [vmem:[#allocation5 + $0xbf0] sm:$0xff] }
 0x1fc   :  { %v3602_v13 = vpop.f32.mrf.mxu0  ;;  %v3643_v16 = vpop.f32.mrf.mxu1  ;;  %v405_v58 = vld [vmem:[#allocation5 + $0xa70] sm:$0xff] }
 0x1fd   :  { %3895 = vmatpush1.bf16.msra.mxu0 %v6398_v4  ;;  %3936 = vmatpush1.bf16.msra.mxu1 %v6400_v6  ;;  %v6209_v4 = vcombine.high %v86_v60, %v102_v61  ;;  %v565_v6 = vld [vmem:[#allocation5 + $0xf70] sm:$0xff]  ;;  %v6208_v13 = vcombine.low %v86_v60, %v102_v61  ;;  %v591_v61 = vlaneseq }
 0x1fe   :  { %v3603_v18 = vpop.f32.mrf.mxu0  ;;  %3896 = vmatprep.subr.bf16.mxu0 %v6367_v7  ;;  %v3644_v53 = vpop.f32.mrf.mxu1  ;;  %3937 = vmatprep.subr.bf16.mxu1 %v6369_v9  ;;  %v581_v7 = vld [vmem:[#allocation5 + $0xff0] sm:$0xff]  ;;  %v566_v9 = vld [vmem:[#allocation5 + $0xf78] sm:$0xff] }
 0x1ff   :  { %v6687_v14 = vcombine.high %v565_v6, %v581_v7  ;;  %v6689_v15 = vcombine.high %v566_v9, %v582_v10  ;;  %v533_v16 = vld [vmem:[#allocation5 + $0xe70] sm:$0xff]  ;;  %v534_v18 = vld [vmem:[#allocation5 + $0xe78] sm:$0xff]  ;;  %v6688_v53 = vcombine.low %v566_v9, %v582_v10 }
 0x200   :  { %v421_v60 = vld [vmem:[#allocation5 + $0xaf0] sm:$0xff] }
 0x201   :  { %3897 = vmatpush1.bf16.msra.mxu0 %v6366_v17  ;;  %3938 = vmatpush1.bf16.msra.mxu1 %v6368_v20  ;;  %v549_v17 = vld [vmem:[#allocation5 + $0xef0] sm:$0xff]  ;;  %v550_v20 = vld [vmem:[#allocation5 + $0xef8] sm:$0xff] }
 0x202   :  { %3898 = vmatprep.subr.bf16.mxu0 %v6335_v21  ;;  %3939 = vmatprep.subr.bf16.mxu1 %v6337_v24  ;;  %v6686_v21 = vcombine.low %v565_v6, %v581_v7  ;;  %v6655_v24 = vcombine.high %v533_v16, %v549_v17  ;;  %v6657_v25 = vcombine.high %v534_v18, %v550_v20  ;;  %v373_v9 = vld [vmem:[#allocation5 + $0x970] sm:$0xff] }
 0x203   :  { %v6527_v6 = vcombine.high %v405_v58, %v421_v60  ;;  %v389_v10 = vld [vmem:[#allocation5 + $0x9f0] sm:$0xff] }
 0x205   :  { %3899 = vmatpush1.bf16.msra.mxu0 %v6334_v30  ;;  %3940 = vmatpush1.bf16.msra.mxu1 %v6336_v57  ;;  %v518_v30 = vld [vmem:[#allocation5 + $0xdf8] sm:$0xff]  ;;  %v6654_v57 = vcombine.low %v533_v16, %v549_v17  ;;  %v6495_v17 = vcombine.high %v373_v9, %v389_v10 }
 0x206   :  { %3900 = vmatprep.subr.bf16.mxu0 %v6303_v31  ;;  %3941 = vmatprep.subr.bf16.mxu1 %v6305_v33  ;;  %v6656_v31 = vcombine.low %v534_v18, %v550_v20  ;;  %v6623_v33 = vcombine.high %v501_v27, %v517_v28  ;;  %v6625_v34 = vcombine.high %v502_v29, %v518_v30  ;;  %v341_v20 = vld [vmem:[#allocation5 + $0x870] sm:$0xff] }
 0x209   :  { %3901 = vmatpush1.bf16.msra.mxu0 %v6302_v41  ;;  %3942 = vmatpush1.bf16.msra.mxu1 %v6304_v42  ;;  %v486_v41 = vld [vmem:[#allocation5 + $0xcf8] sm:$0xff]  ;;  %v6622_v42 = vcombine.low %v501_v27, %v517_v28  ;;  %v8773_v27 = vld [vmem:[#allocation7] sm:$0xff] }
 0x20a   :  { %3902 = vmatprep.subr.bf16.mxu0 %v6271_v43  ;;  %3943 = vmatprep.subr.bf16.mxu1 %v6273_v44  ;;  %v6624_v43 = vcombine.low %v502_v29, %v518_v30  ;;  %v6591_v44 = vcombine.high %v469_v36, %v485_v38  ;;  %v6593_v45 = vcombine.high %v470_v39, %v486_v41 }
 0x20b   :  { %v6494_v29 = vcombine.low %v373_v9, %v389_v10  ;;  %v7727_v10 = vld [vmem:[%s9706_s3 + $0x68] sm:$0xff]  }
 0x20d   :  { %3903 = vmatpush1.bf16.msra.mxu0 %v6270_v49  ;;  %3944 = vmatpush1.bf16.msra.mxu1 %v6272_v50  ;;  %v454_v49 = vld [vmem:[#allocation5 + $0xbf8] sm:$0xff]  ;;  %v6590_v50 = vcombine.low %v469_v36, %v485_v38  ;;  %v7745_v36 = vld [vmem:[%s9706_s3 + $0xf8] sm:$0xff]  }
 0x20e   :  { %3904 = vmatprep.subr.bf16.mxu0 %v6239_v51  ;;  %3945 = vmatprep.subr.bf16.mxu1 %v6241_v54  ;;  %v6592_v51 = vcombine.low %v470_v39, %v486_v41  ;;  %v6559_v54 = vcombine.high %v437_v46, %v453_v47  ;;  %v6561_v55 = vcombine.high %v438_v48, %v454_v49 }
 0x211   :  { %3905 = vmatpush1.bf16.msra.mxu0 %v6238_v63  ;;  %3946 = vmatpush1.bf16.msra.mxu1 %v6240_v1  ;;  %v406_v63 = vld [vmem:[#allocation5 + $0xa78] sm:$0xff] }
 0x212   :  { %3906 = vmatprep.subr.bf16.mxu0 %v6207_v2  ;;  %3947 = vmatprep.subr.bf16.mxu1 %v6209_v4  ;;  %v422_v1 = vld [vmem:[#allocation5 + $0xaf8] sm:$0xff]  ;;  %v6558_v2 = vcombine.low %v437_v46, %v453_v47  ;;  %v6560_v4 = vcombine.low %v438_v48, %v454_v49 }
 0x213   :  { %v6529_v7 = vcombine.high %v406_v63, %v422_v1  ;;  %v6528_v16 = vcombine.low %v406_v63, %v422_v1 }
 0x215   :  { %3907 = vmatpush1.bf16.msra.mxu0 %v6206_v11  ;;  %3948 = vmatpush1.bf16.msra.mxu1 %v6208_v13  ;;  %v8768_v11 = vshrl.u32 %v591_v61, 7  ;;  %v374_v13 = vld [vmem:[#allocation5 + $0x978] sm:$0xff]  ;;  %v7736_v61 = vld [vmem:[%s9706_s3 + $0xb0] sm:$0xff]  }
 0x216   :  { %3908 = vmatprep.subr.bf16.mxu0 %v6687_v14  ;;  %3949 = vmatprep.subr.bf16.mxu1 %v6689_v15  ;;  %v390_v14 = vld [vmem:[#allocation5 + $0x9f8] sm:$0xff]  ;;  %v6526_v15 = vcombine.low %v405_v58, %v421_v60  ;;  %v6817_v58 = vunpack.c.l.bf16 %v7745_v36 }
 0x217   :  { %v6497_v18 = vcombine.high %v374_v13, %v390_v14  ;;  %v8776_v28 = vsub.s32 3, %v8768_v11  ;;  %v6496_v30 = vcombine.low %v374_v13, %v390_v14  ;;  %v6782_v14 = vunpack.c.h.bf16 %v7736_v61 }
 0x219   :  { %3909 = vmatpush2.bf16.msra.mxu0 %v6686_v21  ;;  %3950 = vmatpush2.bf16.msra.mxu1 %v6688_v53  ;;  %v357_v21 = vld [vmem:[#allocation5 + $0x8f0] sm:$0xff]  ;;  %v8771_v53 = vsub.s32 1, %v8768_v11  ;;  %v606_v38 = vrot.slane %v8773_v27, %v8776_v28 }
 0x21a   :  { %3910 = vmatprep.subr.bf16.mxu0 %v6655_v24  ;;  %3951 = vmatprep.subr.bf16.mxu1 %v6657_v25  ;;  %v342_v24 = vld [vmem:[#allocation5 + $0x878] sm:$0xff]  ;;  %v6462_v39 = vcombine.low %v341_v20, %v357_v21 }
 0x21b   :  { %v358_v25 = vld [vmem:[#allocation5 + $0x8f8] sm:$0xff]  ;;  %v3396_v47 = vadd.f32 %v8728_v40, %v606_v38  ;;  %v6745_v38 = vunpack.c.l.bf16 %v7727_v10 }
 0x21c   :  { %v6464_v41 = vcombine.low %v342_v24, %v358_v25 }
 0x21d   :  { %3911 = vmatpush2.bf16.msra.mxu0 %v6654_v57  ;;  %3952 = vmatpush2.bf16.msra.mxu1 %v6656_v31  ;;  %v6463_v57 = vcombine.high %v341_v20, %v357_v21  ;;  %v6465_v31 = vcombine.high %v342_v24, %v358_v25  ;;  %v3977_v63 = vmax.f32 %v3396_v47, 0.0  ;;  %v7735_v21 = vld [vmem:[%s9706_s3 + $0xa8] sm:$0xff]   ;;  %v6781_v25 = vunpack.c.l.bf16 %v7736_v61 }
 0x21e   :  { %3912 = vmatprep.subr.bf16.mxu0 %v6623_v33  ;;  %3953 = vmatprep.subr.bf16.mxu1 %v6625_v34  ;;  %v7729_v33 = vld [vmem:[%s9706_s3 + $0x78] sm:$0xff]   ;;  %v598_v34 = vrot.slane %v8773_v27, %v8771_v53 }
 0x220   :  { %v3355_v46 = vadd.f32 %v8726_v37, %v598_v34  ;;  %v7720_v37 = vld [vmem:[%s9706_s3 + $0x30] sm:$0xff]  }
 0x221   :  { %3913 = vmatpush2.bf16.msra.mxu0 %v6622_v42  ;;  %3954 = vmatpush2.bf16.msra.mxu1 %v6624_v43  ;;  %v6754_v42 = vunpack.c.h.bf16 %v7729_v33  ;;  %v7721_v43 = vld [vmem:[%s9706_s3 + $0x38] sm:$0xff]   ;;  %v6718_v9 = vunpack.c.h.bf16 %v7720_v37  ;;  %v6717_v20 = vunpack.c.l.bf16 %v7720_v37 }
 0x222   :  { %3914 = vmatprep.subr.bf16.mxu0 %v6591_v44  ;;  %3955 = vmatprep.subr.bf16.mxu1 %v6593_v45  ;;  %v6818_v44 = vunpack.c.h.bf16 %v7745_v36  ;;  %v7737_v45 = vld [vmem:[%s9706_s3 + $0xb8] sm:$0xff]   ;;  %v6722_v48 = vunpack.c.h.bf16 %v7721_v43  ;;  %v3975_v40 = vmax.f32 %v3355_v46, 0.0  ;;  %v6721_v60 = vunpack.c.l.bf16 %v7721_v43 }
 0x223   :  { %v6786_v49 = vunpack.c.h.bf16 %v7737_v45  ;;  %v6778_v36 = vunpack.c.h.bf16 %v7735_v21  ;;  %v7717_v37 = vld [vmem:[%s9706_s3 + $0x18] sm:$0xff]  }
 0x225   :  { %3915 = vmatpush2.bf16.msra.mxu0 %v6590_v50  ;;  %3956 = vmatpush2.bf16.msra.mxu1 %v6592_v51  ;;  %v7728_v50 = vld [vmem:[%s9706_s3 + $0x70] sm:$0xff]   ;;  %v6753_v51 = vunpack.c.l.bf16 %v7729_v33  ;;  %v7726_v33 = vld [vmem:[%s9706_s3 + $0x60] sm:$0xff]  }
 0x226   :  { %3916 = vmatprep.subr.bf16.mxu0 %v6559_v54  ;;  %3957 = vmatprep.subr.bf16.mxu1 %v6561_v55  ;;  %v7744_v54 = vld [vmem:[%s9706_s3 + $0xf0] sm:$0xff]   ;;  %v6742_v46 = vunpack.c.h.bf16 %v7726_v33 }
 0x229   :  { %3917 = vmatpush2.bf16.msra.mxu0 %v6558_v2  ;;  %3958 = vmatpush2.bf16.msra.mxu1 %v6560_v4  ;;  %v6785_v2 = vunpack.c.l.bf16 %v7737_v45  ;;  %v6750_v4 = vunpack.c.h.bf16 %v7728_v50  ;;  %v6777_v45 = vunpack.c.l.bf16 %v7735_v21 }
 0x22a   :  { %3918 = vmatprep.subr.bf16.mxu0 %v6527_v6  ;;  %3959 = vmatprep.subr.bf16.mxu1 %v6529_v7  ;;  %v6814_v7 = vunpack.c.h.bf16 %v7744_v54 }
 0x22d   :  { %3919 = vmatpush2.bf16.msra.mxu0 %v6526_v15  ;;  %3960 = vmatpush2.bf16.msra.mxu1 %v6528_v16  ;;  %v6749_v15 = vunpack.c.l.bf16 %v7728_v50  ;;  %v7719_v16 = vld [vmem:[%s9706_s3 + $0x28] sm:$0xff]  }
 0x22e   :  { %3920 = vmatprep.subr.bf16.mxu0 %v6495_v17  ;;  %3961 = vmatprep.subr.bf16.mxu1 %v6497_v18  ;;  %v6813_v18 = vunpack.c.l.bf16 %v7744_v54  ;;  %v6713_v43 = vunpack.c.l.bf16 %v7719_v16  ;;  %v7741_v54 = vld [vmem:[%s9706_s3 + $0xd8] sm:$0xff]  }
 0x231   :  { %3921 = vmatpush2.bf16.msra.mxu0 %v6494_v29  ;;  %3962 = vmatpush2.bf16.msra.mxu1 %v6496_v30  ;;  %v6746_v29 = vunpack.c.h.bf16 %v7727_v10 }
 0x232   :  { %3922 = vmatprep.subr.bf16.mxu0 %v6463_v57  ;;  %3963 = vmatprep.subr.bf16.mxu1 %v6465_v31  ;;  %v6714_v31 = vunpack.c.h.bf16 %v7719_v16  ;;  %v6705_v16 = vunpack.c.l.bf16 %v7717_v37 }
 0x235   :  { %3923 = vmatpush2.bf16.msra.mxu0 %v6462_v39  ;;  %3964 = vmatpush2.bf16.msra.mxu1 %v6464_v41  ;;  %v7742_v39 = vld [vmem:[%s9706_s3 + $0xe0] sm:$0xff]  }
 0x236   :  { %7970 = vmatprep.subr.mxu0 %v6754_v42  ;;  %8005 = vmatprep.subr.mxu1 %v6818_v44  ;;  %v7718_v41 = vld [vmem:[%s9706_s3 + $0x20] sm:$0xff]   ;;  %v6806_v47 = vunpack.c.h.bf16 %v7742_v39 }
 0x237   :  { %v7734_v44 = vld [vmem:[%s9706_s3 + $0xa0] sm:$0xff]  }
 0x238   :  { %v8805_v55 = vpop.f32.mrf.mxu0  ;;  %3925 = vmatmul.mubr.bf16.vlgmr.msra.gmra.mxu0 %v8706_v12  ;;  %v8811_v1 = vpop.f32.mrf.mxu1  ;;  %3966 = vmatmul.mubr.bf16.vlgmr.msra.gmra.mxu1 %v8706_v12  ;;  %v7743_v12 = vld [vmem:[%s9706_s3 + $0xe8] sm:$0xff]   ;;  %v6774_v50 = vunpack.c.h.bf16 %v7734_v44  ;;  %v6773_v61 = vunpack.c.l.bf16 %v7734_v44 }
 0x239   :  { %7971 = vmatpush3.msra.mxu0 %v6722_v48  ;;  %5101 = vmatprep.mubr.f32.mxu0 %v3975_v40  ;;  %v6810_v57 = vunpack.c.h.bf16 %v7743_v12  ;;  %v6809_v42 = vunpack.c.l.bf16 %v7743_v12  ;;  %v6710_v48 = vunpack.c.h.bf16 %v7718_v41  ;;  %v6805_v40 = vunpack.c.l.bf16 %v7742_v39  ;;  %v7731_v39 = vld [vmem:[%s9706_s3 + $0x88] sm:$0xff]  }
 0x23a   :  { %8006 = vmatpush3.msra.mxu1 %v6786_v49  ;;  %v8814_v6 = vpop.f32.mrf.mxu0  ;;  %5171 = vmatprep.mubr.f32.mxu1 %v3977_v63  ;;  %v8819_v13 = vpop.f32.mrf.mxu1  ;;  %v7725_v49 = vld [vmem:[%s9706_s3 + $0x58] sm:$0xff]   ;;  %v6801_v12 = vunpack.c.l.bf16 %v7741_v54 }
 0x23b   :  { %7972 = vmatprep.subr.mxu0 %v6753_v51  ;;  %8007 = vmatprep.subr.mxu1 %v6817_v58  ;;  %v6741_v51 = vunpack.c.l.bf16 %v7726_v33  ;;  %v6709_v58 = vunpack.c.l.bf16 %v7718_v41  ;;  %v6738_v63 = vunpack.c.h.bf16 %v7725_v49  ;;  %v6737_v10 = vunpack.c.l.bf16 %v7725_v49  ;;  %v7715_v33 = vld [vmem:[%s9706_s3 + $0x8] sm:$0xff]  }
 0x23c   :  { %7973 = vmatpush3.msra.mxu0 %v6721_v60  ;;  %v3684_v17 = vpop.f32.mrf.mxu0  ;;  %8008 = vmatpush3.msra.mxu1 %v6785_v2  ;;  %v3725_v24 = vpop.f32.mrf.mxu1  ;;  %v7733_v60 = vld [vmem:[%s9706_s3 + $0x98] sm:$0xff]   ;;  %v6802_v2 = vunpack.c.h.bf16 %v7741_v54  ;;  %v6762_v49 = vunpack.c.h.bf16 %v7731_v39  ;;  %v6692_v54 = vld [vmem:[%s9706_s3] sm:$0xff]  }
 0x23d   :  { %7974 = vmatprep.subr.mxu0 %v6750_v4  ;;  %8009 = vmatprep.subr.mxu1 %v6814_v7  ;;  %v6706_v4 = vunpack.c.h.bf16 %v7717_v37  ;;  %v7724_v7 = vld [vmem:[%s9706_s3 + $0x50] sm:$0xff]  }
 0x23e   :  { %7975 = vmatpush3.msra.mxu0 %v6718_v9  ;;  %v3685_v30 = vpop.f32.mrf.mxu0  ;;  %8010 = vmatpush3.msra.mxu1 %v6782_v14  ;;  %v3726_v34 = vpop.f32.mrf.mxu1  ;;  %v6770_v9 = vunpack.c.h.bf16 %v7733_v60  ;;  %v7740_v14 = vld [vmem:[%s9706_s3 + $0xd0] sm:$0xff]  }
 0x23f   :  { %7976 = vmatprep.subr.mxu0 %v6749_v15  ;;  %8011 = vmatprep.subr.mxu1 %v6813_v18  ;;  %v7716_v15 = vld [vmem:[%s9706_s3 + $0x10] sm:$0xff]   ;;  %v6769_v18 = vunpack.c.l.bf16 %v7733_v60  ;;  %v6798_v21 = vunpack.c.h.bf16 %v7740_v14  ;;  %v8879_v34 = vsub.s32 2, %v8768_v11  ;;  %v7730_v60 = vld [vmem:[%s9706_s3 + $0x80] sm:$0xff]  }
 0x240   :  { %7977 = vmatpush3.msra.mxu0 %v6717_v20  ;;  %8012 = vmatpush3.msra.mxu1 %v6781_v25  ;;  %v7732_v17 = vld [vmem:[%s9706_s3 + $0x90] sm:$0xff]   ;;  %v6734_v20 = vunpack.c.h.bf16 %v7724_v7  ;;  %v6702_v24 = vunpack.c.h.bf16 %v7716_v15  ;;  %v7723_v25 = vld [vmem:[%s9706_s3 + $0x48] sm:$0xff]  }
 0x241   :  { %7978 = vmatprep.subr.mxu0 %v6746_v29  ;;  %8013 = vmatprep.subr.mxu1 %v6810_v57  ;;  %v8870_v29 = vsub.s32 0, %v8768_v11  ;;  %v6766_v30 = vunpack.c.h.bf16 %v7732_v17  ;;  %v6733_v57 = vunpack.c.l.bf16 %v7724_v7  ;;  %v6765_v41 = vunpack.c.l.bf16 %v7732_v17 }
 0x242   :  { %7979 = vmatpush3.msra.mxu0 %v6714_v31  ;;  %8014 = vmatpush3.msra.mxu1 %v6778_v36  ;;  %v7739_v31 = vld [vmem:[%s9706_s3 + $0xc8] sm:$0xff]   ;;  %v6797_v36 = vunpack.c.l.bf16 %v7740_v14  ;;  %v602_v37 = vrot.slane %v8773_v27, %v8879_v34  ;;  %v6694_v7 = vunpack.c.h.bf16 %v6692_v54  ;;  %v6758_v14 = vunpack.c.h.bf16 %v7730_v60 }
 0x243   :  { %7980 = vmatprep.subr.mxu0 %v6745_v38  ;;  %8015 = vmatprep.subr.mxu1 %v6809_v42  ;;  %v6701_v38 = vunpack.c.l.bf16 %v7716_v15  ;;  %v6730_v42 = vunpack.c.h.bf16 %v7723_v25  ;;  %v6794_v44 = vunpack.c.h.bf16 %v7739_v31 }
 0x244   :  { %7981 = vmatpush3.msra.mxu0 %v6713_v43  ;;  %8016 = vmatpush3.msra.mxu1 %v6777_v45  ;;  %v8885_v43 = vsub.s32 5, %v8768_v11  ;;  %v6698_v45 = vunpack.c.h.bf16 %v7715_v33 }
 0x245   :  { %7982 = vmatprep.subr.mxu0 %v6742_v46  ;;  %8017 = vmatprep.subr.mxu1 %v6806_v47  ;;  %v7722_v46 = vld [vmem:[%s9706_s3 + $0x40] sm:$0xff]   ;;  %v594_v47 = vrot.slane %v8773_v27, %v8870_v29 }
 0x246   :  { %7983 = vmatpush3.msra.mxu0 %v6710_v48  ;;  %8018 = vmatpush3.msra.mxu1 %v6774_v50  ;;  %v8893_v48 = vsub.s32 7, %v8768_v11  ;;  %v6729_v50 = vunpack.c.l.bf16 %v7723_v25  ;;  %v6725_v15 = vunpack.c.l.bf16 %v7722_v46 }
 0x247   :  { %7984 = vmatprep.subr.mxu0 %v6741_v51  ;;  %8019 = vmatprep.subr.mxu1 %v6805_v40  ;;  %v7738_v51 = vld [vmem:[%s9706_s3 + $0xc0] sm:$0xff]   ;;  %v6793_v40 = vunpack.c.l.bf16 %v7739_v31 }
 0x248   :  { %7985 = vmatpush3.msra.mxu0 %v6709_v58  ;;  %8020 = vmatpush3.msra.mxu1 %v6773_v61  ;;  %v6697_v58 = vunpack.c.l.bf16 %v7715_v33  ;;  %v6761_v61 = vunpack.c.l.bf16 %v7731_v39  ;;  %v6789_v17 = vunpack.c.l.bf16 %v7738_v51  ;;  %v7760_v39 = vld [vmem:[%s9706_s3 + $0x170] sm:$0xff]  }
 0x249   :  { %7986 = vmatprep.subr.mxu0 %v6738_v63  ;;  %8021 = vmatprep.subr.mxu1 %v6802_v2  ;;  %v6726_v63 = vunpack.c.h.bf16 %v7722_v46  ;;  %v614_v2 = vrot.slane %v8773_v27, %v8885_v43  ;;  %v7768_v46 = vld [vmem:[%s9706_s3 + $0x1b0] sm:$0xff]  }
 0x24a   :  { %7987 = vmatpush3.msra.mxu0 %v6706_v4  ;;  %8022 = vmatpush3.msra.mxu1 %v6770_v9  ;;  %v6790_v4 = vunpack.c.h.bf16 %v7738_v51  ;;  %v3353_v9 = vadd.f32 %v8720_v32, %v594_v47  ;;  %v7777_v32 = vld [vmem:[%s9706_s3 + $0x1f8] sm:$0xff]  }
 0x24b   :  { %7988 = vmatprep.subr.mxu0 %v6737_v10  ;;  %8023 = vmatprep.subr.mxu1 %v6801_v12  ;;  %v622_v10 = vrot.slane %v8773_v27, %v8893_v48  ;;  %v7761_v12 = vld [vmem:[%s9706_s3 + $0x178] sm:$0xff]   ;;  %v6946_v31 = vunpack.c.h.bf16 %v7777_v32 }
 0x24c   :  { %7989 = vmatpush3.msra.mxu0 %v6705_v16  ;;  %8024 = vmatpush3.msra.mxu1 %v6769_v18  ;;  %v3394_v16 = vadd.f32 %v8723_v35, %v602_v37  ;;  %v6693_v18 = vunpack.c.l.bf16 %v6692_v54  ;;  %v3437_v35 = vadd.f32 %v8738_v59, %v614_v2  ;;  %v6882_v25 = vunpack.c.h.bf16 %v7761_v12  ;;  %v7759_v37 = vld [vmem:[%s9706_s3 + $0x168] sm:$0xff]  }
 0x24d   :  { %7990 = vmatprep.subr.mxu0 %v6734_v20  ;;  %8025 = vmatprep.subr.mxu1 %v6798_v21  ;;  %v7753_v20 = vld [vmem:[%s9706_s3 + $0x138] sm:$0xff]   ;;  %v6757_v21 = vunpack.c.l.bf16 %v7730_v60  ;;  %v6881_v59 = vunpack.c.l.bf16 %v7761_v12  ;;  %v7775_v60 = vld [vmem:[%s9706_s3 + $0x1e8] sm:$0xff]  }
 0x24e   :  { %7991 = vmatpush3.msra.mxu0 %v6702_v24  ;;  %8026 = vmatpush3.msra.mxu1 %v6766_v30  ;;  %v7769_v24 = vld [vmem:[%s9706_s3 + $0x1b8] sm:$0xff]   ;;  %v3974_v30 = vmax.f32 %v3353_v9, 0.0  ;;  %v6850_v33 = vunpack.c.h.bf16 %v7753_v20  ;;  %v6874_v9 = vunpack.c.h.bf16 %v7759_v37 }
 0x24f   :  { %7992 = vmatprep.subr.mxu0 %v6733_v57  ;;  %8027 = vmatprep.subr.mxu1 %v6797_v36  ;;  %v3478_v57 = vadd.f32 %v8740_v62, %v622_v10  ;;  %v3976_v36 = vmax.f32 %v3394_v16, 0.0  ;;  %v7752_v62 = vld [vmem:[%s9706_s3 + $0x130] sm:$0xff]   ;;  %v6938_v10 = vunpack.c.h.bf16 %v7775_v60  ;;  %v6873_v16 = vunpack.c.l.bf16 %v7759_v37 }
 0x250   :  { %7993 = vmatpush3.msra.mxu0 %v6701_v38  ;;  %8028 = vmatpush3.msra.mxu1 %v6765_v41  ;;  %v6914_v38 = vunpack.c.h.bf16 %v7769_v24  ;;  %v7776_v41 = vld [vmem:[%s9706_s3 + $0x1f0] sm:$0xff]   ;;  %v6846_v54 = vunpack.c.h.bf16 %v7752_v62  ;;  %v6845_v2 = vunpack.c.l.bf16 %v7752_v62 }
 0x251   :  { %7994 = vmatprep.subr.mxu0 %v6730_v42  ;;  %8029 = vmatprep.subr.mxu1 %v6794_v44  ;;  %v3979_v42 = vmax.f32 %v3437_v35, 0.0  ;;  %v6945_v44 = vunpack.c.l.bf16 %v7777_v32  ;;  %v3981_v47 = vmax.f32 %v3478_v57, 0.0  ;;  %v6942_v51 = vunpack.c.h.bf16 %v7776_v41  ;;  %v7757_v57 = vld [vmem:[%s9706_s3 + $0x158] sm:$0xff]  }
 0x252   :  { %7995 = vmatpush3.msra.mxu0 %v6698_v45  ;;  %8030 = vmatpush3.msra.mxu1 %v6762_v49  ;;  %v6849_v45 = vunpack.c.l.bf16 %v7753_v20  ;;  %v6913_v49 = vunpack.c.l.bf16 %v7769_v24  ;;  %v6937_v32 = vunpack.c.l.bf16 %v7775_v60 }
 0x253   :  { %7996 = vmatprep.subr.mxu0 %v6729_v50  ;;  %8031 = vmatprep.subr.mxu1 %v6793_v40  ;;  %v6878_v50 = vunpack.c.h.bf16 %v7760_v39  ;;  %v6910_v40 = vunpack.c.h.bf16 %v7768_v46 }
 0x254   :  { %7997 = vmatpush3.msra.mxu0 %v6697_v58  ;;  %8032 = vmatpush3.msra.mxu1 %v6761_v61  ;;  %v6877_v58 = vunpack.c.l.bf16 %v7760_v39  ;;  %v7751_v61 = vld [vmem:[%s9706_s3 + $0x128] sm:$0xff]  }
 0x255   :  { %7998 = vmatprep.subr.mxu0 %v6726_v63  ;;  %8033 = vmatprep.subr.mxu1 %v6790_v4  ;;  %v6941_v63 = vunpack.c.l.bf16 %v7776_v41  ;;  %v7767_v4 = vld [vmem:[%s9706_s3 + $0x1a8] sm:$0xff]   ;;  %v6841_v20 = vunpack.c.l.bf16 %v7751_v61  ;;  %v7765_v41 = vld [vmem:[%s9706_s3 + $0x198] sm:$0xff]  }
 0x256   :  { %7999 = vmatpush3.msra.mxu0 %v6694_v7  ;;  %8034 = vmatpush3.msra.mxu1 %v6758_v14  ;;  %v6909_v7 = vunpack.c.l.bf16 %v7768_v46  ;;  %v6842_v14 = vunpack.c.h.bf16 %v7751_v61  ;;  %v6906_v12 = vunpack.c.h.bf16 %v7767_v4  ;;  %v6905_v24 = vunpack.c.l.bf16 %v7767_v4  ;;  %v7756_v46 = vld [vmem:[%s9706_s3 + $0x150] sm:$0xff]  }
 0x257   :  { %8000 = vmatprep.subr.mxu0 %v6725_v15  ;;  %8035 = vmatprep.subr.mxu1 %v6789_v17  ;;  %v7758_v15 = vld [vmem:[%s9706_s3 + $0x160] sm:$0xff]   ;;  %v6862_v60 = vunpack.c.h.bf16 %v7756_v46  ;;  %v8990_v4 = vsub.s32 4, %v8768_v11 }
 0x258   :  { %8001 = vmatpush3.msra.mxu0 %v6693_v18  ;;  %8036 = vmatpush3.msra.mxu1 %v6757_v21  ;;  %v7774_v17 = vld [vmem:[%s9706_s3 + $0x1e0] sm:$0xff]   ;;  %v6870_v35 = vunpack.c.h.bf16 %v7758_v15 }
 0x259   :  { %5102 = vmatmul.mubr.f32.vlgmr.msra.gmra.mxu0 %v3974_v30  ;;  %5172 = vmatmul.mubr.f32.vlgmr.msra.gmra.mxu1 %v3976_v36  ;;  %v7750_v18 = vld [vmem:[%s9706_s3 + $0x120] sm:$0xff]   ;;  %v7773_v36 = vld [vmem:[%s9706_s3 + $0x1d8] sm:$0xff]   ;;  %v6933_v39 = vunpack.c.l.bf16 %v7774_v17 }
 0x25a   :  { %8040 = vmatprep.subr.mxu0 %v6882_v25  ;;  %8075 = vmatprep.subr.mxu1 %v6946_v31  ;;  %v7766_v21 = vld [vmem:[%s9706_s3 + $0x1a0] sm:$0xff]   ;;  %v6934_v25 = vunpack.c.h.bf16 %v7774_v17  ;;  %v6838_v30 = vunpack.c.h.bf16 %v7750_v18  ;;  %v7763_v17 = vld [vmem:[%s9706_s3 + $0x188] sm:$0xff]  }
 0x25b   :  { %8041 = vmatpush3.msra.mxu0 %v6850_v33  ;;  %5241 = vmatprep.mubr.f32.mxu0 %v3979_v42  ;;  %v6902_v31 = vunpack.c.h.bf16 %v7766_v21  ;;  %v6869_v33 = vunpack.c.l.bf16 %v7758_v15  ;;  %v6901_v62 = vunpack.c.l.bf16 %v7766_v21  ;;  %v6866_v42 = vunpack.c.h.bf16 %v7757_v57 }
 0x25c   :  { %8076 = vmatpush3.msra.mxu1 %v6914_v38  ;;  %5311 = vmatprep.mubr.f32.mxu1 %v3981_v47  ;;  %v7749_v38 = vld [vmem:[%s9706_s3 + $0x118] sm:$0xff]   ;;  %v6898_v47 = vunpack.c.h.bf16 %v7765_v41  ;;  %v8999_v15 = vsub.s32 6, %v8768_v11  ;;  %v7754_v11 = vld [vmem:[%s9706_s3 + $0x140] sm:$0xff]  }
 0x25d   :  { %8042 = vmatprep.subr.mxu0 %v6881_v59  ;;  %8077 = vmatprep.subr.mxu1 %v6945_v44  ;;  %v6837_v59 = vunpack.c.l.bf16 %v7750_v18  ;;  %v6930_v44 = vunpack.c.h.bf16 %v7773_v36  ;;  %v6833_v37 = vunpack.c.l.bf16 %v7749_v38 }
 0x25e   :  { %8043 = vmatpush3.msra.mxu0 %v6849_v45  ;;  %8078 = vmatpush3.msra.mxu1 %v6913_v49  ;;  %v6834_v45 = vunpack.c.h.bf16 %v7749_v38  ;;  %v6865_v49 = vunpack.c.l.bf16 %v7757_v57  ;;  %v7770_v57 = vld [vmem:[%s9706_s3 + $0x1c0] sm:$0xff]  }
 0x25f   :  { %8044 = vmatprep.subr.mxu0 %v6878_v50  ;;  %8079 = vmatprep.subr.mxu1 %v6942_v51  ;;  %v7772_v50 = vld [vmem:[%s9706_s3 + $0x1d0] sm:$0xff]  }
 0x260   :  { %8045 = vmatpush3.msra.mxu0 %v6846_v54  ;;  %8080 = vmatpush3.msra.mxu1 %v6910_v40  ;;  %v7748_v51 = vld [vmem:[%s9706_s3 + $0x110] sm:$0xff]   ;;  %v6929_v54 = vunpack.c.l.bf16 %v7773_v36  ;;  %v6926_v61 = vunpack.c.h.bf16 %v7772_v50 }
 0x261   :  { %8046 = vmatprep.subr.mxu0 %v6877_v58  ;;  %8081 = vmatprep.subr.mxu1 %v6941_v63  ;;  %v7764_v40 = vld [vmem:[%s9706_s3 + $0x190] sm:$0xff]   ;;  %v6897_v58 = vunpack.c.l.bf16 %v7765_v41  ;;  %v6830_v63 = vunpack.c.h.bf16 %v7748_v51  ;;  %v6854_v41 = vunpack.c.h.bf16 %v7754_v11 }
 0x262   :  { %8047 = vmatpush3.msra.mxu0 %v6845_v2  ;;  %8082 = vmatpush3.msra.mxu1 %v6909_v7  ;;  %v7755_v2 = vld [vmem:[%s9706_s3 + $0x148] sm:$0xff]   ;;  %v6894_v7 = vunpack.c.h.bf16 %v7764_v40  ;;  %v6893_v18 = vunpack.c.l.bf16 %v7764_v40 }
 0x263   :  { %8048 = vmatprep.subr.mxu0 %v6874_v9  ;;  %8083 = vmatprep.subr.mxu1 %v6938_v10  ;;  %v6861_v9 = vunpack.c.l.bf16 %v7756_v46  ;;  %v7771_v10 = vld [vmem:[%s9706_s3 + $0x1c8] sm:$0xff]  }
 0x264   :  { %8049 = vmatpush3.msra.mxu0 %v6842_v14  ;;  %8084 = vmatpush3.msra.mxu1 %v6906_v12  ;;  %v7747_v14 = vld [vmem:[%s9706_s3 + $0x108] sm:$0xff]   ;;  %v6925_v12 = vunpack.c.l.bf16 %v7772_v50  ;;  %v6921_v36 = vunpack.c.l.bf16 %v7771_v10 }
 0x265   :  { %8050 = vmatprep.subr.mxu0 %v6873_v16  ;;  %8085 = vmatprep.subr.mxu1 %v6937_v32  ;;  %v6829_v16 = vunpack.c.l.bf16 %v7748_v51  ;;  %v6858_v32 = vunpack.c.h.bf16 %v7755_v2  ;;  %v6826_v21 = vunpack.c.h.bf16 %v7747_v14  ;;  %v6825_v38 = vunpack.c.l.bf16 %v7747_v14 }
 0x266   :  { %8051 = vmatpush3.msra.mxu0 %v6841_v20  ;;  %8086 = vmatpush3.msra.mxu1 %v6905_v24  ;;  %v6922_v20 = vunpack.c.h.bf16 %v7771_v10  ;;  %v610_v24 = vrot.slane %v8773_v27, %v8990_v4  ;;  %v6917_v51 = vunpack.c.l.bf16 %v7770_v57 }
 0x267   :  { %8052 = vmatprep.subr.mxu0 %v6870_v35  ;;  %8087 = vmatprep.subr.mxu1 %v6934_v25  ;;  %v9009_v35 = vld [vmem:[#allocation7 + $0x8] sm:$0xff]  ;;  %v6890_v25 = vunpack.c.h.bf16 %v7763_v17 }
 0x268   :  { %8053 = vmatpush3.msra.mxu0 %v6838_v30  ;;  %8088 = vmatpush3.msra.mxu1 %v6902_v31  ;;  %v6857_v30 = vunpack.c.l.bf16 %v7755_v2  ;;  %v7746_v31 = vld [vmem:[%s9706_s3 + $0x100] sm:$0xff]  }
 0x269   :  { %8054 = vmatprep.subr.mxu0 %v6869_v33  ;;  %8089 = vmatprep.subr.mxu1 %v6933_v39  ;;  %v618_v33 = vrot.slane %v8773_v27, %v8999_v15  ;;  %v7762_v39 = vld [vmem:[%s9706_s3 + $0x180] sm:$0xff]   ;;  %v3435_v27 = vadd.f32 %v8732_v52, %v610_v24  ;;  %v7809_v52 = vld [vmem:[%s9706_s3 + $0x2f8] sm:$0xff]  }
 0x26a   :  { %8055 = vmatpush3.msra.mxu0 %v6837_v59  ;;  %8090 = vmatpush3.msra.mxu1 %v6901_v62  ;;  %v6889_v59 = vunpack.c.l.bf16 %v7763_v17  ;;  %v630_v62 = vrot.slane %v9009_v35, %v8771_v53  ;;  %v6886_v46 = vunpack.c.h.bf16 %v7762_v39  ;;  %v6885_v40 = vunpack.c.l.bf16 %v7762_v39 }
 0x26b   :  { %8056 = vmatprep.subr.mxu0 %v6866_v42  ;;  %8091 = vmatprep.subr.mxu1 %v6930_v44  ;;  %v6918_v42 = vunpack.c.h.bf16 %v7770_v57  ;;  %v6822_v44 = vunpack.c.h.bf16 %v7746_v31  ;;  %v3476_v50 = vadd.f32 %v8735_v56, %v618_v33 }
 0x26c   :  { %8057 = vmatpush3.msra.mxu0 %v6834_v45  ;;  %8092 = vmatpush3.msra.mxu1 %v6898_v47  ;;  %v638_v45 = vrot.slane %v9009_v35, %v8776_v28  ;;  %v6853_v47 = vunpack.c.l.bf16 %v7754_v11  ;;  %v3519_v56 = vadd.f32 %v8750_v23, %v630_v62  ;;  %v7792_v23 = vld [vmem:[%s9706_s3 + $0x270] sm:$0xff]  }
 0x26d   :  { %8058 = vmatprep.subr.mxu0 %v6865_v49  ;;  %8093 = vmatprep.subr.mxu1 %v6929_v54  ;;  %v7793_v49 = vld [vmem:[%s9706_s3 + $0x278] sm:$0xff]   ;;  %v6821_v54 = vunpack.c.l.bf16 %v7746_v31  ;;  %v3980_v14 = vmax.f32 %v3476_v50, 0.0  ;;  %v7006_v33 = vunpack.c.h.bf16 %v7792_v23 }
 0x26e   :  { %8059 = vmatpush3.msra.mxu0 %v6833_v37  ;;  %8094 = vmatpush3.msra.mxu1 %v6897_v58  ;;  %v7785_v37 = vld [vmem:[%s9706_s3 + $0x238] sm:$0xff]   ;;  %v3560_v2 = vadd.f32 %v8752_v26, %v638_v45  ;;  %v7009_v26 = vunpack.c.l.bf16 %v7793_v49 }
 0x26f   :  { %8060 = vmatprep.subr.mxu0 %v6862_v60  ;;  %8095 = vmatprep.subr.mxu1 %v6926_v61  ;;  %v7801_v58 = vld [vmem:[%s9706_s3 + $0x2b8] sm:$0xff]   ;;  %v7010_v61 = vunpack.c.h.bf16 %v7793_v49  ;;  %v6978_v10 = vunpack.c.h.bf16 %v7785_v37  ;;  %v6977_v11 = vunpack.c.l.bf16 %v7785_v37 }
 0x270   :  { %8061 = vmatpush3.msra.mxu0 %v6830_v63  ;;  %8096 = vmatpush3.msra.mxu1 %v6894_v7  ;;  %v3978_v63 = vmax.f32 %v3435_v27, 0.0  ;;  %v7041_v57 = vunpack.c.l.bf16 %v7801_v58  ;;  %v7783_v27 = vld [vmem:[%s9706_s3 + $0x228] sm:$0xff]  }
 0x271   :  { %8062 = vmatprep.subr.mxu0 %v6861_v9  ;;  %8097 = vmatprep.subr.mxu1 %v6925_v12  ;;  %v7074_v9 = vunpack.c.h.bf16 %v7809_v52  ;;  %v7042_v12 = vunpack.c.h.bf16 %v7801_v58  ;;  %v7806_v58 = vld [vmem:[%s9706_s3 + $0x2e0] sm:$0xff]  }
 0x272   :  { %8063 = vmatpush3.msra.mxu0 %v6829_v16  ;;  %8098 = vmatpush3.msra.mxu1 %v6893_v18  ;;  %v7808_v18 = vld [vmem:[%s9706_s3 + $0x2f0] sm:$0xff]  }
 0x273   :  { %8064 = vmatprep.subr.mxu0 %v6858_v32  ;;  %8099 = vmatprep.subr.mxu1 %v6922_v20  ;;  %v7784_v32 = vld [vmem:[%s9706_s3 + $0x230] sm:$0xff]   ;;  %v3983_v20 = vmax.f32 %v3519_v56, 0.0  ;;  %v7069_v45 = vunpack.c.l.bf16 %v7808_v18  ;;  %v7782_v56 = vld [vmem:[%s9706_s3 + $0x220] sm:$0xff]  }
 0x274   :  { %8065 = vmatpush3.msra.mxu0 %v6826_v21  ;;  %8100 = vmatpush3.msra.mxu1 %v6890_v25  ;;  %v7073_v21 = vunpack.c.l.bf16 %v7809_v52  ;;  %v7800_v25 = vld [vmem:[%s9706_s3 + $0x2b0] sm:$0xff]   ;;  %v7790_v52 = vld [vmem:[%s9706_s3 + $0x260] sm:$0xff]  }
 0x275   :  { %8066 = vmatprep.subr.mxu0 %v6857_v30  ;;  %8101 = vmatprep.subr.mxu1 %v6921_v36  ;;  %v3985_v30 = vmax.f32 %v3560_v2, 0.0  ;;  %v7070_v36 = vunpack.c.h.bf16 %v7808_v18  ;;  %v7037_v49 = vunpack.c.l.bf16 %v7800_v25  ;;  %v7798_v2 = vld [vmem:[%s9706_s3 + $0x2a0] sm:$0xff]   ;;  %v6997_v18 = vunpack.c.l.bf16 %v7790_v52 }
 0x276   :  { %8067 = vmatpush3.msra.mxu0 %v6825_v38  ;;  %8102 = vmatpush3.msra.mxu1 %v6889_v59  ;;  %v6974_v38 = vunpack.c.h.bf16 %v7784_v32  ;;  %v7791_v59 = vld [vmem:[%s9706_s3 + $0x268] sm:$0xff]  }
 0x277   :  { %8068 = vmatprep.subr.mxu0 %v6854_v41  ;;  %8103 = vmatprep.subr.mxu1 %v6918_v42  ;;  %v7038_v41 = vunpack.c.h.bf16 %v7800_v25  ;;  %v7005_v42 = vunpack.c.l.bf16 %v7792_v23  ;;  %v7002_v50 = vunpack.c.h.bf16 %v7791_v59  ;;  %v7789_v23 = vld [vmem:[%s9706_s3 + $0x258] sm:$0xff]   ;;  %v7029_v25 = vunpack.c.l.bf16 %v7798_v2 }
 0x278   :  { %8069 = vmatpush3.msra.mxu0 %v6822_v44  ;;  %v9041_v60 = vpop.f32.mrf.mxu0  ;;  %8104 = vmatpush3.msra.mxu1 %v6886_v46  ;;  %v9044_v7 = vpop.f32.mrf.mxu1  ;;  %v7807_v44 = vld [vmem:[%s9706_s3 + $0x2e8] sm:$0xff]   ;;  %v6973_v46 = vunpack.c.l.bf16 %v7784_v32  ;;  %v7805_v32 = vld [vmem:[%s9706_s3 + $0x2d8] sm:$0xff]  }
 0x279   :  { %8070 = vmatprep.subr.mxu0 %v6853_v47  ;;  %8105 = vmatprep.subr.mxu1 %v6917_v51  ;;  %v7799_v47 = vld [vmem:[%s9706_s3 + $0x2a8] sm:$0xff]   ;;  %v7066_v51 = vunpack.c.h.bf16 %v7807_v44 }
 0x27a   :  { %8071 = vmatpush3.msra.mxu0 %v6821_v54  ;;  %v9046_v16 = vpop.f32.mrf.mxu0  ;;  %8106 = vmatpush3.msra.mxu1 %v6885_v40  ;;  %v9051_v17 = vpop.f32.mrf.mxu1  ;;  %v6970_v54 = vunpack.c.h.bf16 %v7783_v27  ;;  %v7034_v37 = vunpack.c.h.bf16 %v7799_v47  ;;  %v7001_v40 = vunpack.c.l.bf16 %v7791_v59  ;;  %v7780_v59 = vld [vmem:[%s9706_s3 + $0x210] sm:$0xff]  }
 0x27b   :  { %5242 = vmatmul.mubr.f32.vlgmr.msra.gmra.mxu0 %v3978_v63  ;;  %5312 = vmatmul.mubr.f32.vlgmr.msra.gmra.mxu1 %v3980_v14  ;;  %v6969_v63 = vunpack.c.l.bf16 %v7783_v27  ;;  %v7062_v14 = vunpack.c.h.bf16 %v7806_v58 }
 0x27c   :  { %8110 = vmatprep.subr.mxu0 %v7010_v61  ;;  %v3766_v24 = vpop.f32.mrf.mxu0  ;;  %8145 = vmatprep.subr.mxu1 %v7074_v9  ;;  %v3807_v31 = vpop.f32.mrf.mxu1  ;;  %v7065_v61 = vunpack.c.l.bf16 %v7807_v44  ;;  %v7033_v9 = vunpack.c.l.bf16 %v7799_v47  ;;  %v7787_v47 = vld [vmem:[%s9706_s3 + $0x248] sm:$0xff]  }
 0x27d   :  { %8111 = vmatpush3.msra.mxu0 %v6978_v10  ;;  %5381 = vmatprep.mubr.f32.mxu0 %v3983_v20  ;;  %v6998_v10 = vunpack.c.h.bf16 %v7790_v52  ;;  %v7781_v20 = vld [vmem:[%s9706_s3 + $0x218] sm:$0xff]  }
 0x27e   :  { %8146 = vmatpush3.msra.mxu1 %v7042_v12  ;;  %v3767_v39 = vpop.f32.mrf.mxu0  ;;  %5451 = vmatprep.mubr.f32.mxu1 %v3985_v30  ;;  %v3808_v62 = vpop.f32.mrf.mxu1  ;;  %v6966_v12 = vunpack.c.h.bf16 %v7782_v56  ;;  %v7797_v24 = vld [vmem:[%s9706_s3 + $0x298] sm:$0xff]   ;;  %v6994_v30 = vunpack.c.h.bf16 %v7789_v23  ;;  %v6962_v31 = vunpack.c.h.bf16 %v7781_v20 }
 0x27f   :  { %8112 = vmatprep.subr.mxu0 %v7009_v26  ;;  %8147 = vmatprep.subr.mxu1 %v7073_v21  ;;  %v7030_v26 = vunpack.c.h.bf16 %v7798_v2  ;;  %v7061_v21 = vunpack.c.l.bf16 %v7806_v58  ;;  %v7804_v39 = vld [vmem:[%s9706_s3 + $0x2d0] sm:$0xff]   ;;  %v6961_v62 = vunpack.c.l.bf16 %v7781_v20  ;;  %v7025_v44 = vunpack.c.l.bf16 %v7797_v24  ;;  %v7786_v2 = vld [vmem:[%s9706_s3 + $0x240] sm:$0xff]  }
 0x280   :  { %8113 = vmatpush3.msra.mxu0 %v6977_v11  ;;  %8148 = vmatpush3.msra.mxu1 %v7041_v57  ;;  %v6965_v11 = vunpack.c.l.bf16 %v7782_v56  ;;  %v7058_v57 = vunpack.c.h.bf16 %v7805_v32  ;;  %v7053_v52 = vunpack.c.l.bf16 %v7804_v39  ;;  %v6986_v56 = vunpack.c.h.bf16 %v7787_v47  ;;  %v7794_v20 = vld [vmem:[%s9706_s3 + $0x280] sm:$0xff]  }
 0x281   :  { %8114 = vmatprep.subr.mxu0 %v7006_v33  ;;  %8149 = vmatprep.subr.mxu1 %v7070_v36  ;;  %v7788_v33 = vld [vmem:[%s9706_s3 + $0x250] sm:$0xff]   ;;  %v7026_v36 = vunpack.c.h.bf16 %v7797_v24  ;;  %v646_v24 = vrot.slane %v9009_v35, %v8885_v43 }
 0x282   :  { %8115 = vmatpush3.msra.mxu0 %v6974_v38  ;;  %8150 = vmatpush3.msra.mxu1 %v7038_v41  ;;  %v6993_v38 = vunpack.c.l.bf16 %v7789_v23  ;;  %v7057_v41 = vunpack.c.l.bf16 %v7805_v32  ;;  %v6990_v27 = vunpack.c.h.bf16 %v7788_v33  ;;  %v7778_v23 = vld [vmem:[%s9706_s3 + $0x200] sm:$0xff]  }
 0x283   :  { %8116 = vmatprep.subr.mxu0 %v7005_v42  ;;  %8151 = vmatprep.subr.mxu1 %v7069_v45  ;;  %v7796_v42 = vld [vmem:[%s9706_s3 + $0x290] sm:$0xff]   ;;  %v7054_v45 = vunpack.c.h.bf16 %v7804_v39 }
 0x284   :  { %8117 = vmatpush3.msra.mxu0 %v6973_v46  ;;  %8152 = vmatpush3.msra.mxu1 %v7037_v49  ;;  %v6958_v46 = vunpack.c.h.bf16 %v7780_v59  ;;  %v7022_v49 = vunpack.c.h.bf16 %v7796_v42  ;;  %v7021_v58 = vunpack.c.l.bf16 %v7796_v42  ;;  %v7013_v42 = vunpack.c.l.bf16 %v7794_v20 }
 0x285   :  { %8118 = vmatprep.subr.mxu0 %v7002_v50  ;;  %8153 = vmatprep.subr.mxu1 %v7066_v51  ;;  %v6989_v50 = vunpack.c.l.bf16 %v7788_v33  ;;  %v7803_v51 = vld [vmem:[%s9706_s3 + $0x2c8] sm:$0xff]   ;;  %v7014_v33 = vunpack.c.h.bf16 %v7794_v20 }
 0x286   :  { %8119 = vmatpush3.msra.mxu0 %v6970_v54  ;;  %8154 = vmatpush3.msra.mxu1 %v7034_v37  ;;  %v7779_v54 = vld [vmem:[%s9706_s3 + $0x208] sm:$0xff]   ;;  %v6957_v37 = vunpack.c.l.bf16 %v7780_v59 }
 0x287   :  { %8120 = vmatprep.subr.mxu0 %v7001_v40  ;;  %8155 = vmatprep.subr.mxu1 %v7065_v61  ;;  %v7795_v40 = vld [vmem:[%s9706_s3 + $0x288] sm:$0xff]   ;;  %v7050_v61 = vunpack.c.h.bf16 %v7803_v51  ;;  %v6953_v32 = vunpack.c.l.bf16 %v7779_v54 }
 0x288   :  { %8121 = vmatpush3.msra.mxu0 %v6969_v63  ;;  %8156 = vmatpush3.msra.mxu1 %v7033_v9  ;;  %v6954_v63 = vunpack.c.h.bf16 %v7779_v54  ;;  %v626_v9 = vrot.slane %v9009_v35, %v8870_v29  ;;  %v7824_v54 = vld [vmem:[%s9706_s3 + $0x370] sm:$0xff]  }
 0x289   :  { %8122 = vmatprep.subr.mxu0 %v6998_v10  ;;  %8157 = vmatprep.subr.mxu1 %v7062_v14  ;;  %v7018_v10 = vunpack.c.h.bf16 %v7795_v40  ;;  %v6985_v14 = vunpack.c.l.bf16 %v7787_v47 }
 0x28a   :  { %8123 = vmatpush3.msra.mxu0 %v6966_v12  ;;  %8158 = vmatpush3.msra.mxu1 %v7030_v26  ;;  %v7802_v12 = vld [vmem:[%s9706_s3 + $0x2c0] sm:$0xff]   ;;  %v634_v26 = vrot.slane %v9009_v35, %v8879_v34 }
 0x28b   :  { %8124 = vmatprep.subr.mxu0 %v6997_v18  ;;  %8159 = vmatprep.subr.mxu1 %v7061_v21  ;;  %v7049_v18 = vunpack.c.l.bf16 %v7803_v51  ;;  %v7017_v21 = vunpack.c.l.bf16 %v7795_v40  ;;  %v7045_v59 = vunpack.c.l.bf16 %v7802_v12 }
 0x28c   :  { %8125 = vmatpush3.msra.mxu0 %v6965_v11  ;;  %8160 = vmatpush3.msra.mxu1 %v7029_v25  ;;  %v6982_v11 = vunpack.c.h.bf16 %v7786_v2  ;;  %v7046_v25 = vunpack.c.h.bf16 %v7802_v12  ;;  %v3558_v39 = vadd.f32 %v8747_v22, %v634_v26  ;;  %v3601_v22 = vadd.f32 %v8762_v5, %v646_v24  ;;  %v7839_v26 = vld [vmem:[%s9706_s3 + $0x3e8] sm:$0xff]  }
 0x28d   :  { %8126 = vmatprep.subr.mxu0 %v6994_v30  ;;  %8161 = vmatprep.subr.mxu1 %v7058_v57  ;;  %v6950_v30 = vunpack.c.h.bf16 %v7778_v23  ;;  %v3517_v57 = vadd.f32 %v8744_v19, %v626_v9  ;;  %v7841_v19 = vld [vmem:[%s9706_s3 + $0x3f8] sm:$0xff]  }
 0x28e   :  { %8127 = vmatpush3.msra.mxu0 %v6962_v31  ;;  %8162 = vmatpush3.msra.mxu1 %v7026_v36  ;;  %v654_v31 = vrot.slane %v9009_v35, %v8893_v48  ;;  %v6981_v36 = vunpack.c.l.bf16 %v7786_v2  ;;  %v7202_v47 = vunpack.c.h.bf16 %v7841_v19  ;;  %v7201_v40 = vunpack.c.l.bf16 %v7841_v19 }
 0x28f   :  { %8128 = vmatprep.subr.mxu0 %v6993_v38  ;;  %8163 = vmatprep.subr.mxu1 %v7057_v41  ;;  %v7825_v38 = vld [vmem:[%s9706_s3 + $0x378] sm:$0xff]   ;;  %v6949_v41 = vunpack.c.l.bf16 %v7778_v23  ;;  %v7134_v2 = vunpack.c.h.bf16 %v7824_v54  ;;  %v7133_v23 = vunpack.c.l.bf16 %v7824_v54 }
 0x290   :  { %8129 = vmatpush3.msra.mxu0 %v6961_v62  ;;  %8164 = vmatpush3.msra.mxu1 %v7025_v44  ;;  %v7817_v62 = vld [vmem:[%s9706_s3 + $0x338] sm:$0xff]   ;;  %v7137_v5 = vunpack.c.l.bf16 %v7825_v38 }
 0x291   :  { %8130 = vmatprep.subr.mxu0 %v6990_v27  ;;  %8165 = vmatprep.subr.mxu1 %v7054_v45  ;;  %v7833_v44 = vld [vmem:[%s9706_s3 + $0x3b8] sm:$0xff]   ;;  %v7138_v27 = vunpack.c.h.bf16 %v7825_v38  ;;  %v3982_v45 = vmax.f32 %v3517_v57, 0.0  ;;  %v7822_v57 = vld [vmem:[%s9706_s3 + $0x360] sm:$0xff]  }
 0x292   :  { %8131 = vmatpush3.msra.mxu0 %v6958_v46  ;;  %8166 = vmatpush3.msra.mxu1 %v7022_v49  ;;  %v3642_v46 = vadd.f32 %v8764_v8, %v654_v31  ;;  %v7106_v49 = vunpack.c.h.bf16 %v7817_v62  ;;  %v7170_v51 = vunpack.c.h.bf16 %v7833_v44  ;;  %v7816_v8 = vld [vmem:[%s9706_s3 + $0x330] sm:$0xff]   ;;  %v7814_v38 = vld [vmem:[%s9706_s3 + $0x320] sm:$0xff]  }
 0x293   :  { %8132 = vmatprep.subr.mxu0 %v6989_v50  ;;  %8167 = vmatprep.subr.mxu1 %v7053_v52  ;;  %v3984_v50 = vmax.f32 %v3558_v39, 0.0  ;;  %v7840_v52 = vld [vmem:[%s9706_s3 + $0x3f0] sm:$0xff]   ;;  %v7101_v20 = vunpack.c.l.bf16 %v7816_v8  ;;  %v7193_v39 = vunpack.c.l.bf16 %v7839_v26 }
 0x294   :  { %8133 = vmatpush3.msra.mxu0 %v6957_v37  ;;  %8168 = vmatpush3.msra.mxu1 %v7021_v58  ;;  %v3987_v37 = vmax.f32 %v3601_v22, 0.0  ;;  %v7105_v58 = vunpack.c.l.bf16 %v7817_v62  ;;  %v7198_v9 = vunpack.c.h.bf16 %v7840_v52  ;;  %v7126_v62 = vunpack.c.h.bf16 %v7822_v57  ;;  %v7821_v22 = vld [vmem:[%s9706_s3 + $0x358] sm:$0xff]  }
 0x295   :  { %8134 = vmatprep.subr.mxu0 %v6986_v56  ;;  %8169 = vmatprep.subr.mxu1 %v7050_v61  ;;  %v7832_v56 = vld [vmem:[%s9706_s3 + $0x3b0] sm:$0xff]   ;;  %v3989_v61 = vmax.f32 %v3642_v46, 0.0  ;;  %v7837_v46 = vld [vmem:[%s9706_s3 + $0x3d8] sm:$0xff]  }
 0x296   :  { %8135 = vmatpush3.msra.mxu0 %v6954_v63  ;;  %8170 = vmatpush3.msra.mxu1 %v7018_v10  ;;  %v7169_v63 = vunpack.c.l.bf16 %v7833_v44  ;;  %v7102_v10 = vunpack.c.h.bf16 %v7816_v8  ;;  %v7166_v12 = vunpack.c.h.bf16 %v7832_v56  ;;  %v7094_v44 = vunpack.c.h.bf16 %v7814_v38 }
 0x297   :  { %8136 = vmatprep.subr.mxu0 %v6985_v14  ;;  %8171 = vmatprep.subr.mxu1 %v7049_v18  ;;  %v7823_v14 = vld [vmem:[%s9706_s3 + $0x368] sm:$0xff]  }
 0x298   :  { %8137 = vmatpush3.msra.mxu0 %v6953_v32  ;;  %8172 = vmatpush3.msra.mxu1 %v7017_v21  ;;  %v7815_v18 = vld [vmem:[%s9706_s3 + $0x328] sm:$0xff]   ;;  %v7197_v32 = vunpack.c.l.bf16 %v7840_v52  ;;  %v7130_v24 = vunpack.c.h.bf16 %v7823_v14  ;;  %v7186_v52 = vunpack.c.h.bf16 %v7837_v46 }
 0x299   :  { %8138 = vmatprep.subr.mxu0 %v6982_v11  ;;  %8173 = vmatprep.subr.mxu1 %v7046_v25  ;;  %v7831_v21 = vld [vmem:[%s9706_s3 + $0x3a8] sm:$0xff]   ;;  %v7165_v11 = vunpack.c.l.bf16 %v7832_v56  ;;  %v7194_v25 = vunpack.c.h.bf16 %v7839_v26  ;;  %v7836_v56 = vld [vmem:[%s9706_s3 + $0x3d0] sm:$0xff]  }
 0x29a   :  { %8139 = vmatpush3.msra.mxu0 %v6950_v30  ;;  %8174 = vmatpush3.msra.mxu1 %v7014_v33  ;;  %v7098_v30 = vunpack.c.h.bf16 %v7815_v18  ;;  %v7162_v31 = vunpack.c.h.bf16 %v7831_v21  ;;  %v7129_v33 = vunpack.c.l.bf16 %v7823_v14  ;;  %v7161_v19 = vunpack.c.l.bf16 %v7831_v21  ;;  %v7819_v26 = vld [vmem:[%s9706_s3 + $0x348] sm:$0xff]  }
 0x29b   :  { %8140 = vmatprep.subr.mxu0 %v6981_v36  ;;  %8175 = vmatprep.subr.mxu1 %v7045_v59  ;;  %v7838_v36 = vld [vmem:[%s9706_s3 + $0x3e0] sm:$0xff]   ;;  %v7097_v59 = vunpack.c.l.bf16 %v7815_v18  ;;  %v7811_v21 = vld [vmem:[%s9706_s3 + $0x308] sm:$0xff]  }
 0x29c   :  { %8141 = vmatpush3.msra.mxu0 %v6949_v41  ;;  %8176 = vmatpush3.msra.mxu1 %v7013_v42  ;;  %v7830_v41 = vld [vmem:[%s9706_s3 + $0x3a0] sm:$0xff]   ;;  %v7190_v42 = vunpack.c.h.bf16 %v7838_v36 }
 0x29d   :  { %5382 = vmatmul.mubr.f32.vlgmr.msra.gmra.mxu0 %v3982_v45  ;;  %5452 = vmatmul.mubr.f32.vlgmr.msra.gmra.mxu1 %v3984_v50  ;;  %v7125_v45 = vunpack.c.l.bf16 %v7822_v57  ;;  %v7093_v50 = vunpack.c.l.bf16 %v7814_v38  ;;  %v7157_v54 = vunpack.c.l.bf16 %v7830_v41  ;;  %v7114_v57 = vunpack.c.h.bf16 %v7819_v26 }
 0x29e   :  { %8180 = vmatprep.subr.mxu0 %v7138_v27  ;;  %8215 = vmatprep.subr.mxu1 %v7202_v47  ;;  %v7158_v27 = vunpack.c.h.bf16 %v7830_v41  ;;  %v7813_v47 = vld [vmem:[%s9706_s3 + $0x318] sm:$0xff]   ;;  %v642_v38 = vrot.slane %v9009_v35, %v8990_v4  ;;  %v7113_v41 = vunpack.c.l.bf16 %v7819_v26 }
 0x29f   :  { %8181 = vmatpush3.msra.mxu0 %v7106_v49  ;;  %5521 = vmatprep.mubr.f32.mxu0 %v3987_v37  ;;  %v7189_v49 = vunpack.c.l.bf16 %v7838_v36  ;;  %v7090_v8 = vunpack.c.h.bf16 %v7813_v47  ;;  %v7820_v37 = vld [vmem:[%s9706_s3 + $0x350] sm:$0xff]   ;;  %v7818_v36 = vld [vmem:[%s9706_s3 + $0x340] sm:$0xff]  }
 0x2a0   :  { %8216 = vmatpush3.msra.mxu1 %v7170_v51  ;;  %5591 = vmatprep.mubr.f32.mxu1 %v3989_v61  ;;  %v7829_v51 = vld [vmem:[%s9706_s3 + $0x398] sm:$0xff]   ;;  %v7812_v61 = vld [vmem:[%s9706_s3 + $0x310] sm:$0xff]   ;;  %v7118_v14 = vunpack.c.h.bf16 %v7820_v37 }
 0x2a1   :  { %8182 = vmatprep.subr.mxu0 %v7137_v5  ;;  %8217 = vmatprep.subr.mxu1 %v7201_v40  ;;  %v7122_v5 = vunpack.c.h.bf16 %v7821_v22  ;;  %v7154_v40 = vunpack.c.h.bf16 %v7829_v51 }
 0x2a2   :  { %8183 = vmatpush3.msra.mxu0 %v7105_v58  ;;  %8218 = vmatpush3.msra.mxu1 %v7169_v63  ;;  %v7121_v58 = vunpack.c.l.bf16 %v7821_v22  ;;  %v7185_v63 = vunpack.c.l.bf16 %v7837_v46  ;;  %v7081_v22 = vunpack.c.l.bf16 %v7811_v21  ;;  %v7110_v46 = vunpack.c.h.bf16 %v7818_v36 }
 0x2a3   :  { %8184 = vmatprep.subr.mxu0 %v7134_v2  ;;  %8219 = vmatprep.subr.mxu1 %v7198_v9  ;;  %v7089_v2 = vunpack.c.l.bf16 %v7813_v47  ;;  %v7828_v9 = vld [vmem:[%s9706_s3 + $0x390] sm:$0xff]  }
 0x2a4   :  { %8185 = vmatpush3.msra.mxu0 %v7102_v10  ;;  %8220 = vmatpush3.msra.mxu1 %v7166_v12  ;;  %v7153_v10 = vunpack.c.l.bf16 %v7829_v51  ;;  %v7182_v12 = vunpack.c.h.bf16 %v7836_v56  ;;  %v7150_v18 = vunpack.c.h.bf16 %v7828_v9  ;;  %v3599_v51 = vadd.f32 %v8756_v0, %v642_v38  ;;  %v7873_v0 = vld [vmem:[%s9706_s3 + $0x4f8] sm:$0xff]   ;;  %v7864_v38 = vld [vmem:[%s9706_s3 + $0x4b0] sm:$0xff]  }
 0x2a5   :  { %8186 = vmatprep.subr.mxu0 %v7133_v23  ;;  %8221 = vmatprep.subr.mxu1 %v7197_v32  ;;  %v7086_v23 = vunpack.c.h.bf16 %v7812_v61  ;;  %v7117_v32 = vunpack.c.l.bf16 %v7820_v37  ;;  %v7857_v37 = vld [vmem:[%s9706_s3 + $0x478] sm:$0xff]  }
 0x2a6   :  { %8187 = vmatpush3.msra.mxu0 %v7101_v20  ;;  %8222 = vmatpush3.msra.mxu1 %v7165_v11  ;;  %v7835_v20 = vld [vmem:[%s9706_s3 + $0x3c8] sm:$0xff]   ;;  %v7181_v11 = vunpack.c.l.bf16 %v7836_v56 }
 0x2a7   :  { %8188 = vmatprep.subr.mxu0 %v7130_v24  ;;  %8223 = vmatprep.subr.mxu1 %v7194_v25  ;;  %v7085_v24 = vunpack.c.l.bf16 %v7812_v61  ;;  %v7827_v25 = vld [vmem:[%s9706_s3 + $0x388] sm:$0xff]   ;;  %v7849_v61 = vld [vmem:[%s9706_s3 + $0x438] sm:$0xff]  }
 0x2a8   :  { %8189 = vmatpush3.msra.mxu0 %v7098_v30  ;;  %8224 = vmatpush3.msra.mxu1 %v7162_v31  ;;  %v7149_v30 = vunpack.c.l.bf16 %v7828_v9  ;;  %v7178_v31 = vunpack.c.h.bf16 %v7835_v20 }
 0x2a9   :  { %8190 = vmatprep.subr.mxu0 %v7129_v33  ;;  %8225 = vmatprep.subr.mxu1 %v7193_v39  ;;  %v7082_v33 = vunpack.c.h.bf16 %v7811_v21  ;;  %v9235_v39 = vld [vmem:[#allocation7 + $0x10] sm:$0xff] }
 0x2aa   :  { %8191 = vmatpush3.msra.mxu0 %v7097_v59  ;;  %8226 = vmatpush3.msra.mxu1 %v7161_v19  ;;  %v7146_v59 = vunpack.c.h.bf16 %v7827_v25  ;;  %v7834_v19 = vld [vmem:[%s9706_s3 + $0x3c0] sm:$0xff]   ;;  %v662_v47 = vrot.slane %v9235_v39, %v8771_v53 }
 0x2ab   :  { %8192 = vmatprep.subr.mxu0 %v7126_v62  ;;  %8227 = vmatprep.subr.mxu1 %v7190_v42  ;;  %v7810_v62 = vld [vmem:[%s9706_s3 + $0x300] sm:$0xff]   ;;  %v650_v42 = vrot.slane %v9009_v35, %v8999_v15 }
 0x2ac   :  { %8193 = vmatpush3.msra.mxu0 %v7094_v44  ;;  %8228 = vmatpush3.msra.mxu1 %v7158_v27  ;;  %v7177_v44 = vunpack.c.l.bf16 %v7835_v20  ;;  %v7826_v27 = vld [vmem:[%s9706_s3 + $0x380] sm:$0xff]   ;;  %v7077_v56 = vunpack.c.l.bf16 %v7810_v62 }
 0x2ad   :  { %8194 = vmatprep.subr.mxu0 %v7125_v45  ;;  %8229 = vmatprep.subr.mxu1 %v7189_v49  ;;  %v7145_v45 = vunpack.c.l.bf16 %v7827_v25  ;;  %v7174_v49 = vunpack.c.h.bf16 %v7834_v19  ;;  %v7265_v25 = vunpack.c.l.bf16 %v7857_v37 }
 0x2ae   :  { %8195 = vmatpush3.msra.mxu0 %v7093_v50  ;;  %8230 = vmatpush3.msra.mxu1 %v7157_v54  ;;  %v7078_v50 = vunpack.c.h.bf16 %v7810_v62  ;;  %v670_v54 = vrot.slane %v9235_v39, %v8776_v28 }
 0x2af   :  { %8196 = vmatprep.subr.mxu0 %v7122_v5  ;;  %8231 = vmatprep.subr.mxu1 %v7186_v52  ;;  %v7142_v5 = vunpack.c.h.bf16 %v7826_v27  ;;  %v7109_v52 = vunpack.c.l.bf16 %v7818_v36  ;;  %v7233_v36 = vunpack.c.l.bf16 %v7849_v61 }
 0x2b0   :  { %8197 = vmatpush3.msra.mxu0 %v7090_v8  ;;  %8232 = vmatpush3.msra.mxu1 %v7154_v40  ;;  %v3640_v40 = vadd.f32 %v8759_v3, %v650_v42  ;;  %v7865_v3 = vld [vmem:[%s9706_s3 + $0x4b8] sm:$0xff]   ;;  %v3724_v26 = vadd.f32 %v8819_v13, %v670_v54  ;;  %v7872_v13 = vld [vmem:[%s9706_s3 + $0x4f0] sm:$0xff]  }
 0x2b1   :  { %8198 = vmatprep.subr.mxu0 %v7121_v58  ;;  %8233 = vmatprep.subr.mxu1 %v7185_v63  ;;  %v7173_v58 = vunpack.c.l.bf16 %v7834_v19  ;;  %v7326_v62 = vunpack.c.h.bf16 %v7872_v13 }
 0x2b2   :  { %8199 = vmatpush3.msra.mxu0 %v7089_v2  ;;  %8234 = vmatpush3.msra.mxu1 %v7153_v10  ;;  %v7141_v2 = vunpack.c.l.bf16 %v7826_v27  ;;  %v3683_v10 = vadd.f32 %v8814_v6, %v662_v47  ;;  %v3988_v21 = vmax.f32 %v3640_v40, 0.0  ;;  %v7856_v6 = vld [vmem:[%s9706_s3 + $0x470] sm:$0xff]   ;;  %v7325_v47 = vunpack.c.l.bf16 %v7872_v13 }
 0x2b3   :  { %8200 = vmatprep.subr.mxu0 %v7118_v14  ;;  %8235 = vmatprep.subr.mxu1 %v7182_v12  ;;  %v7266_v14 = vunpack.c.h.bf16 %v7857_v37  ;;  %v7262_v19 = vunpack.c.h.bf16 %v7856_v6  ;;  %v7261_v27 = vunpack.c.l.bf16 %v7856_v6  ;;  %v7854_v37 = vld [vmem:[%s9706_s3 + $0x460] sm:$0xff]  }
 0x2b4   :  { %8201 = vmatpush3.msra.mxu0 %v7086_v23  ;;  %8236 = vmatpush3.msra.mxu1 %v7150_v18  ;;  %v3986_v23 = vmax.f32 %v3599_v51, 0.0  ;;  %v7330_v18 = vunpack.c.h.bf16 %v7873_v0  ;;  %v7293_v51 = vunpack.c.l.bf16 %v7864_v38 }
 0x2b5   :  { %8202 = vmatprep.subr.mxu0 %v7117_v32  ;;  %8237 = vmatprep.subr.mxu1 %v7181_v11  ;;  %v7234_v32 = vunpack.c.h.bf16 %v7849_v61  ;;  %v7298_v11 = vunpack.c.h.bf16 %v7865_v3 }
 0x2b6   :  { %8203 = vmatpush3.msra.mxu0 %v7085_v24  ;;  %8238 = vmatpush3.msra.mxu1 %v7149_v30  ;;  %v7848_v30 = vld [vmem:[%s9706_s3 + $0x430] sm:$0xff]  }
 0x2b7   :  { %8204 = vmatprep.subr.mxu0 %v7114_v57  ;;  %8239 = vmatprep.subr.mxu1 %v7178_v31  ;;  %v3991_v31 = vmax.f32 %v3683_v10, 0.0  ;;  %v7230_v42 = vunpack.c.h.bf16 %v7848_v30 }
 0x2b8   :  { %8205 = vmatpush3.msra.mxu0 %v7082_v33  ;;  %v9250_v35 = vpop.f32.mrf.mxu0  ;;  %8240 = vmatpush3.msra.mxu1 %v7146_v59  ;;  %v9255_v8 = vpop.f32.mrf.mxu1  ;;  %v7329_v33 = vunpack.c.l.bf16 %v7873_v0  ;;  %v3993_v59 = vmax.f32 %v3724_v26, 0.0  ;;  %v7846_v0 = vld [vmem:[%s9706_s3 + $0x420] sm:$0xff]   ;;  %v7853_v26 = vld [vmem:[%s9706_s3 + $0x458] sm:$0xff]  }
 0x2b9   :  { %8206 = vmatprep.subr.mxu0 %v7113_v41  ;;  %8241 = vmatprep.subr.mxu1 %v7177_v44  ;;  %v7297_v41 = vunpack.c.l.bf16 %v7865_v3  ;;  %v7855_v44 = vld [vmem:[%s9706_s3 + $0x468] sm:$0xff]   ;;  %v7862_v3 = vld [vmem:[%s9706_s3 + $0x4a0] sm:$0xff]   ;;  %v7221_v6 = vunpack.c.l.bf16 %v7846_v0  ;;  %v7250_v13 = vunpack.c.h.bf16 %v7853_v26 }
 0x2ba   :  { %8207 = vmatpush3.msra.mxu0 %v7081_v22  ;;  %v9267_v63 = vpop.f32.mrf.mxu0  ;;  %8242 = vmatpush3.msra.mxu1 %v7145_v45  ;;  %v9272_v9 = vpop.f32.mrf.mxu1  ;;  %v7294_v22 = vunpack.c.h.bf16 %v7864_v38  ;;  %v7871_v45 = vld [vmem:[%s9706_s3 + $0x4e8] sm:$0xff]   ;;  %v7258_v54 = vunpack.c.h.bf16 %v7855_v44  ;;  %v7868_v38 = vld [vmem:[%s9706_s3 + $0x4d0] sm:$0xff]  }
 0x2bb   :  { %8208 = vmatprep.subr.mxu0 %v7110_v46  ;;  %8243 = vmatprep.subr.mxu1 %v7174_v49  ;;  %v7847_v46 = vld [vmem:[%s9706_s3 + $0x428] sm:$0xff]   ;;  %v7229_v49 = vunpack.c.l.bf16 %v7848_v30  ;;  %v7321_v61 = vunpack.c.l.bf16 %v7871_v45 }
 0x2bc   :  { %8209 = vmatpush3.msra.mxu0 %v7078_v50  ;;  %v3848_v12 = vpop.f32.mrf.mxu0  ;;  %8244 = vmatpush3.msra.mxu1 %v7142_v5  ;;  %v3889_v20 = vpop.f32.mrf.mxu1  ;;  %v7863_v50 = vld [vmem:[%s9706_s3 + $0x4a8] sm:$0xff]   ;;  %v7322_v5 = vunpack.c.h.bf16 %v7871_v45 }
 0x2bd   :  { %8210 = vmatprep.subr.mxu0 %v7109_v52  ;;  %8245 = vmatprep.subr.mxu1 %v7173_v58  ;;  %v7226_v52 = vunpack.c.h.bf16 %v7847_v46  ;;  %v7290_v40 = vunpack.c.h.bf16 %v7863_v50  ;;  %v7257_v58 = vunpack.c.l.bf16 %v7855_v44  ;;  %v7289_v10 = vunpack.c.l.bf16 %v7863_v50  ;;  %v7869_v20 = vld [vmem:[%s9706_s3 + $0x4d8] sm:$0xff]   ;;  %v7851_v45 = vld [vmem:[%s9706_s3 + $0x448] sm:$0xff]  }
 0x2be   :  { %8211 = vmatpush3.msra.mxu0 %v7077_v56  ;;  %v3849_v24 = vpop.f32.mrf.mxu0  ;;  %8246 = vmatpush3.msra.mxu1 %v7141_v2  ;;  %v3890_v57 = vpop.f32.mrf.mxu1  ;;  %v7870_v56 = vld [vmem:[%s9706_s3 + $0x4e0] sm:$0xff]   ;;  %v7225_v2 = vunpack.c.l.bf16 %v7847_v46  ;;  %v7314_v30 = vunpack.c.h.bf16 %v7869_v20  ;;  %v7843_v50 = vld [vmem:[%s9706_s3 + $0x408] sm:$0xff]  }
 0x2bf   :  { %5522 = vmatmul.mubr.f32.vlgmr.msra.gmra.mxu0 %v3986_v23  ;;  %5592 = vmatmul.mubr.f32.vlgmr.msra.gmra.mxu1 %v3988_v21  ;;  %v7318_v12 = vunpack.c.h.bf16 %v7870_v56  ;;  %v7222_v23 = vunpack.c.h.bf16 %v7846_v0  ;;  %v7845_v21 = vld [vmem:[%s9706_s3 + $0x418] sm:$0xff]   ;;  %v658_v0 = vrot.slane %v9235_v39, %v8870_v29 }
 0x2c0   :  { %8250 = vmatprep.subr.mxu0 %v7266_v14  ;;  %8285 = vmatprep.subr.mxu1 %v7330_v18  ;;  %v7254_v14 = vunpack.c.h.bf16 %v7854_v37  ;;  %v7286_v18 = vunpack.c.h.bf16 %v7862_v3  ;;  %v7861_v24 = vld [vmem:[%s9706_s3 + $0x498] sm:$0xff]   ;;  %v7218_v57 = vunpack.c.h.bf16 %v7845_v21 }
 0x2c1   :  { %8251 = vmatpush3.msra.mxu0 %v7234_v32  ;;  %5661 = vmatprep.mubr.f32.mxu0 %v3991_v31  ;;  %v7253_v32 = vunpack.c.l.bf16 %v7854_v37  ;;  %v7852_v31 = vld [vmem:[%s9706_s3 + $0x450] sm:$0xff]   ;;  %v7242_v37 = vunpack.c.h.bf16 %v7851_v45 }
 0x2c2   :  { %8286 = vmatpush3.msra.mxu1 %v7298_v11  ;;  %5731 = vmatprep.mubr.f32.mxu1 %v3993_v59  ;;  %v7317_v11 = vunpack.c.l.bf16 %v7870_v56  ;;  %v7844_v59 = vld [vmem:[%s9706_s3 + $0x410] sm:$0xff]   ;;  %v7246_v44 = vunpack.c.h.bf16 %v7852_v31  ;;  %v7850_v56 = vld [vmem:[%s9706_s3 + $0x440] sm:$0xff]  }
 0x2c3   :  { %8252 = vmatprep.subr.mxu0 %v7265_v25  ;;  %8287 = vmatprep.subr.mxu1 %v7329_v33  ;;  %v7285_v25 = vunpack.c.l.bf16 %v7862_v3  ;;  %v7282_v33 = vunpack.c.h.bf16 %v7861_v24  ;;  %v7866_v3 = vld [vmem:[%s9706_s3 + $0x4c0] sm:$0xff]  }
 0x2c4   :  { %8253 = vmatpush3.msra.mxu0 %v7233_v36  ;;  %8288 = vmatpush3.msra.mxu1 %v7297_v41  ;;  %v7249_v36 = vunpack.c.l.bf16 %v7853_v26  ;;  %v7313_v41 = vunpack.c.l.bf16 %v7869_v20  ;;  %v7858_v26 = vld [vmem:[%s9706_s3 + $0x480] sm:$0xff]   ;;  %v678_v20 = vrot.slane %v9235_v39, %v8885_v43 }
 0x2c5   :  { %8254 = vmatprep.subr.mxu0 %v7262_v19  ;;  %8289 = vmatprep.subr.mxu1 %v7326_v62  ;;  %v7217_v19 = vunpack.c.l.bf16 %v7845_v21  ;;  %v7860_v62 = vld [vmem:[%s9706_s3 + $0x490] sm:$0xff]   ;;  %v7302_v21 = vunpack.c.h.bf16 %v7866_v3 }
 0x2c6   :  { %8255 = vmatpush3.msra.mxu0 %v7230_v42  ;;  %8290 = vmatpush3.msra.mxu1 %v7294_v22  ;;  %v7281_v42 = vunpack.c.l.bf16 %v7861_v24  ;;  %v7310_v22 = vunpack.c.h.bf16 %v7868_v38  ;;  %v7278_v46 = vunpack.c.h.bf16 %v7860_v62  ;;  %v686_v24 = vrot.slane %v9235_v39, %v8893_v48 }
 0x2c7   :  { %8256 = vmatprep.subr.mxu0 %v7261_v27  ;;  %8291 = vmatprep.subr.mxu1 %v7325_v47  ;;  %v7214_v27 = vunpack.c.h.bf16 %v7844_v59  ;;  %v7245_v47 = vunpack.c.l.bf16 %v7852_v31  ;;  %v7301_v31 = vunpack.c.l.bf16 %v7866_v3 }
 0x2c8   :  { %8257 = vmatpush3.msra.mxu0 %v7229_v49  ;;  %8292 = vmatpush3.msra.mxu1 %v7293_v51  ;;  %v7867_v49 = vld [vmem:[%s9706_s3 + $0x4c8] sm:$0xff]   ;;  %v7309_v51 = vunpack.c.l.bf16 %v7868_v38  ;;  %v7269_v38 = vunpack.c.l.bf16 %v7858_v26 }
 0x2c9   :  { %8258 = vmatprep.subr.mxu0 %v7258_v54  ;;  %8293 = vmatprep.subr.mxu1 %v7322_v5  ;;  %v7213_v54 = vunpack.c.l.bf16 %v7844_v59  ;;  %v7859_v5 = vld [vmem:[%s9706_s3 + $0x488] sm:$0xff]   ;;  %v7897_v59 = vld [vmem:[%s9706_s3 + $0x5b8] sm:$0xff]  }
 0x2ca   :  { %8259 = vmatpush3.msra.mxu0 %v7226_v52  ;;  %8294 = vmatpush3.msra.mxu1 %v7290_v40  ;;  %v7277_v52 = vunpack.c.l.bf16 %v7860_v62  ;;  %v7306_v40 = vunpack.c.h.bf16 %v7867_v49  ;;  %v3806_v62 = vadd.f32 %v9051_v17, %v686_v24  ;;  %v7880_v17 = vld [vmem:[%s9706_s3 + $0x530] sm:$0xff]  }
 0x2cb   :  { %8260 = vmatprep.subr.mxu0 %v7257_v58  ;;  %8295 = vmatprep.subr.mxu1 %v7321_v61  ;;  %v7210_v58 = vunpack.c.h.bf16 %v7843_v50  ;;  %v7274_v61 = vunpack.c.h.bf16 %v7859_v5 }
 0x2cc   :  { %8261 = vmatpush3.msra.mxu0 %v7225_v2  ;;  %8296 = vmatpush3.msra.mxu1 %v7289_v10  ;;  %v7241_v2 = vunpack.c.l.bf16 %v7851_v45  ;;  %v7842_v10 = vld [vmem:[%s9706_s3 + $0x400] sm:$0xff]   ;;  %v7888_v45 = vld [vmem:[%s9706_s3 + $0x570] sm:$0xff]  }
 0x2cd   :  { %8262 = vmatprep.subr.mxu0 %v7254_v14  ;;  %8297 = vmatprep.subr.mxu1 %v7318_v12  ;;  %v666_v14 = vrot.slane %v9235_v39, %v8879_v34  ;;  %v7305_v12 = vunpack.c.l.bf16 %v7867_v49 }
 0x2ce   :  { %8263 = vmatpush3.msra.mxu0 %v7222_v23  ;;  %8298 = vmatpush3.msra.mxu1 %v7286_v18  ;;  %v7209_v23 = vunpack.c.l.bf16 %v7843_v50  ;;  %v7273_v18 = vunpack.c.l.bf16 %v7859_v5  ;;  %v7425_v5 = vunpack.c.l.bf16 %v7897_v59 }
 0x2cf   :  { %8264 = vmatprep.subr.mxu0 %v7253_v32  ;;  %8299 = vmatprep.subr.mxu1 %v7317_v11  ;;  %v7238_v32 = vunpack.c.h.bf16 %v7850_v56  ;;  %v7206_v11 = vunpack.c.h.bf16 %v7842_v10 }
 0x2d0   :  { %8265 = vmatpush3.msra.mxu0 %v7221_v6  ;;  %8300 = vmatpush3.msra.mxu1 %v7285_v25  ;;  %v3681_v6 = vadd.f32 %v8805_v55, %v658_v0  ;;  %v7270_v25 = vunpack.c.h.bf16 %v7858_v26  ;;  %v7905_v55 = vld [vmem:[%s9706_s3 + $0x5f8] sm:$0xff]   ;;  %v7389_v0 = vunpack.c.l.bf16 %v7888_v45 }
 0x2d1   :  { %8266 = vmatprep.subr.mxu0 %v7250_v13  ;;  %8301 = vmatprep.subr.mxu1 %v7314_v30  ;;  %v7237_v13 = vunpack.c.l.bf16 %v7850_v56  ;;  %v7889_v30 = vld [vmem:[%s9706_s3 + $0x578] sm:$0xff]   ;;  %v7457_v49 = vunpack.c.l.bf16 %v7905_v55 }
 0x2d2   :  { %8267 = vmatpush3.msra.mxu0 %v7218_v57  ;;  %8302 = vmatpush3.msra.mxu1 %v7282_v33  ;;  %v3722_v57 = vadd.f32 %v8811_v1, %v666_v14  ;;  %v7205_v33 = vunpack.c.l.bf16 %v7842_v10  ;;  %v3765_v1 = vadd.f32 %v9046_v16, %v678_v20  ;;  %v7393_v16 = vunpack.c.l.bf16 %v7889_v30  ;;  %v7895_v14 = vld [vmem:[%s9706_s3 + $0x5a8] sm:$0xff]  }
 0x2d3   :  { %8268 = vmatprep.subr.mxu0 %v7249_v36  ;;  %8303 = vmatprep.subr.mxu1 %v7313_v41  ;;  %v7881_v36 = vld [vmem:[%s9706_s3 + $0x538] sm:$0xff]   ;;  %v7394_v41 = vunpack.c.h.bf16 %v7889_v30  ;;  %v7357_v10 = vunpack.c.l.bf16 %v7880_v17  ;;  %v7418_v20 = vunpack.c.h.bf16 %v7895_v14  ;;  %v7417_v30 = vunpack.c.l.bf16 %v7895_v14 }
 0x2d4   :  { %8269 = vmatpush3.msra.mxu0 %v7217_v19  ;;  %8304 = vmatpush3.msra.mxu1 %v7281_v42  ;;  %v3990_v19 = vmax.f32 %v3681_v6, 0.0  ;;  %v7458_v42 = vunpack.c.h.bf16 %v7905_v55  ;;  %v7361_v50 = vunpack.c.l.bf16 %v7881_v36  ;;  %v7878_v6 = vld [vmem:[%s9706_s3 + $0x520] sm:$0xff]   ;;  %v7885_v55 = vld [vmem:[%s9706_s3 + $0x558] sm:$0xff]  }
 0x2d5   :  { %8270 = vmatprep.subr.mxu0 %v7246_v44  ;;  %8305 = vmatprep.subr.mxu1 %v7310_v22  ;;  %v7362_v44 = vunpack.c.h.bf16 %v7881_v36  ;;  %v3992_v22 = vmax.f32 %v3722_v57, 0.0 }
 0x2d6   :  { %8271 = vmatpush3.msra.mxu0 %v7214_v27  ;;  %8306 = vmatpush3.msra.mxu1 %v7278_v46  ;;  %v7426_v27 = vunpack.c.h.bf16 %v7897_v59  ;;  %v7904_v46 = vld [vmem:[%s9706_s3 + $0x5f0] sm:$0xff]   ;;  %v7901_v59 = vld [vmem:[%s9706_s3 + $0x5d8] sm:$0xff]  }
 0x2d7   :  { %8272 = vmatprep.subr.mxu0 %v7245_v47  ;;  %8307 = vmatprep.subr.mxu1 %v7309_v51  ;;  %v3995_v47 = vmax.f32 %v3765_v1, 0.0  ;;  %v7896_v51 = vld [vmem:[%s9706_s3 + $0x5b0] sm:$0xff]   ;;  %v7453_v3 = vunpack.c.l.bf16 %v7904_v46  ;;  %v7877_v1 = vld [vmem:[%s9706_s3 + $0x518] sm:$0xff]  }
 0x2d8   :  { %8273 = vmatpush3.msra.mxu0 %v7213_v54  ;;  %8308 = vmatpush3.msra.mxu1 %v7277_v52  ;;  %v3997_v54 = vmax.f32 %v3806_v62, 0.0  ;;  %v7390_v52 = vunpack.c.h.bf16 %v7888_v45  ;;  %v7422_v56 = vunpack.c.h.bf16 %v7896_v51  ;;  %v7893_v62 = vld [vmem:[%s9706_s3 + $0x598] sm:$0xff]   ;;  %v7884_v45 = vld [vmem:[%s9706_s3 + $0x550] sm:$0xff]  }
 0x2d9   :  { %8274 = vmatprep.subr.mxu0 %v7242_v37  ;;  %8309 = vmatprep.subr.mxu1 %v7306_v40  ;;  %v7454_v37 = vunpack.c.h.bf16 %v7904_v46  ;;  %v7358_v40 = vunpack.c.h.bf16 %v7880_v17  ;;  %v7377_v46 = vunpack.c.l.bf16 %v7885_v55  ;;  %v7900_v17 = vld [vmem:[%s9706_s3 + $0x5d0] sm:$0xff]  }
 0x2da   :  { %8275 = vmatpush3.msra.mxu0 %v7210_v58  ;;  %8310 = vmatpush3.msra.mxu1 %v7274_v61  ;;  %v7887_v58 = vld [vmem:[%s9706_s3 + $0x568] sm:$0xff]  }
 0x2db   :  { %8276 = vmatprep.subr.mxu0 %v7241_v2  ;;  %8311 = vmatprep.subr.mxu1 %v7305_v12  ;;  %v7903_v61 = vld [vmem:[%s9706_s3 + $0x5e8] sm:$0xff]   ;;  %v7421_v12 = vunpack.c.l.bf16 %v7896_v51  ;;  %v7892_v51 = vld [vmem:[%s9706_s3 + $0x590] sm:$0xff]  }
 0x2dc   :  { %8277 = vmatpush3.msra.mxu0 %v7209_v23  ;;  %8312 = vmatpush3.msra.mxu1 %v7273_v18  ;;  %v7879_v2 = vld [vmem:[%s9706_s3 + $0x528] sm:$0xff]   ;;  %v7386_v23 = vunpack.c.h.bf16 %v7887_v58  ;;  %v7450_v26 = vunpack.c.h.bf16 %v7903_v61  ;;  %v7449_v24 = vunpack.c.l.bf16 %v7903_v61  ;;  %v7405_v14 = vunpack.c.l.bf16 %v7892_v51 }
 0x2dd   :  { %8278 = vmatprep.subr.mxu0 %v7238_v32  ;;  %8313 = vmatprep.subr.mxu1 %v7302_v21  ;;  %v7354_v18 = vunpack.c.h.bf16 %v7879_v2  ;;  %v7886_v32 = vld [vmem:[%s9706_s3 + $0x560] sm:$0xff]   ;;  %v7385_v21 = vunpack.c.l.bf16 %v7887_v58  ;;  %v7406_v58 = vunpack.c.h.bf16 %v7892_v51  ;;  %v7875_v61 = vld [vmem:[%s9706_s3 + $0x508] sm:$0xff]  }
 0x2de   :  { %8279 = vmatpush3.msra.mxu0 %v7206_v11  ;;  %8314 = vmatpush3.msra.mxu1 %v7270_v25  ;;  %v7902_v11 = vld [vmem:[%s9706_s3 + $0x5e0] sm:$0xff]   ;;  %v7353_v25 = vunpack.c.l.bf16 %v7879_v2  ;;  %v7382_v57 = vunpack.c.h.bf16 %v7886_v32  ;;  %v7437_v2 = vunpack.c.l.bf16 %v7900_v17 }
 0x2df   :  { %8280 = vmatprep.subr.mxu0 %v7237_v13  ;;  %8315 = vmatprep.subr.mxu1 %v7301_v31  ;;  %v7894_v13 = vld [vmem:[%s9706_s3 + $0x5a0] sm:$0xff]   ;;  %v7446_v31 = vunpack.c.h.bf16 %v7902_v11 }
 0x2e0   :  { %8281 = vmatpush3.msra.mxu0 %v7205_v33  ;;  %8316 = vmatpush3.msra.mxu1 %v7269_v38  ;;  %v7350_v33 = vunpack.c.h.bf16 %v7878_v6  ;;  %v7414_v36 = vunpack.c.h.bf16 %v7894_v13  ;;  %v7381_v38 = vunpack.c.l.bf16 %v7886_v32 }
 0x2e1   :  { %5662 = vmatmul.mubr.f32.vlgmr.msra.gmra.mxu0 %v3990_v19  ;;  %5732 = vmatmul.mubr.f32.vlgmr.msra.gmra.mxu1 %v3992_v22  ;;  %v7349_v19 = vunpack.c.l.bf16 %v7878_v6  ;;  %v7442_v22 = vunpack.c.h.bf16 %v7901_v59 }
 0x2e2   :  { %8320 = vmatprep.subr.mxu0 %v7394_v41  ;;  %8355 = vmatprep.subr.mxu1 %v7458_v42  ;;  %v7445_v41 = vunpack.c.l.bf16 %v7902_v11  ;;  %v7413_v42 = vunpack.c.l.bf16 %v7894_v13 }
 0x2e3   :  { %8321 = vmatpush3.msra.mxu0 %v7362_v44  ;;  %5801 = vmatprep.mubr.f32.mxu0 %v3995_v47  ;;  %v7378_v44 = vunpack.c.h.bf16 %v7885_v55  ;;  %v7876_v47 = vld [vmem:[%s9706_s3 + $0x510] sm:$0xff]  }
 0x2e4   :  { %8356 = vmatpush3.msra.mxu1 %v7426_v27  ;;  %5871 = vmatprep.mubr.f32.mxu1 %v3997_v54  ;;  %v7346_v27 = vunpack.c.h.bf16 %v7877_v1  ;;  %v7409_v54 = vunpack.c.l.bf16 %v7893_v62 }
 0x2e5   :  { %8322 = vmatprep.subr.mxu0 %v7393_v16  ;;  %8357 = vmatprep.subr.mxu1 %v7457_v49  ;;  %v7410_v16 = vunpack.c.h.bf16 %v7893_v62  ;;  %v7441_v49 = vunpack.c.l.bf16 %v7901_v59 }
 0x2e6   :  { %8323 = vmatpush3.msra.mxu0 %v7361_v50  ;;  %8358 = vmatpush3.msra.mxu1 %v7425_v5  ;;  %v7345_v50 = vunpack.c.l.bf16 %v7877_v1  ;;  %v7374_v5 = vunpack.c.h.bf16 %v7884_v45 }
 0x2e7   :  { %8324 = vmatprep.subr.mxu0 %v7390_v52  ;;  %8359 = vmatprep.subr.mxu1 %v7454_v37  ;;  %v7438_v52 = vunpack.c.h.bf16 %v7900_v17  ;;  %v7342_v37 = vunpack.c.h.bf16 %v7876_v47 }
 0x2e8   :  { %8325 = vmatpush3.msra.mxu0 %v7358_v40  ;;  %8360 = vmatpush3.msra.mxu1 %v7422_v56  ;;  %v7883_v40 = vld [vmem:[%s9706_s3 + $0x548] sm:$0xff]   ;;  %v7373_v56 = vunpack.c.l.bf16 %v7884_v45 }
 0x2e9   :  { %8326 = vmatprep.subr.mxu0 %v7389_v0  ;;  %8361 = vmatprep.subr.mxu1 %v7453_v3  ;;  %v7899_v0 = vld [vmem:[%s9706_s3 + $0x5c8] sm:$0xff]   ;;  %v7341_v3 = vunpack.c.l.bf16 %v7876_v47  ;;  %v7369_v6 = vunpack.c.l.bf16 %v7883_v40 }
 0x2ea   :  { %8327 = vmatpush3.msra.mxu0 %v7357_v10  ;;  %8362 = vmatpush3.msra.mxu1 %v7421_v12  ;;  %v7891_v10 = vld [vmem:[%s9706_s3 + $0x588] sm:$0xff]   ;;  %v7370_v12 = vunpack.c.h.bf16 %v7883_v40 }
 0x2eb   :  { %8328 = vmatprep.subr.mxu0 %v7386_v23  ;;  %8363 = vmatprep.subr.mxu1 %v7450_v26  ;;  %v7434_v23 = vunpack.c.h.bf16 %v7899_v0  ;;  %v7338_v26 = vunpack.c.h.bf16 %v7875_v61  ;;  %v7402_v11 = vunpack.c.h.bf16 %v7891_v10 }
 0x2ec   :  { %8329 = vmatpush3.msra.mxu0 %v7354_v18  ;;  %8364 = vmatpush3.msra.mxu1 %v7418_v20  ;;  %v7882_v18 = vld [vmem:[%s9706_s3 + $0x540] sm:$0xff]   ;;  %v674_v20 = vrot.slane %v9235_v39, %v8990_v4 }
 0x2ed   :  { %8330 = vmatprep.subr.mxu0 %v7385_v21  ;;  %8365 = vmatprep.subr.mxu1 %v7449_v24  ;;  %v9463_v21 = vld [vmem:[#allocation7 + $0x18] sm:$0xff] }
 0x2ee   :  { %8331 = vmatpush3.msra.mxu0 %v7353_v25  ;;  %8366 = vmatpush3.msra.mxu1 %v7417_v30  ;;  %v7898_v24 = vld [vmem:[%s9706_s3 + $0x5c0] sm:$0xff]   ;;  %v682_v30 = vrot.slane %v9235_v39, %v8999_v15  ;;  %v694_v1 = vrot.slane %v9463_v21, %v8771_v53  ;;  %v3763_v62 = vadd.f32 %v9041_v60, %v674_v20  ;;  %v7937_v60 = vld [vmem:[%s9706_s3 + $0x6f8] sm:$0xff]   ;;  %v7919_v20 = vld [vmem:[%s9706_s3 + $0x668] sm:$0xff]  }
 0x2ef   :  { %8332 = vmatprep.subr.mxu0 %v7382_v57  ;;  %8367 = vmatprep.subr.mxu1 %v7446_v31  ;;  %v7874_v25 = vld [vmem:[%s9706_s3 + $0x500] sm:$0xff]   ;;  %v7433_v57 = vunpack.c.l.bf16 %v7899_v0  ;;  %v7337_v31 = vunpack.c.l.bf16 %v7875_v61  ;;  %v7430_v39 = vunpack.c.h.bf16 %v7898_v24  ;;  %v7936_v0 = vld [vmem:[%s9706_s3 + $0x6f0] sm:$0xff]  }
 0x2f0   :  { %8333 = vmatpush3.msra.mxu0 %v7350_v33  ;;  %8368 = vmatpush3.msra.mxu1 %v7414_v36  ;;  %v7890_v33 = vld [vmem:[%s9706_s3 + $0x580] sm:$0xff]   ;;  %v7401_v36 = vunpack.c.l.bf16 %v7891_v10  ;;  %v3804_v53 = vadd.f32 %v9044_v7, %v682_v30  ;;  %v7929_v7 = vld [vmem:[%s9706_s3 + $0x6b8] sm:$0xff]   ;;  %v7928_v10 = vld [vmem:[%s9706_s3 + $0x6b0] sm:$0xff]   ;;  %v7581_v30 = vunpack.c.l.bf16 %v7936_v0 }
 0x2f1   :  { %8334 = vmatprep.subr.mxu0 %v7381_v38  ;;  %8369 = vmatprep.subr.mxu1 %v7445_v41  ;;  %v7366_v38 = vunpack.c.h.bf16 %v7882_v18  ;;  %v7334_v41 = vunpack.c.h.bf16 %v7874_v25  ;;  %v7397_v47 = vunpack.c.l.bf16 %v7890_v33 }
 0x2f2   :  { %8335 = vmatpush3.msra.mxu0 %v7349_v19  ;;  %8370 = vmatpush3.msra.mxu1 %v7413_v42  ;;  %v702_v42 = vrot.slane %v9463_v21, %v8776_v28  ;;  %v7913_v28 = vld [vmem:[%s9706_s3 + $0x638] sm:$0xff]   ;;  %v3996_v40 = vmax.f32 %v3804_v53, 0.0 }
 0x2f3   :  { %8336 = vmatprep.subr.mxu0 %v7378_v44  ;;  %8371 = vmatprep.subr.mxu1 %v7442_v22  ;;  %v7398_v44 = vunpack.c.h.bf16 %v7890_v33  ;;  %v7365_v22 = vunpack.c.l.bf16 %v7882_v18  ;;  %v7549_v33 = vunpack.c.l.bf16 %v7928_v10 }
 0x2f4   :  { %8337 = vmatpush3.msra.mxu0 %v7346_v27  ;;  %8372 = vmatpush3.msra.mxu1 %v7410_v16  ;;  %v7921_v27 = vld [vmem:[%s9706_s3 + $0x678] sm:$0xff]   ;;  %v7429_v16 = vunpack.c.l.bf16 %v7898_v24  ;;  %v7935_v24 = vld [vmem:[%s9706_s3 + $0x6e8] sm:$0xff]  }
 0x2f5   :  { %8338 = vmatprep.subr.mxu0 %v7377_v46  ;;  %8373 = vmatprep.subr.mxu1 %v7441_v49  ;;  %v7333_v46 = vunpack.c.l.bf16 %v7874_v25  ;;  %v7522_v51 = vunpack.c.h.bf16 %v7921_v27  ;;  %v7911_v25 = vld [vmem:[%s9706_s3 + $0x628] sm:$0xff]  }
 0x2f6   :  { %8339 = vmatpush3.msra.mxu0 %v7345_v50  ;;  %8374 = vmatpush3.msra.mxu1 %v7409_v54  ;;  %v3847_v50 = vadd.f32 %v9267_v63, %v694_v1  ;;  %v3994_v54 = vmax.f32 %v3763_v62, 0.0  ;;  %v7521_v63 = vunpack.c.l.bf16 %v7921_v27  ;;  %v7482_v1 = vunpack.c.h.bf16 %v7911_v25  ;;  %v7934_v62 = vld [vmem:[%s9706_s3 + $0x6e0] sm:$0xff]  }
 0x2f7   :  { %8340 = vmatprep.subr.mxu0 %v7374_v5  ;;  %8375 = vmatprep.subr.mxu1 %v7438_v52  ;;  %v3888_v5 = vadd.f32 %v9272_v9, %v702_v42  ;;  %v7586_v52 = vunpack.c.h.bf16 %v7937_v60  ;;  %v7912_v9 = vld [vmem:[%s9706_s3 + $0x630] sm:$0xff]   ;;  %v7910_v42 = vld [vmem:[%s9706_s3 + $0x620] sm:$0xff]  }
 0x2f8   :  { %8341 = vmatpush3.msra.mxu0 %v7342_v37  ;;  %v9459_v32 = vpop.f32.mrf.mxu0  ;;  %8376 = vmatpush3.msra.mxu1 %v7406_v58  ;;  %v9471_v13 = vpop.f32.mrf.mxu1  ;;  %v7490_v37 = vunpack.c.h.bf16 %v7913_v28  ;;  %v7554_v58 = vunpack.c.h.bf16 %v7929_v7  ;;  %v3999_v61 = vmax.f32 %v3847_v50, 0.0  ;;  %v7486_v18 = vunpack.c.h.bf16 %v7912_v9  ;;  %v7926_v27 = vld [vmem:[%s9706_s3 + $0x6a0] sm:$0xff]  }
 0x2f9   :  { %8342 = vmatprep.subr.mxu0 %v7373_v56  ;;  %8377 = vmatprep.subr.mxu1 %v7437_v2  ;;  %v7920_v56 = vld [vmem:[%s9706_s3 + $0x670] sm:$0xff]   ;;  %v7585_v2 = vunpack.c.l.bf16 %v7937_v60  ;;  %v7917_v60 = vld [vmem:[%s9706_s3 + $0x658] sm:$0xff]   ;;  %v7477_v50 = vunpack.c.l.bf16 %v7910_v42 }
 0x2fa   :  { %8343 = vmatpush3.msra.mxu0 %v7341_v3  ;;  %v9478_v55 = vpop.f32.mrf.mxu0  ;;  %8378 = vmatpush3.msra.mxu1 %v7405_v14  ;;  %v9480_v59 = vpop.f32.mrf.mxu1  ;;  %v7489_v3 = vunpack.c.l.bf16 %v7913_v28  ;;  %v4001_v14 = vmax.f32 %v3888_v5, 0.0  ;;  %v7542_v28 = vunpack.c.h.bf16 %v7926_v27  ;;  %v7506_v5 = vunpack.c.h.bf16 %v7917_v60 }
 0x2fb   :  { %8344 = vmatprep.subr.mxu0 %v7370_v12  ;;  %8379 = vmatprep.subr.mxu1 %v7434_v23  ;;  %v7553_v12 = vunpack.c.l.bf16 %v7929_v7  ;;  %v7518_v23 = vunpack.c.h.bf16 %v7920_v56  ;;  %v7909_v7 = vld [vmem:[%s9706_s3 + $0x618] sm:$0xff]  }
 0x2fc   :  { %8345 = vmatpush3.msra.mxu0 %v7338_v26  ;;  %v3930_v19 = vpop.f32.mrf.mxu0  ;;  %8380 = vmatpush3.msra.mxu1 %v7402_v11  ;;  %v3971_v45 = vpop.f32.mrf.mxu1  ;;  %v7582_v26 = vunpack.c.h.bf16 %v7936_v0  ;;  %v7550_v11 = vunpack.c.h.bf16 %v7928_v10  ;;  %v7908_v0 = vld [vmem:[%s9706_s3 + $0x610] sm:$0xff]  }
 0x2fd   :  { %8346 = vmatprep.subr.mxu0 %v7369_v6  ;;  %8381 = vmatprep.subr.mxu1 %v7433_v57  ;;  %v7517_v6 = vunpack.c.l.bf16 %v7920_v56  ;;  %v7485_v57 = vunpack.c.l.bf16 %v7912_v9  ;;  %v7513_v19 = vunpack.c.l.bf16 %v7919_v20  ;;  %v7505_v56 = vunpack.c.l.bf16 %v7917_v60 }
 0x2fe   :  { %8347 = vmatpush3.msra.mxu0 %v7337_v31  ;;  %v3931_v17 = vpop.f32.mrf.mxu0  ;;  %8382 = vmatpush3.msra.mxu1 %v7401_v36  ;;  %v3972_v49 = vpop.f32.mrf.mxu1  ;;  %v7927_v31 = vld [vmem:[%s9706_s3 + $0x6a8] sm:$0xff]   ;;  %v7514_v36 = vunpack.c.h.bf16 %v7919_v20 }
 0x2ff   :  { %8348 = vmatprep.subr.mxu0 %v7366_v38  ;;  %8383 = vmatprep.subr.mxu1 %v7430_v39  ;;  %v7578_v38 = vunpack.c.h.bf16 %v7935_v24  ;;  %v7918_v39 = vld [vmem:[%s9706_s3 + $0x660] sm:$0xff]   ;;  %v7545_v45 = vunpack.c.l.bf16 %v7927_v31  ;;  %v7573_v49 = vunpack.c.l.bf16 %v7934_v62  ;;  %v7931_v20 = vld [vmem:[%s9706_s3 + $0x6c8] sm:$0xff]  }
 0x300   :  { %8349 = vmatpush3.msra.mxu0 %v7334_v41  ;;  %8384 = vmatpush3.msra.mxu1 %v7398_v44  ;;  %v7546_v41 = vunpack.c.h.bf16 %v7927_v31  ;;  %v7577_v44 = vunpack.c.l.bf16 %v7935_v24  ;;  %v7510_v53 = vunpack.c.h.bf16 %v7918_v39  ;;  %v7509_v17 = vunpack.c.l.bf16 %v7918_v39 }
 0x301   :  { %8350 = vmatprep.subr.mxu0 %v7365_v22  ;;  %8385 = vmatprep.subr.mxu1 %v7429_v16  ;;  %v7481_v22 = vunpack.c.l.bf16 %v7911_v25  ;;  %v7574_v16 = vunpack.c.h.bf16 %v7934_v62  ;;  %v7469_v24 = vunpack.c.l.bf16 %v7908_v0  ;;  %v7923_v25 = vld [vmem:[%s9706_s3 + $0x688] sm:$0xff]   ;;  %v7562_v31 = vunpack.c.h.bf16 %v7931_v20 }
 0x302   :  { %8351 = vmatpush3.msra.mxu0 %v7333_v46  ;;  %8386 = vmatpush3.msra.mxu1 %v7397_v47  ;;  %v7478_v46 = vunpack.c.h.bf16 %v7910_v42  ;;  %v7933_v47 = vld [vmem:[%s9706_s3 + $0x6d8] sm:$0xff]   ;;  %v698_v62 = vrot.slane %v9463_v21, %v8879_v34  ;;  %v7561_v42 = vunpack.c.l.bf16 %v7931_v20 }
 0x303   :  { %5802 = vmatmul.mubr.f32.vlgmr.msra.gmra.mxu0 %v3994_v54  ;;  %5872 = vmatmul.mubr.f32.vlgmr.msra.gmra.mxu1 %v3996_v40  ;;  %v7541_v54 = vunpack.c.l.bf16 %v7926_v27  ;;  %v7916_v40 = vld [vmem:[%s9706_s3 + $0x650] sm:$0xff]   ;;  %v7569_v9 = vunpack.c.l.bf16 %v7933_v47 }
 0x304   :  { %8390 = vmatprep.subr.mxu0 %v7522_v51  ;;  %8425 = vmatprep.subr.mxu1 %v7586_v52  ;;  %v7925_v51 = vld [vmem:[%s9706_s3 + $0x698] sm:$0xff]   ;;  %v7570_v52 = vunpack.c.h.bf16 %v7933_v47  ;;  %v7502_v10 = vunpack.c.h.bf16 %v7916_v40  ;;  %v3886_v47 = vadd.f32 %v9255_v8, %v698_v62 }
 0x305   :  { %8391 = vmatpush3.msra.mxu0 %v7490_v37  ;;  %5941 = vmatprep.mubr.f32.mxu0 %v3999_v61  ;;  %v7474_v37 = vunpack.c.h.bf16 %v7909_v7  ;;  %v7473_v61 = vunpack.c.l.bf16 %v7909_v7 }
 0x306   :  { %8426 = vmatpush3.msra.mxu1 %v7554_v58  ;;  %6011 = vmatprep.mubr.f32.mxu1 %v4001_v14  ;;  %v7538_v58 = vunpack.c.h.bf16 %v7925_v51 }
 0x307   :  { %8392 = vmatprep.subr.mxu0 %v7521_v63  ;;  %8427 = vmatprep.subr.mxu1 %v7585_v2  ;;  %v7932_v63 = vld [vmem:[%s9706_s3 + $0x6d0] sm:$0xff]  }
 0x308   :  { %8393 = vmatpush3.msra.mxu0 %v7489_v3  ;;  %8428 = vmatpush3.msra.mxu1 %v7553_v12  ;;  %v7924_v2 = vld [vmem:[%s9706_s3 + $0x690] sm:$0xff]   ;;  %v7537_v3 = vunpack.c.l.bf16 %v7925_v51  ;;  %v7566_v14 = vunpack.c.h.bf16 %v7932_v63  ;;  %v7470_v12 = vunpack.c.h.bf16 %v7908_v0 }
 0x309   :  { %8394 = vmatprep.subr.mxu0 %v7518_v23  ;;  %8429 = vmatprep.subr.mxu1 %v7582_v26  ;;  %v7915_v23 = vld [vmem:[%s9706_s3 + $0x648] sm:$0xff]   ;;  %v7534_v26 = vunpack.c.h.bf16 %v7924_v2 }
 0x30a   :  { %8395 = vmatpush3.msra.mxu0 %v7486_v18  ;;  %8430 = vmatpush3.msra.mxu1 %v7550_v11  ;;  %v7501_v18 = vunpack.c.l.bf16 %v7916_v40  ;;  %v7907_v11 = vld [vmem:[%s9706_s3 + $0x608] sm:$0xff]   ;;  %v7497_v39 = vunpack.c.l.bf16 %v7915_v23  ;;  %v4000_v40 = vmax.f32 %v3886_v47, 0.0  ;;  %v7957_v47 = vld [vmem:[%s9706_s3 + $0x798] sm:$0xff]  }
 0x30b   :  { %8396 = vmatprep.subr.mxu0 %v7517_v6  ;;  %8431 = vmatprep.subr.mxu1 %v7581_v30  ;;  %v7565_v6 = vunpack.c.l.bf16 %v7932_v63  ;;  %v7533_v30 = vunpack.c.l.bf16 %v7924_v2  ;;  %v7968_v63 = vld [vmem:[%s9706_s3 + $0x7f0] sm:$0xff]  }
 0x30c   :  { %8397 = vmatpush3.msra.mxu0 %v7485_v57  ;;  %8432 = vmatpush3.msra.mxu1 %v7549_v33  ;;  %v7498_v57 = vunpack.c.h.bf16 %v7915_v23  ;;  %v7466_v33 = vunpack.c.h.bf16 %v7907_v11  ;;  %v7960_v2 = vld [vmem:[%s9706_s3 + $0x7b0] sm:$0xff]  }
 0x30d   :  { %8398 = vmatprep.subr.mxu0 %v7514_v36  ;;  %8433 = vmatprep.subr.mxu1 %v7578_v38  ;;  %v7914_v36 = vld [vmem:[%s9706_s3 + $0x640] sm:$0xff]   ;;  %v690_v38 = vrot.slane %v9463_v21, %v8870_v29 }
 0x30e   :  { %8399 = vmatpush3.msra.mxu0 %v7482_v1  ;;  %8434 = vmatpush3.msra.mxu1 %v7546_v41  ;;  %v7530_v1 = vunpack.c.h.bf16 %v7923_v25  ;;  %v7930_v41 = vld [vmem:[%s9706_s3 + $0x6c0] sm:$0xff]   ;;  %v7494_v27 = vunpack.c.h.bf16 %v7914_v36 }
 0x30f   :  { %8400 = vmatprep.subr.mxu0 %v7513_v19  ;;  %8435 = vmatprep.subr.mxu1 %v7577_v44  ;;  %v7906_v19 = vld [vmem:[%s9706_s3 + $0x600] sm:$0xff]   ;;  %v7465_v44 = vunpack.c.l.bf16 %v7907_v11  ;;  %v3845_v34 = vadd.f32 %v9250_v35, %v690_v38  ;;  %v7969_v35 = vld [vmem:[%s9706_s3 + $0x7f8] sm:$0xff]   ;;  %v7967_v11 = vld [vmem:[%s9706_s3 + $0x7e8] sm:$0xff]  }
 0x310   :  { %8401 = vmatpush3.msra.mxu0 %v7481_v22  ;;  %8436 = vmatpush3.msra.mxu1 %v7545_v45  ;;  %v7922_v29 = vld [vmem:[%s9706_s3 + $0x680] sm:$0xff]   ;;  %v7529_v22 = vunpack.c.l.bf16 %v7923_v25  ;;  %v710_v45 = vrot.slane %v9463_v21, %v8885_v43  ;;  %v7557_v43 = vunpack.c.l.bf16 %v7930_v41  ;;  %v7461_v7 = vunpack.c.l.bf16 %v7906_v19 }
 0x311   :  { %8402 = vmatprep.subr.mxu0 %v7510_v53  ;;  %8437 = vmatprep.subr.mxu1 %v7574_v16  ;;  %v7558_v53 = vunpack.c.h.bf16 %v7930_v41  ;;  %v7462_v16 = vunpack.c.h.bf16 %v7906_v19  ;;  %v7526_v60 = vunpack.c.h.bf16 %v7922_v29  ;;  %v7950_v38 = vld [vmem:[%s9706_s3 + $0x760] sm:$0xff]   ;;  %v7705_v62 = vunpack.c.l.bf16 %v7967_v11 }
 0x312   :  { %8403 = vmatpush3.msra.mxu0 %v7478_v46  ;;  %8438 = vmatpush3.msra.mxu1 %v7542_v28  ;;  %v718_v46 = vrot.slane %v9463_v21, %v8893_v48  ;;  %v7493_v28 = vunpack.c.l.bf16 %v7914_v36  ;;  %v7945_v48 = vld [vmem:[%s9706_s3 + $0x738] sm:$0xff]   ;;  %v3929_v8 = vadd.f32 %v9478_v55, %v710_v45  ;;  %v7966_v41 = vld [vmem:[%s9706_s3 + $0x7e0] sm:$0xff]  }
 0x313   :  { %8404 = vmatprep.subr.mxu0 %v7509_v17  ;;  %8439 = vmatprep.subr.mxu1 %v7573_v49  ;;  %v7953_v17 = vld [vmem:[%s9706_s3 + $0x778] sm:$0xff]   ;;  %v7525_v49 = vunpack.c.l.bf16 %v7922_v29  ;;  %v7942_v19 = vld [vmem:[%s9706_s3 + $0x720] sm:$0xff]  }
 0x314   :  { %8405 = vmatpush3.msra.mxu0 %v7477_v50  ;;  %8440 = vmatpush3.msra.mxu1 %v7541_v54  ;;  %v7961_v50 = vld [vmem:[%s9706_s3 + $0x7b8] sm:$0xff]   ;;  %v7650_v51 = vunpack.c.h.bf16 %v7953_v17  ;;  %v3998_v54 = vmax.f32 %v3845_v34, 0.0  ;;  %v7649_v55 = vunpack.c.l.bf16 %v7953_v17  ;;  %v4003_v0 = vmax.f32 %v3929_v8, 0.0 }
 0x315   :  { %8406 = vmatprep.subr.mxu0 %v7506_v5  ;;  %8441 = vmatprep.subr.mxu1 %v7570_v52  ;;  %v3970_v5 = vadd.f32 %v9480_v59, %v718_v46  ;;  %v7714_v52 = vunpack.c.h.bf16 %v7969_v35  ;;  %v7944_v59 = vld [vmem:[%s9706_s3 + $0x730] sm:$0xff]   ;;  %v7606_v45 = vunpack.c.h.bf16 %v7942_v19  ;;  %v7637_v34 = vunpack.c.l.bf16 %v7950_v38  ;;  %v7965_v46 = vld [vmem:[%s9706_s3 + $0x7d8] sm:$0xff]  }
 0x316   :  { %8407 = vmatpush3.msra.mxu0 %v7474_v37  ;;  %8442 = vmatpush3.msra.mxu1 %v7538_v58  ;;  %v7618_v37 = vunpack.c.h.bf16 %v7945_v48  ;;  %v7682_v58 = vunpack.c.h.bf16 %v7961_v50  ;;  %v7614_v23 = vunpack.c.h.bf16 %v7944_v59  ;;  %v7613_v25 = vunpack.c.l.bf16 %v7944_v59 }
 0x317   :  { %8408 = vmatprep.subr.mxu0 %v7505_v56  ;;  %8443 = vmatprep.subr.mxu1 %v7569_v9  ;;  %v7952_v56 = vld [vmem:[%s9706_s3 + $0x770] sm:$0xff]   ;;  %v7713_v9 = vunpack.c.l.bf16 %v7969_v35  ;;  %v7605_v17 = vunpack.c.l.bf16 %v7942_v19  ;;  %v7698_v35 = vunpack.c.h.bf16 %v7965_v46 }
 0x318   :  { %8409 = vmatpush3.msra.mxu0 %v7473_v61  ;;  %8444 = vmatpush3.msra.mxu1 %v7537_v3  ;;  %v7617_v61 = vunpack.c.l.bf16 %v7945_v48  ;;  %v4005_v3 = vmax.f32 %v3970_v5, 0.0  ;;  %v7645_v20 = vunpack.c.l.bf16 %v7952_v56  ;;  %v7697_v5 = vunpack.c.l.bf16 %v7965_v46 }
 0x319   :  { %8410 = vmatprep.subr.mxu0 %v7502_v10  ;;  %8445 = vmatprep.subr.mxu1 %v7566_v14  ;;  %v7681_v10 = vunpack.c.l.bf16 %v7961_v50  ;;  %v7646_v14 = vunpack.c.h.bf16 %v7952_v56  ;;  %v7666_v50 = vunpack.c.h.bf16 %v7957_v47 }
 0x31a   :  { %8411 = vmatpush3.msra.mxu0 %v7470_v12  ;;  %8446 = vmatpush3.msra.mxu1 %v7534_v26  ;;  %v7710_v12 = vunpack.c.h.bf16 %v7968_v63  ;;  %v7951_v26 = vld [vmem:[%s9706_s3 + $0x768] sm:$0xff]  }
 0x31b   :  { %8412 = vmatprep.subr.mxu0 %v7501_v18  ;;  %8447 = vmatprep.subr.mxu1 %v7565_v6  ;;  %v7678_v18 = vunpack.c.h.bf16 %v7960_v2  ;;  %v7943_v6 = vld [vmem:[%s9706_s3 + $0x728] sm:$0xff]  }
 0x31c   :  { %8413 = vmatpush3.msra.mxu0 %v7469_v24  ;;  %8448 = vmatpush3.msra.mxu1 %v7533_v30  ;;  %v7709_v24 = vunpack.c.l.bf16 %v7968_v63  ;;  %v7959_v30 = vld [vmem:[%s9706_s3 + $0x7a8] sm:$0xff]   ;;  %v7610_v36 = vunpack.c.h.bf16 %v7943_v6 }
 0x31d   :  { %8414 = vmatprep.subr.mxu0 %v7498_v57  ;;  %8449 = vmatprep.subr.mxu1 %v7562_v31  ;;  %v7677_v57 = vunpack.c.l.bf16 %v7960_v2  ;;  %v7642_v31 = vunpack.c.h.bf16 %v7951_v26  ;;  %v7673_v29 = vunpack.c.l.bf16 %v7959_v30  ;;  %v7947_v63 = vld [vmem:[%s9706_s3 + $0x748] sm:$0xff]  }
 0x31e   :  { %8415 = vmatpush3.msra.mxu0 %v7466_v33  ;;  %8450 = vmatpush3.msra.mxu1 %v7530_v1  ;;  %v7706_v33 = vunpack.c.h.bf16 %v7967_v11  ;;  %v7674_v1 = vunpack.c.h.bf16 %v7959_v30  ;;  %v714_v30 = vrot.slane %v9463_v21, %v8999_v15 }
 0x31f   :  { %8416 = vmatprep.subr.mxu0 %v7497_v39  ;;  %8451 = vmatprep.subr.mxu1 %v7561_v42  ;;  %v7641_v39 = vunpack.c.l.bf16 %v7951_v26  ;;  %v7609_v42 = vunpack.c.l.bf16 %v7943_v6  ;;  %v7625_v6 = vunpack.c.l.bf16 %v7947_v63 }
 0x320   :  { %8417 = vmatpush3.msra.mxu0 %v7465_v44  ;;  %8452 = vmatpush3.msra.mxu1 %v7529_v22  ;;  %v7958_v44 = vld [vmem:[%s9706_s3 + $0x7a0] sm:$0xff]   ;;  %v7638_v22 = vunpack.c.h.bf16 %v7950_v38 }
 0x321   :  { %8418 = vmatprep.subr.mxu0 %v7494_v27  ;;  %8453 = vmatprep.subr.mxu1 %v7558_v53  ;;  %v7702_v27 = vunpack.c.h.bf16 %v7966_v41  ;;  %v7949_v53 = vld [vmem:[%s9706_s3 + $0x758] sm:$0xff]  }
 0x322   :  { %8419 = vmatpush3.msra.mxu0 %v7462_v16  ;;  %8454 = vmatpush3.msra.mxu1 %v7526_v60  ;;  %v7670_v16 = vunpack.c.h.bf16 %v7958_v44  ;;  %v7941_v60 = vld [vmem:[%s9706_s3 + $0x718] sm:$0xff]   ;;  %v7633_v8 = vunpack.c.l.bf16 %v7949_v53 }
 0x323   :  { %8420 = vmatprep.subr.mxu0 %v7493_v28  ;;  %8455 = vmatprep.subr.mxu1 %v7557_v43  ;;  %v7701_v28 = vunpack.c.l.bf16 %v7966_v41  ;;  %v7669_v43 = vunpack.c.l.bf16 %v7958_v44  ;;  %v7602_v48 = vunpack.c.h.bf16 %v7941_v60  ;;  %v3968_v41 = vadd.f32 %v9471_v13, %v714_v30 }
 0x324   :  { %8421 = vmatpush3.msra.mxu0 %v7461_v7  ;;  %8456 = vmatpush3.msra.mxu1 %v7525_v49  ;;  %v7634_v7 = vunpack.c.h.bf16 %v7949_v53  ;;  %v7948_v49 = vld [vmem:[%s9706_s3 + $0x750] sm:$0xff]   ;;  %v6690_v53 = vld [vmem:[#allocation8] ss:$0 sm:$0xff] }
 0x325   :  { %5942 = vmatmul.mubr.f32.vlgmr.msra.gmra.mxu0 %v3998_v54  ;;  %6012 = vmatmul.mubr.f32.vlgmr.msra.gmra.mxu1 %v4000_v40  ;;  %v7940_v54 = vld [vmem:[%s9706_s3 + $0x710] sm:$0xff]   ;;  %v7665_v40 = vunpack.c.l.bf16 %v7957_v47 }
 0x326   :  { %8460 = vmatprep.subr.mxu0 %v7650_v51  ;;  %8495 = vmatprep.subr.mxu1 %v7714_v52  ;;  %v7964_v51 = vld [vmem:[%s9706_s3 + $0x7d0] sm:$0xff]   ;;  %v7601_v52 = vunpack.c.l.bf16 %v7941_v60 }
 0x327   :  { %8461 = vmatpush3.msra.mxu0 %v7618_v37  ;;  %6081 = vmatprep.mubr.f32.mxu0 %v4003_v0  ;;  %v7956_v37 = vld [vmem:[%s9706_s3 + $0x790] sm:$0xff]   ;;  %v7694_v56 = vunpack.c.h.bf16 %v7964_v51  ;;  %v7629_v0 = vunpack.c.l.bf16 %v7948_v49  ;;  %v7693_v2 = vunpack.c.l.bf16 %v7964_v51 }
 0x328   :  { %8496 = vmatpush3.msra.mxu1 %v7682_v58  ;;  %6151 = vmatprep.mubr.f32.mxu1 %v4005_v3  ;;  %v7630_v58 = vunpack.c.h.bf16 %v7948_v49  ;;  %v7662_v59 = vunpack.c.h.bf16 %v7956_v37  ;;  %v7597_v3 = vunpack.c.l.bf16 %v7940_v54 }
 0x329   :  { %8462 = vmatprep.subr.mxu0 %v7649_v55  ;;  %8497 = vmatprep.subr.mxu1 %v7713_v9  ;;  %v7598_v55 = vunpack.c.h.bf16 %v7940_v54  ;;  %v7963_v9 = vld [vmem:[%s9706_s3 + $0x7c8] sm:$0xff]  }
 0x32a   :  { %8463 = vmatpush3.msra.mxu0 %v7617_v61  ;;  %8498 = vmatpush3.msra.mxu1 %v7681_v10  ;;  %v7939_v61 = vld [vmem:[%s9706_s3 + $0x708] sm:$0xff]  }
 0x32b   :  { %8464 = vmatprep.subr.mxu0 %v7646_v14  ;;  %8499 = vmatprep.subr.mxu1 %v7710_v12  ;;  %v7955_v10 = vld [vmem:[%s9706_s3 + $0x788] sm:$0xff]   ;;  %v7661_v14 = vunpack.c.l.bf16 %v7956_v37  ;;  %v7626_v12 = vunpack.c.h.bf16 %v7947_v63  ;;  %v7594_v26 = vunpack.c.h.bf16 %v7939_v61 }
 0x32c   :  { %8465 = vmatpush3.msra.mxu0 %v7614_v23  ;;  %8500 = vmatpush3.msra.mxu1 %v7678_v18  ;;  %v7690_v23 = vunpack.c.h.bf16 %v7963_v9  ;;  %v7946_v18 = vld [vmem:[%s9706_s3 + $0x740] sm:$0xff]   ;;  %v7658_v11 = vunpack.c.h.bf16 %v7955_v10 }
 0x32d   :  { %8466 = vmatprep.subr.mxu0 %v7645_v20  ;;  %8501 = vmatprep.subr.mxu1 %v7709_v24  ;;  %v706_v20 = vrot.slane %v9463_v21, %v8990_v4  ;;  %v7962_v24 = vld [vmem:[%s9706_s3 + $0x7c0] sm:$0xff]   ;;  %v7621_v21 = vunpack.c.l.bf16 %v7946_v18 }
 0x32e   :  { %8467 = vmatpush3.msra.mxu0 %v7613_v25  ;;  %8502 = vmatpush3.msra.mxu1 %v7677_v57  ;;  %v7938_v25 = vld [vmem:[%s9706_s3 + $0x700] sm:$0xff]   ;;  %v7689_v57 = vunpack.c.l.bf16 %v7963_v9  ;;  %v7686_v38 = vunpack.c.h.bf16 %v7962_v24  ;;  %v7685_v19 = vunpack.c.l.bf16 %v7962_v24 }
 0x32f   :  { %8468 = vmatprep.subr.mxu0 %v7642_v31  ;;  %8503 = vmatprep.subr.mxu1 %v7706_v33  ;;  %v7593_v31 = vunpack.c.l.bf16 %v7939_v61  ;;  %v7954_v4 = vld [vmem:[%s9706_s3 + $0x780] sm:$0xff]   ;;  %v7657_v33 = vunpack.c.l.bf16 %v7955_v10  ;;  %s8653_s3 = smov [#allocation10]  }
 0x330   :  { %8469 = vmatpush3.msra.mxu0 %v7610_v36  ;;  %8504 = vmatpush3.msra.mxu1 %v7674_v1  ;;  %v7622_v36 = vunpack.c.h.bf16 %v7946_v18  ;;  %v7590_v1 = vunpack.c.h.bf16 %v7938_v25  ;;  %v7654_v15 = vunpack.c.h.bf16 %v7954_v4  ;;  %s6165_s6 = sshll.u32 %s8653_s3, 4  ;;  %s6166_s6 = int_to_ptr.vmem [resolvable:$true] %s6165_s6 }
 0x331   :  { %8470 = vmatprep.subr.mxu0 %v7641_v39  ;;  %8505 = vmatprep.subr.mxu1 %v7705_v62  ;;  %v3927_v39 = vadd.f32 %v9459_v32, %v706_v20  ;;  %v7589_v62 = vunpack.c.l.bf16 %v7938_v25  ;;  %v8002_v32 = vpop.f32.mrf.mxu0  ;;  %s8619_s7 = scalar_lea.vmem %s6166_s6, 128  ;;  %p8624_p7 = scmp.lt.s32.totalorder %s6166_s6, %s6166_s6 }
 0x332   :  { %8471 = vmatpush3.msra.mxu0 %v7609_v42  ;;  %8506 = vmatpush3.msra.mxu1 %v7673_v29  ;;  %v7653_v42 = vunpack.c.l.bf16 %v7954_v4  ;;  %v4004_v29 = vmax.f32 %v3968_v41, 0.0  ;;  %p8620_p6 = scmp.ne.s32.totalorder %s6166_s6, %s8619_s7  ;;  %p8625_p8 = scmp.lt.s32.totalorder %s8619_s7, %s8619_s7 }
 0x333   :  { %8472 = vmatprep.subr.mxu0 %v7638_v22  ;;  %8507 = vmatprep.subr.mxu1 %v7702_v27  ;;  %v4002_v44 = vmax.f32 %v3927_v39, 0.0  ;;  %v8003_v13 = vpop.f32.mrf.mxu0  ;;  %v8037_v22 = vpop.f32.mrf.mxu1 }
 0x334   :  { %8473 = vmatpush3.msra.mxu0 %v7606_v45  ;;  %8508 = vmatpush3.msra.mxu1 %v7670_v16  ;;  %v8004_v45 = vadd.f32 %v8003_v13, %v8002_v32  ;;  %p8626_p9 = por %p8625_p8, %p8624_p7 }
 0x335   :  { %8474 = vmatprep.subr.mxu0 %v7637_v34  ;;  %8509 = vmatprep.subr.mxu1 %v7701_v28  ;;  %v8038_v16 = vpop.f32.mrf.mxu1 }
 0x336   :  { %8475 = vmatpush3.msra.mxu0 %v7605_v17  ;;  %8510 = vmatpush3.msra.mxu1 %v7669_v43  ;;  %v5104_v46 = vadd.f32 %v8004_v45, %v6690_v53  ;;  %v8039_v17 = vadd.f32 %v8038_v16, %v8037_v22  ;;  %p8627_p10 = pnand %p8626_p9, %p8620_p6 }
 0x337   :  { %8476 = vmatprep.subr.mxu0 %v7634_v7  ;;  %8511 = vmatprep.subr.mxu1 %v7698_v35 }
 0x338   :  { %8477 = vmatpush3.msra.mxu0 %v7602_v48  ;;  %8512 = vmatpush3.msra.mxu1 %v7666_v50  ;;  %v5174_v43 = vadd.f32 %v8039_v17, %v5104_v46 }
 0x339   :  { %8478 = vmatprep.subr.mxu0 %v7633_v8  ;;  %8513 = vmatprep.subr.mxu1 %v7697_v5 }
 0x33a   :  { %8479 = vmatpush3.msra.mxu0 %v7601_v52  ;;  %8514 = vmatpush3.msra.mxu1 %v7665_v40 }
 0x33b   :  { %8480 = vmatprep.subr.mxu0 %v7630_v58  ;;  %8515 = vmatprep.subr.mxu1 %v7694_v56  ;;  %v8072_v27 = vpop.f32.mrf.mxu0  ;;  %v8107_v60 = vpop.f32.mrf.mxu1 }
 0x33c   :  { %8481 = vmatpush3.msra.mxu0 %v7598_v55  ;;  %8516 = vmatpush3.msra.mxu1 %v7662_v59 }
 0x33d   :  { %8482 = vmatprep.subr.mxu0 %v7629_v0  ;;  %8517 = vmatprep.subr.mxu1 %v7693_v2  ;;  %v8073_v34 = vpop.f32.mrf.mxu0  ;;  %v8108_v7 = vpop.f32.mrf.mxu1 }
 0x33e   :  { %8483 = vmatpush3.msra.mxu0 %v7597_v3  ;;  %8518 = vmatpush3.msra.mxu1 %v7661_v14  ;;  %v8074_v47 = vadd.f32 %v8073_v34, %v8072_v27  ;;  %v8109_v8 = vadd.f32 %v8108_v7, %v8107_v60 }
 0x33f   :  { %8484 = vmatprep.subr.mxu0 %v7626_v12  ;;  %8519 = vmatprep.subr.mxu1 %v7690_v23 }
 0x340   :  { %8485 = vmatpush3.msra.mxu0 %v7594_v26  ;;  %8520 = vmatpush3.msra.mxu1 %v7658_v11  ;;  %v5244_v48 = vadd.f32 %v8074_v47, %v5174_v43 }
 0x341   :  { %8486 = vmatprep.subr.mxu0 %v7625_v6  ;;  %8521 = vmatprep.subr.mxu1 %v7689_v57 }
 0x342   :  { %8487 = vmatpush3.msra.mxu0 %v7593_v31  ;;  %8522 = vmatpush3.msra.mxu1 %v7657_v33  ;;  %v5314_v54 = vadd.f32 %v8109_v8, %v5244_v48 }
 0x343   :  { %8488 = vmatprep.subr.mxu0 %v7622_v36  ;;  %8523 = vmatprep.subr.mxu1 %v7686_v38 }
 0x344   :  { %8489 = vmatpush3.msra.mxu0 %v7590_v1  ;;  %8524 = vmatpush3.msra.mxu1 %v7654_v15 }
 0x345   :  { %8490 = vmatprep.subr.mxu0 %v7621_v21  ;;  %8525 = vmatprep.subr.mxu1 %v7685_v19 }
 0x346   :  { %8491 = vmatpush3.msra.mxu0 %v7589_v62  ;;  %8526 = vmatpush3.msra.mxu1 %v7653_v42 }
 0x347   :  { %6082 = vmatmul.mubr.f32.vlgmr.msra.gmra.mxu0 %v4002_v44  ;;  %6152 = vmatmul.mubr.f32.vlgmr.msra.gmra.mxu1 %v4004_v29 }
 0x35d   :  { %v8142_v28 = vpop.f32.mrf.mxu0  ;;  %v8177_v49 = vpop.f32.mrf.mxu1 }
 0x35f   :  { %v8143_v35 = vpop.f32.mrf.mxu0  ;;  %v8178_v5 = vpop.f32.mrf.mxu1 }
 0x360   :  { %v8144_v51 = vadd.f32 %v8143_v35, %v8142_v28  ;;  %v8179_v56 = vadd.f32 %v8178_v5, %v8177_v49 }
 0x362   :  { %v5384_v37 = vadd.f32 %v8144_v51, %v5314_v54 }
 0x364   :  { %v5454_v63 = vadd.f32 %v8179_v56, %v5384_v37 }
 0x37f   :  { %v8212_v50 = vpop.f32.mrf.mxu0  ;;  %v8247_v40 = vpop.f32.mrf.mxu1 }
 0x381   :  { %v8213_v52 = vpop.f32.mrf.mxu0  ;;  %v8248_v59 = vpop.f32.mrf.mxu1 }
 0x382   :  { %v8214_v55 = vadd.f32 %v8213_v52, %v8212_v50  ;;  %v8249_v3 = vadd.f32 %v8248_v59, %v8247_v40 }
 0x384   :  { %v5524_v9 = vadd.f32 %v8214_v55, %v5454_v63 }
 0x386   :  { %v5594_v14 = vadd.f32 %v8249_v3, %v5524_v9 }
 0x3a1   :  { %v8282_v58 = vpop.f32.mrf.mxu0  ;;  %v8317_v61 = vpop.f32.mrf.mxu1 }
 0x3a3   :  { %v8283_v0 = vpop.f32.mrf.mxu0  ;;  %v8318_v12 = vpop.f32.mrf.mxu1 }
 0x3a4   :  { %v8284_v10 = vadd.f32 %v8283_v0, %v8282_v58  ;;  %v8319_v11 = vadd.f32 %v8318_v12, %v8317_v61 }
 0x3a6   :  { %v5664_v26 = vadd.f32 %v8284_v10, %v5594_v14 }
 0x3a8   :  { %v5734_v24 = vadd.f32 %v8319_v11, %v5664_v26 }
 0x3c3   :  { %v8352_v2 = vpop.f32.mrf.mxu0  ;;  %v8387_v18 = vpop.f32.mrf.mxu1 }
 0x3c5   :  { %v8353_v23 = vpop.f32.mrf.mxu0  ;;  %v8388_v25 = vpop.f32.mrf.mxu1 }
 0x3c6   :  { %v8354_v6 = vadd.f32 %v8353_v23, %v8352_v2  ;;  %v8389_v4 = vadd.f32 %v8388_v25, %v8387_v18 }
 0x3c8   :  { %v5804_v57 = vadd.f32 %v8354_v6, %v5734_v24 }
 0x3ca   :  { %v5874_v36 = vadd.f32 %v8389_v4, %v5804_v57 }
 0x3e5   :  { %v8422_v20 = vpop.f32.mrf.mxu0  ;;  %v8457_v31 = vpop.f32.mrf.mxu1 }
 0x3e7   :  { %v8423_v30 = vpop.f32.mrf.mxu0  ;;  %v8458_v38 = vpop.f32.mrf.mxu1 }
 0x3e8   :  { %v8424_v33 = vadd.f32 %v8423_v30, %v8422_v20  ;;  %v8459_v15 = vadd.f32 %v8458_v38, %v8457_v31 }
 0x3ea   :  { %v5944_v1 = vadd.f32 %v8424_v33, %v5874_v36 }
 0x3ec   :  { %v6014_v19 = vadd.f32 %v8459_v15, %v5944_v1 }
 0x407   :  { %v8492_v39 = vpop.f32.mrf.mxu0  ;;  %v8527_v21 = vpop.f32.mrf.mxu1 }
 0x409   :  { %v8493_v41 = vpop.f32.mrf.mxu0  ;;  %v8528_v42 = vpop.f32.mrf.mxu1 }
 0x40a   :  { %v8494_v62 = vadd.f32 %v8493_v41, %v8492_v39  ;;  %v8529_v29 = vadd.f32 %v8528_v42, %v8527_v21 }
 0x40c   :  { %v6084_v44 = vadd.f32 %v8494_v62, %v6014_v19 }
 0x40e   :  { %v6154_v32 = vadd.f32 %v8529_v29, %v6084_v44 }
 0x410   :  { %6158 = vst.msk [vmem:[#allocation10] sm:$0xff] %vm6157_vm0, %v6154_v32 }
 0x411   :  { %8630 = shalt.err (!%p8627_p10)
}
 0x412   :  { %6168 = dma.vmem_to_hbm [thread:$0]  %s6166_s6, 128, %s9708_s5, [#allocation4]  }
 0x413   :  { %8645 = dma.done.wait [#allocation4], 128  }
 0x414   :  { %8646 = vsyncadd [#allocation4], 4294967168 }
 0x415   :  { %6172 = vsyncpa [#allocation3], 1 }
 0x416   :  { %6173 = vsyncpa [#allocation6], 1 }
 0x417   :  { %6174 = vsyncpa [#allocation9], 1 }
 0x418   :  { %6175 = vsyncpa [#allocation4], 1 }

</bundles_post_ra>
